<compile_context>
chip_gen: v6e
topology: v6e:2x2x1
jax: 0.10.0
libtpu: 0.0.40
codegen_flags: <defaults>
</compile_context>

<pallas_src>
import functools

import jax
import jax.numpy as jnp
from jax.experimental import pallas as pl
from jax.experimental.pallas import tpu as pltpu


# ----------------------------------------------------------------------------
# Pallas kernels
# ----------------------------------------------------------------------------
def _matmul_t_kernel(w_ref, p_ref, b_ref, o_ref, *, relu):
    """o = relu(w @ p + b): w (OC,K), p (K,Mblk), b (OC,1), o (OC,Mblk).

    Channel-major output: the lane axis is the large M = N*OH*OW dimension,
    so stores are lane-dense (unmasked vst) instead of 8/16-lane masked ones.
    """
    acc = jnp.dot(w_ref[...], p_ref[...], preferred_element_type=jnp.float32)
    acc = acc + b_ref[...]
    if relu:
        acc = jnp.maximum(acc, 0.0)
    o_ref[...] = acc.astype(o_ref.dtype)


def conv_matmul_t(p_t, w, b, *, relu=True, out_dtype=jnp.float32,
                  compute_dtype=jnp.bfloat16):
    """Conv-as-matmul, channel-major: returns (OC, M) = w_flat @ p_t + b."""
    OC = w.shape[0]
    K, M = p_t.shape
    wm = w.reshape(OC, K).astype(compute_dtype)
    pm = p_t.astype(compute_dtype)
    bc = b.reshape(OC, 1).astype(jnp.float32)

    # >=2 lane-dense M blocks when the problem is big enough (keeps both v7x
    # TensorCores busy); otherwise one full-M block.  Never needs padding.
    nblk = 2 if (M >= 2048 and M % 256 == 0) else 1
    blk = M // nblk

    isz = jnp.dtype(compute_dtype).itemsize
    cost = pl.CostEstimate(
        flops=2 * OC * K * M,
        transcendentals=0,
        bytes_accessed=K * M * isz + OC * K * isz
        + OC * M * jnp.dtype(out_dtype).itemsize + OC * 4)

    return pl.pallas_call(
        functools.partial(_matmul_t_kernel, relu=relu),
        out_shape=jax.ShapeDtypeStruct((OC, M), out_dtype),
        grid=(nblk,),
        in_specs=[
            pl.BlockSpec((OC, K), lambda i: (0, 0)),
            pl.BlockSpec((K, blk), lambda i: (0, i)),
            pl.BlockSpec((OC, 1), lambda i: (0, 0)),
        ],
        out_specs=pl.BlockSpec((OC, blk), lambda i: (0, i)),
        compiler_params=pltpu.CompilerParams(
            dimension_semantics=("parallel",)),
        cost_estimate=cost,
    )(wm, pm, bc)


def _rnn_head_kernel(flat_ref, act_ref, fcw_ref, fcb_ref,
                     wif_ref, whf_ref, bif_ref, bhf_ref,
                     wib_ref, whb_ref, bib_ref, bhb_ref,
                     hw_ref, hb_ref, o_ref, *, T, B, H, F):
    """fc + ReLU + nan_to_num + bidirectional GRU (last step) + fused heads."""
    flat = flat_ref[...]                                     # (T*B, 512)
    feats = jnp.dot(flat, fcw_ref[...], preferred_element_type=jnp.float32)
    feats = jnp.maximum(feats + fcb_ref[...], 0.0)
    # torch.nan_to_num(nan=0, posinf=1, neginf=-1); -inf cannot survive ReLU
    # but keep the full mapping for exactness.
    feats = jnp.where(feats != feats, 0.0, feats)            # NaN  -> 0
    feats = jnp.where(feats == jnp.inf, 1.0, feats)          # +inf -> 1
    feats = jnp.where(feats == -jnp.inf, -1.0, feats)        # -inf -> -1

    act = act_ref[...]                                       # (T*B, A)

    def gru_cell(xp, h, wh, bh):
        # xp already holds W_i x + b_i for the three gates [r | z | n].
        hp = jnp.dot(h, wh, preferred_element_type=jnp.float32) + bh
        r = jax.nn.sigmoid(xp[:, 0:H] + hp[:, 0:H])
        z = jax.nn.sigmoid(xp[:, H:2 * H] + hp[:, H:2 * H])
        n = jnp.tanh(xp[:, 2 * H:3 * H] + r * hp[:, 2 * H:3 * H])
        return (1.0 - z) * n + z * h

    # Forward direction: input-gate projections for all T hoisted out of the
    # recurrence (one matmul for every frame); single fused (H,3H) hidden
    # matmul per step.  Feature/action split of the weight rows avoids an
    # in-kernel lane concat of two narrow arrays.
    wif = wif_ref[...]
    xproj = (jnp.dot(feats, wif[0:F, :], preferred_element_type=jnp.float32)
             + jnp.dot(act, wif[F:, :], preferred_element_type=jnp.float32)
             + bif_ref[...])                                 # (T*B, 3H)
    whf = whf_ref[...]
    bhf = bhf_ref[...]
    h = jnp.zeros((B, H), jnp.float32)
    for t in range(T):           # static unroll; T is small and trace-time
        h = gru_cell(xproj[t * B:(t + 1) * B, :], h, whf, bhf)

    # Backward direction: rnn_output[:, -1, :] for the reverse direction is a
    # single cell step on x[T-1] from a zero hidden state.
    wib = wib_ref[...]
    xb = (jnp.dot(feats[(T - 1) * B:, :], wib[0:F, :],
                  preferred_element_type=jnp.float32)
          + jnp.dot(act[(T - 1) * B:, :], wib[F:, :],
                    preferred_element_type=jnp.float32)
          + bib_ref[...])
    h_b = gru_cell(xb, jnp.zeros((B, H), jnp.float32),
                   whb_ref[...], bhb_ref[...])

    # Fused heads (discrete logits + K mean heads + K logstd heads) on
    # rnn_last = [h_fwd | h_bwd]; the concat is avoided by splitting the
    # fused head weight along its input rows.
    hw = hw_ref[...]
    out = (jnp.dot(h, hw[0:H, :], preferred_element_type=jnp.float32)
           + jnp.dot(h_b, hw[H:, :], preferred_element_type=jnp.float32)
           + hb_ref[...])
    o_ref[...] = out.astype(o_ref.dtype)


def rnn_head_pallas(flat_tb, act_tb, fc_wt, fc_b, gru_f, gru_b,
                    head_w, head_b, *, T, B):
    F = fc_wt.shape[1]
    H = gru_f[1].shape[0]
    NH = head_w.shape[1]
    wif, whf, bif, bhf = gru_f
    wib, whb, bib, bhb = gru_b
    return pl.pallas_call(
        functools.partial(_rnn_head_kernel, T=T, B=B, H=H, F=F),
        out_shape=jax.ShapeDtypeStruct((B, NH), jnp.float32),
    )(flat_tb, act_tb, fc_wt, fc_b.reshape(1, -1),
      wif, whf, bif.reshape(1, -1), bhf.reshape(1, -1),
      wib, whb, bib.reshape(1, -1), bhb.reshape(1, -1),
      head_w, head_b.reshape(1, -1))


# ----------------------------------------------------------------------------
# Channel-major im2col glue (JAX): builds P^T = (C*k*k, N*OH*OW)
# ----------------------------------------------------------------------------
def _patches_t_nchw(x, k):
    """Non-overlapping k-stride patches of an NCHW input, channel-major."""
    N, C, H, W = x.shape
    OH, OW = H // k, W // k
    p = x.reshape(N, C, OH, k, OW, k).transpose(1, 3, 5, 0, 2, 4)
    return p.reshape(C * k * k, N * OH * OW), (OH, OW)


def _patches_t_cm(y, N, H, W, k):
    """Same, for an activation already in channel-major (C, N*H*W) layout."""
    C = y.shape[0]
    OH, OW = H // k, W // k
    p = y.reshape(C, N, OH, k, OW, k).transpose(0, 3, 5, 1, 2, 4)
    return p.reshape(C * k * k, N * OH * OW), (OH, OW)


def _patches_t_overlap_cm(y, N, H, W, k, s):
    """Overlapping (kernel k, stride s) patches of a channel-major activation."""
    C = y.shape[0]
    OH = (H - k) // s + 1
    OW = (W - k) // s + 1
    yr = y.reshape(C, N, H, W)
    # TODO(synk): 16 static slices are fine at 4x4 outputs; switch to
    # lax.conv_general_dilated_patches if the spatial size ever grows.
    taps = []
    for kh in range(k):
        for kw in range(k):
            taps.append(yr[:, :, kh:kh + s * (OH - 1) + 1:s,
                           kw:kw + s * (OW - 1) + 1:s])
    p = jnp.stack(taps, axis=1)                    # (C, k*k, N, OH, OW)
    return p.reshape(C * k * k, N * OH * OW), (OH, OW)


# ----------------------------------------------------------------------------
# Parameter init (deterministic) + BatchNorm folding + weight packing
# ----------------------------------------------------------------------------
def _fold_bn_post(w, b, gamma, beta, mean, var, eps=1e-5):
    """conv -> BN(eval): fold per-output-channel affine into conv."""
    s = gamma / jnp.sqrt(var + eps)
    return w * s[:, None, None, None], b * s + (beta - mean * s)


def _fold_bn_pre(w, b, gamma, beta, mean, var, eps=1e-5):
    """BN(eval) -> conv: fold per-input-channel affine into conv."""
    s = gamma / jnp.sqrt(var + eps)
    t = beta - mean * s
    w2 = w * s[None, :, None, None]
    b2 = b + jnp.sum(w * t[None, :, None, None], axis=(1, 2, 3))
    return w2, b2


def build_params(key, action_dim, latent_dim, discrete_option):
    ks = jax.random.split(key, 32)

    def nrm(k, shape, scale=0.1):
        return scale * jax.random.normal(k, shape, dtype=jnp.float32)

    # conv params, PyTorch layout (OC, IC, KH, KW)
    w1, b1 = nrm(ks[0], (8, 3, 4, 4)), nrm(ks[1], (8,))
    w2, b2 = nrm(ks[2], (16, 8, 4, 4)), nrm(ks[3], (16,))
    w3, b3 = nrm(ks[4], (32, 16, 4, 4)), nrm(ks[5], (32,))

    # BatchNorm affine params (eval mode: running_mean=0, running_var=1)
    bn = {}
    for i, c in [(0, 3), (1, 8), (2, 16), (3, 32)]:
        bn[f"g{i}"] = 1.0 + nrm(ks[6 + i], (c,), 0.05)
        bn[f"b{i}"] = nrm(ks[10 + i], (c,), 0.05)
        bn[f"m{i}"] = jnp.zeros((c,), jnp.float32)
        bn[f"v{i}"] = jnp.ones((c,), jnp.float32)

    w1, b1 = _fold_bn_pre(w1, b1, bn["g0"], bn["b0"], bn["m0"], bn["v0"])
    w1, b1 = _fold_bn_post(w1, b1, bn["g1"], bn["b1"], bn["m1"], bn["v1"])
    w2, b2 = _fold_bn_post(w2, b2, bn["g2"], bn["b2"], bn["m2"], bn["v2"])
    w3, b3 = _fold_bn_post(w3, b3, bn["g3"], bn["b3"], bn["m3"], bn["v3"])

    p = {"cw1": w1, "cb1": b1, "cw2": w2, "cb2": b2, "cw3": w3, "cb3": b3}

    fc_w, fc_b = nrm(ks[14], (16, 512)), nrm(ks[15], (16,))
    p["fc_wT"], p["fc_b"] = fc_w.T, fc_b

    I, H = 16 + action_dim, 16

    # PyTorch GRU layout: weight_ih (3H, I), weight_hh (3H, H), gates [r|z|n].
    def pack_dir(k0):
        wih = nrm(ks[k0], (3 * H, I))
        whh = nrm(ks[k0 + 1], (3 * H, H))
        bih = nrm(ks[k0 + 2], (3 * H,))
        bhh = nrm(ks[k0 + 3], (3 * H,))
        return (wih.T, whh.T, bih, bhh)          # fused [r|z|n] columns

    p["gru_f"] = pack_dir(16)
    p["gru_b"] = pack_dir(20)

    K, L = discrete_option, latent_dim
    disc_w, disc_b = nrm(ks[24], (K, 2 * H)), nrm(ks[25], (K,))
    mean_w, mean_b = nrm(ks[26], (K, L, 2 * H)), nrm(ks[27], (K, L))
    lstd_w, lstd_b = nrm(ks[28], (K, L, 2 * H)), nrm(ks[29], (K, L))
    p["head_w"] = jnp.concatenate(
        [disc_w.T,
         jnp.transpose(mean_w, (2, 0, 1)).reshape(2 * H, K * L),
         jnp.transpose(lstd_w, (2, 0, 1)).reshape(2 * H, K * L)], axis=1)
    p["head_b"] = jnp.concatenate(
        [disc_b, mean_b.reshape(-1), lstd_b.reshape(-1)])
    return p


# ----------------------------------------------------------------------------
# Forward pass
# ----------------------------------------------------------------------------
@functools.partial(jax.jit, static_argnames=("latent_dim", "discrete_option"))
def encoder_forward(params, state, action, key, *, latent_dim, discrete_option):
    B, T, C, H, W = state.shape
    N = B * T
    x = state.reshape(N, C, H, W)

    # bev_layer: BNs folded, ReLU fused into the Pallas matmul kernels,
    # channel-major activations throughout (lane axis = N*OH*OW).
    p1, (oh1, ow1) = _patches_t_nchw(x, 4)
    y1 = conv_matmul_t(p1, params["cw1"], params["cb1"], out_dtype=jnp.bfloat16)
    p2, (oh2, ow2) = _patches_t_cm(y1, N, oh1, ow1, 4)
    y2 = conv_matmul_t(p2, params["cw2"], params["cb2"], out_dtype=jnp.bfloat16)
    p3, (oh3, ow3) = _patches_t_overlap_cm(y2, N, oh2, ow2, 4, 2)
    y3 = conv_matmul_t(p3, params["cw3"], params["cb3"], out_dtype=jnp.float32)

    # AdaptiveAvgPool2d((4,4)) is the identity for 160x160 inputs.
    # TODO(synk): real adaptive average pool for other spatial sizes.
    assert oh3 == 4 and ow3 == 4

    # time-major (T*B, 32*4*4) with per-frame NCHW flatten order, feeding the
    # single fused fc + GRU + heads kernel.
    flat_tb = (y3.reshape(32, B, T, oh3 * ow3)
                 .transpose(2, 1, 0, 3)
                 .reshape(T * B, 32 * oh3 * ow3)
                 .astype(jnp.float32))
    act_tb = jnp.transpose(action, (1, 0, 2)).reshape(T * B, -1)

    head_out = rnn_head_pallas(flat_tb, act_tb, params["fc_wT"], params["fc_b"],
                               params["gru_f"], params["gru_b"],
                               params["head_w"], params["head_b"], T=T, B=B)

    K, L = discrete_option, latent_dim
    logits = head_out[:, :K]
    z_means = head_out[:, K:K + K * L].reshape(B, K, L)
    z_stds = jnp.exp(head_out[:, K + K * L:].reshape(B, K, L))

    kg, kn = jax.random.split(key)
    g = jax.random.gumbel(kg, logits.shape, dtype=logits.dtype)
    y_soft = jax.nn.softmax(logits + g, axis=-1)             # tau = 1.0
    discrete_y = jax.nn.one_hot(jnp.argmax(y_soft, axis=-1), K,
                                dtype=logits.dtype)
    # TODO(synk): straight-through estimator omitted (forward-only kernel).

    z_mean = jnp.sum(discrete_y[:, :, None] * z_means, axis=1)
    z_std = jnp.sum(discrete_y[:, :, None] * z_stds, axis=1)
    z = z_mean + z_std * jax.random.normal(kn, z_std.shape, dtype=z_std.dtype)
    return z, logits, z_mean, z_std


if __name__ == "__main__":
    B, T = 2, 4
    Hs = Ws = 160                      # chosen so the conv stack yields 4x4 maps
    action_dim, latent_dim, discrete_option = 4, 8, 3

    key = jax.random.PRNGKey(0)
    kp, kstate, kact, kfwd = jax.random.split(key, 4)

    params = build_params(kp, action_dim, latent_dim, discrete_option)
    state = jax.random.normal(kstate, (B, T, 3, Hs, Ws), dtype=jnp.float32)
    action = jax.random.normal(kact, (B, T, action_dim), dtype=jnp.float32)

    z, logits, z_mean, z_std = encoder_forward(
        params, state, action, kfwd,
        latent_dim=latent_dim, discrete_option=discrete_option)
    jax.block_until_ready((z, logits, z_mean, z_std))
    print("KERNEL_OK")
</pallas_src>

<mosaic_0001>
module attributes {stable_mosaic.version = 11 : i64} {
  func.func @_matmul_t_kernel(%arg0: i32, %arg1: memref<8x48xbf16, #tpu.memory_space<vmem>>, %arg2: memref<48x6400xbf16, #tpu.memory_space<vmem>>, %arg3: memref<8x1xf32, #tpu.memory_space<vmem>>, %arg4: memref<8x6400xbf16, #tpu.memory_space<vmem>>) attributes {dimension_semantics = [#tpu.dimension_semantics<parallel>], iteration_bounds = array<i64: 2>, scalar_prefetch = 0 : i64, scratch_operands = 0 : i64, tpu.core_type = #tpu.core_type<tc>, window_params = [{pipeline_mode = #tpu.pipeline_mode<synchronous>, transform_indices = @transform_0, window_bounds = array<i64: 8, 48>}, {transform_indices = @transform_1, window_bounds = array<i64: 48, 6400>}, {pipeline_mode = #tpu.pipeline_mode<synchronous>, transform_indices = @transform_2, window_bounds = array<i64: 8, 1>}, {transform_indices = @transform_3, window_bounds = array<i64: 8, 6400>}]} {
    %c0 = arith.constant 0 : index
    %c0_0 = arith.constant 0 : index
    %0 = vector.load %arg1[%c0, %c0_0] : memref<8x48xbf16, #tpu.memory_space<vmem>>, vector<8x48xbf16>
    %c0_1 = arith.constant 0 : index
    %c0_2 = arith.constant 0 : index
    %1 = vector.load %arg2[%c0_1, %c0_2] : memref<48x6400xbf16, #tpu.memory_space<vmem>>, vector<48x6400xbf16>
    %cst = arith.constant dense<0.000000e+00> : vector<8x6400xf32>
    %2 = tpu.matmul %0, %1, %cst {dimension_numbers = #tpu.dot_dimension_numbers<[1], [0], [0], [1], [0, 0, 1, 1], [], []>} : vector<8x48xbf16>, vector<48x6400xbf16>, vector<8x6400xf32> -> vector<8x6400xf32>
    %c0_3 = arith.constant 0 : index
    %c0_4 = arith.constant 0 : index
    %3 = vector.load %arg3[%c0_3, %c0_4] : memref<8x1xf32, #tpu.memory_space<vmem>>, vector<8x1xf32>
    %4 = vector.broadcast %3 : vector<8x1xf32> to vector<8x6400xf32>
    %5 = arith.addf %2, %4 : vector<8x6400xf32>
    %cst_5 = arith.constant 0.000000e+00 : f32
    %6 = vector.broadcast %cst_5 : f32 to vector<8x6400xf32>
    %7 = arith.maximumf %5, %6 : vector<8x6400xf32>
    %8 = arith.truncf %7 : vector<8x6400xf32> to vector<8x6400xbf16>
    %c0_6 = arith.constant 0 : index
    %c0_7 = arith.constant 0 : index
    %9 = vector.load %arg4[%c0_6, %c0_7] : memref<8x6400xbf16, #tpu.memory_space<vmem>>, vector<8x6400xbf16>
    tpu.vector_store %arg4[%c0_6, %c0_7], %8 {strides = array<i32>} : memref<8x6400xbf16, #tpu.memory_space<vmem>>, vector<8x6400xbf16>,
    return
  }
  func.func @transform_0(%arg0: i32) -> (i32, i32) {
    %c0_i32 = arith.constant 0 : i32
    %c0_i32_0 = arith.constant 0 : i32
    %c0_i32_1 = arith.constant 0 : i32
    return %c0_i32, %c0_i32_0 : i32, i32
  }
  func.func @transform_1(%arg0: i32) -> (i32, i32) {
    %c0_i32 = arith.constant 0 : i32
    %c0_i32_0 = arith.constant 0 : i32
    return %c0_i32, %arg0 : i32, i32
  }
  func.func @transform_2(%arg0: i32) -> (i32, i32) {
    %c0_i32 = arith.constant 0 : i32
    %c0_i32_0 = arith.constant 0 : i32
    %c0_i32_1 = arith.constant 0 : i32
    return %c0_i32, %c0_i32_0 : i32, i32
  }
  func.func @transform_3(%arg0: i32) -> (i32, i32) {
    %c0_i32 = arith.constant 0 : i32
    %c0_i32_0 = arith.constant 0 : i32
    return %c0_i32, %arg0 : i32, i32
  }
}

module attributes {stable_mosaic.version = 11 : i64} {
  func.func @_matmul_t_kernel(%arg0: i32, %arg1: memref<16x128xbf16, #tpu.memory_space<vmem>>, %arg2: memref<128x800xbf16, #tpu.memory_space<vmem>>, %arg3: memref<16x1xf32, #tpu.memory_space<vmem>>, %arg4: memref<16x800xbf16, #tpu.memory_space<vmem>>) attributes {dimension_semantics = [#tpu.dimension_semantics<parallel>], iteration_bounds = array<i64: 1>, scalar_prefetch = 0 : i64, scratch_operands = 0 : i64, tpu.core_type = #tpu.core_type<tc>, window_params = [{pipeline_mode = #tpu.pipeline_mode<synchronous>, transform_indices = @transform_0, window_bounds = array<i64: 16, 128>}, {transform_indices = @transform_1, window_bounds = array<i64: 128, 800>}, {pipeline_mode = #tpu.pipeline_mode<synchronous>, transform_indices = @transform_2, window_bounds = array<i64: 16, 1>}, {transform_indices = @transform_3, window_bounds = array<i64: 16, 800>}]} {
    %c0 = arith.constant 0 : index
    %c0_0 = arith.constant 0 : index
    %0 = vector.load %arg1[%c0, %c0_0] : memref<16x128xbf16, #tpu.memory_space<vmem>>, vector<16x128xbf16>
    %c0_1 = arith.constant 0 : index
    %c0_2 = arith.constant 0 : index
    %1 = vector.load %arg2[%c0_1, %c0_2] : memref<128x800xbf16, #tpu.memory_space<vmem>>, vector<128x800xbf16>
    %cst = arith.constant dense<0.000000e+00> : vector<16x800xf32>
    %2 = tpu.matmul %0, %1, %cst {dimension_numbers = #tpu.dot_dimension_numbers<[1], [0], [0], [1], [0, 0, 1, 1], [], []>} : vector<16x128xbf16>, vector<128x800xbf16>, vector<16x800xf32> -> vector<16x800xf32>
    %c0_3 = arith.constant 0 : index
    %c0_4 = arith.constant 0 : index
    %3 = vector.load %arg3[%c0_3, %c0_4] : memref<16x1xf32, #tpu.memory_space<vmem>>, vector<16x1xf32>
    %4 = vector.broadcast %3 : vector<16x1xf32> to vector<16x800xf32>
    %5 = arith.addf %2, %4 : vector<16x800xf32>
    %cst_5 = arith.constant 0.000000e+00 : f32
    %6 = vector.broadcast %cst_5 : f32 to vector<16x800xf32>
    %7 = arith.maximumf %5, %6 : vector<16x800xf32>
    %8 = arith.truncf %7 : vector<16x800xf32> to vector<16x800xbf16>
    %c0_6 = arith.constant 0 : index
    %c0_7 = arith.constant 0 : index
    %9 = vector.load %arg4[%c0_6, %c0_7] : memref<16x800xbf16, #tpu.memory_space<vmem>>, vector<16x800xbf16>
    tpu.vector_store %arg4[%c0_6, %c0_7], %8 {strides = array<i32>} : memref<16x800xbf16, #tpu.memory_space<vmem>>, vector<16x800xbf16>,
    return
  }
  func.func @transform_0(%arg0: i32) -> (i32, i32) {
    %c0_i32 = arith.constant 0 : i32
    %c0_i32_0 = arith.constant 0 : i32
    %c0_i32_1 = arith.constant 0 : i32
    return %c0_i32, %c0_i32_0 : i32, i32
  }
  func.func @transform_1(%arg0: i32) -> (i32, i32) {
    %c0_i32 = arith.constant 0 : i32
    %c0_i32_0 = arith.constant 0 : i32
    return %c0_i32, %arg0 : i32, i32
  }
  func.func @transform_2(%arg0: i32) -> (i32, i32) {
    %c0_i32 = arith.constant 0 : i32
    %c0_i32_0 = arith.constant 0 : i32
    %c0_i32_1 = arith.constant 0 : i32
    return %c0_i32, %c0_i32_0 : i32, i32
  }
  func.func @transform_3(%arg0: i32) -> (i32, i32) {
    %c0_i32 = arith.constant 0 : i32
    %c0_i32_0 = arith.constant 0 : i32
    return %c0_i32, %arg0 : i32, i32
  }
}

module attributes {stable_mosaic.version = 11 : i64} {
  func.func @_matmul_t_kernel(%arg0: i32, %arg1: memref<32x256xbf16, #tpu.memory_space<vmem>>, %arg2: memref<256x128xbf16, #tpu.memory_space<vmem>>, %arg3: memref<32x1xf32, #tpu.memory_space<vmem>>, %arg4: memref<32x128xf32, #tpu.memory_space<vmem>>) attributes {dimension_semantics = [#tpu.dimension_semantics<parallel>], iteration_bounds = array<i64: 1>, scalar_prefetch = 0 : i64, scratch_operands = 0 : i64, tpu.core_type = #tpu.core_type<tc>, window_params = [{pipeline_mode = #tpu.pipeline_mode<synchronous>, transform_indices = @transform_0, window_bounds = array<i64: 32, 256>}, {transform_indices = @transform_1, window_bounds = array<i64: 256, 128>}, {pipeline_mode = #tpu.pipeline_mode<synchronous>, transform_indices = @transform_2, window_bounds = array<i64: 32, 1>}, {transform_indices = @transform_3, window_bounds = array<i64: 32, 128>}]} {
    %c0 = arith.constant 0 : index
    %c0_0 = arith.constant 0 : index
    %0 = vector.load %arg1[%c0, %c0_0] : memref<32x256xbf16, #tpu.memory_space<vmem>>, vector<32x256xbf16>
    %c0_1 = arith.constant 0 : index
    %c0_2 = arith.constant 0 : index
    %1 = vector.load %arg2[%c0_1, %c0_2] : memref<256x128xbf16, #tpu.memory_space<vmem>>, vector<256x128xbf16>
    %cst = arith.constant dense<0.000000e+00> : vector<32x128xf32>
    %2 = tpu.matmul %0, %1, %cst {dimension_numbers = #tpu.dot_dimension_numbers<[1], [0], [0], [1], [0, 0, 1, 1], [], []>} : vector<32x256xbf16>, vector<256x128xbf16>, vector<32x128xf32> -> vector<32x128xf32>
    %c0_3 = arith.constant 0 : index
    %c0_4 = arith.constant 0 : index
    %3 = vector.load %arg3[%c0_3, %c0_4] : memref<32x1xf32, #tpu.memory_space<vmem>>, vector<32x1xf32>
    %4 = vector.broadcast %3 : vector<32x1xf32> to vector<32x128xf32>
    %5 = arith.addf %2, %4 : vector<32x128xf32>
    %cst_5 = arith.constant 0.000000e+00 : f32
    %6 = vector.broadcast %cst_5 : f32 to vector<32x128xf32>
    %7 = arith.maximumf %5, %6 : vector<32x128xf32>
    %c0_6 = arith.constant 0 : index
    %c0_7 = arith.constant 0 : index
    %8 = vector.load %arg4[%c0_6, %c0_7] : memref<32x128xf32, #tpu.memory_space<vmem>>, vector<32x128xf32>
    tpu.vector_store %arg4[%c0_6, %c0_7], %7 {strides = array<i32>} : memref<32x128xf32, #tpu.memory_space<vmem>>, vector<32x128xf32>,
    return
  }
  func.func @transform_0(%arg0: i32) -> (i32, i32) {
    %c0_i32 = arith.constant 0 : i32
    %c0_i32_0 = arith.constant 0 : i32
    %c0_i32_1 = arith.constant 0 : i32
    return %c0_i32, %c0_i32_0 : i32, i32
  }
  func.func @transform_1(%arg0: i32) -> (i32, i32) {
    %c0_i32 = arith.constant 0 : i32
    %c0_i32_0 = arith.constant 0 : i32
    return %c0_i32, %arg0 : i32, i32
  }
  func.func @transform_2(%arg0: i32) -> (i32, i32) {
    %c0_i32 = arith.constant 0 : i32
    %c0_i32_0 = arith.constant 0 : i32
    %c0_i32_1 = arith.constant 0 : i32
    return %c0_i32, %c0_i32_0 : i32, i32
  }
  func.func @transform_3(%arg0: i32) -> (i32, i32) {
    %c0_i32 = arith.constant 0 : i32
    %c0_i32_0 = arith.constant 0 : i32
    return %c0_i32, %arg0 : i32, i32
  }
}

module attributes {stable_mosaic.version = 11 : i64} {
  func.func @_rnn_head_kernel(%arg0: memref<8x512xf32, #tpu.memory_space<vmem>>, %arg1: memref<8x4xf32, #tpu.memory_space<vmem>>, %arg2: memref<512x16xf32, #tpu.memory_space<vmem>>, %arg3: memref<1x16xf32, #tpu.memory_space<vmem>>, %arg4: memref<20x48xf32, #tpu.memory_space<vmem>>, %arg5: memref<16x48xf32, #tpu.memory_space<vmem>>, %arg6: memref<1x48xf32, #tpu.memory_space<vmem>>, %arg7: memref<1x48xf32, #tpu.memory_space<vmem>>, %arg8: memref<20x48xf32, #tpu.memory_space<vmem>>, %arg9: memref<16x48xf32, #tpu.memory_space<vmem>>, %arg10: memref<1x48xf32, #tpu.memory_space<vmem>>, %arg11: memref<1x48xf32, #tpu.memory_space<vmem>>, %arg12: memref<32x51xf32, #tpu.memory_space<vmem>>, %arg13: memref<1x51xf32, #tpu.memory_space<vmem>>, %arg14: memref<2x51xf32, #tpu.memory_space<vmem>>) attributes {dimension_semantics = [], scalar_prefetch = 0 : i64, scratch_operands = 0 : i64, tpu.core_type = #tpu.core_type<tc>} {
    %c0 = arith.constant 0 : index
    %c0_0 = arith.constant 0 : index
    %0 = vector.load %arg0[%c0, %c0_0] : memref<8x512xf32, #tpu.memory_space<vmem>>, vector<8x512xf32>
    %c0_1 = arith.constant 0 : index
    %c0_2 = arith.constant 0 : index
    %1 = vector.load %arg2[%c0_1, %c0_2] : memref<512x16xf32, #tpu.memory_space<vmem>>, vector<512x16xf32>
    %cst = arith.constant dense<0.000000e+00> : vector<8x16xf32>
    %2 = tpu.matmul %0, %1, %cst {dimension_numbers = #tpu.dot_dimension_numbers<[1], [0], [0], [1], [0, 0, 1, 1], [], []>} : vector<8x512xf32>, vector<512x16xf32>, vector<8x16xf32> -> vector<8x16xf32>
    %c0_3 = arith.constant 0 : index
    %c0_4 = arith.constant 0 : index
    %3 = vector.load %arg3[%c0_3, %c0_4] : memref<1x16xf32, #tpu.memory_space<vmem>>, vector<1x16xf32>
    %4 = vector.broadcast %3 : vector<1x16xf32> to vector<8x16xf32>
    %5 = arith.addf %2, %4 : vector<8x16xf32>
    %cst_5 = arith.constant 0.000000e+00 : f32
    %6 = vector.broadcast %cst_5 : f32 to vector<8x16xf32>
    %7 = arith.maximumf %5, %6 : vector<8x16xf32>
    %8 = arith.cmpf one, %7, %7 : vector<8x16xf32>
    %cst_6 = arith.constant 0.000000e+00 : f32
    %9 = vector.broadcast %cst_6 : f32 to vector<8x16xf32>
    %10 = arith.select %8, %9, %7 : vector<8x16xi1>, vector<8x16xf32>
    %cst_7 = arith.constant 0x7F800000 : f32
    %11 = vector.broadcast %cst_7 : f32 to vector<8x16xf32>
    %12 = arith.cmpf oeq, %10, %11 : vector<8x16xf32>
    %cst_8 = arith.constant 1.000000e+00 : f32
    %13 = vector.broadcast %cst_8 : f32 to vector<8x16xf32>
    %14 = arith.select %12, %13, %10 : vector<8x16xi1>, vector<8x16xf32>
    %cst_9 = arith.constant 0xFF800000 : f32
    %15 = vector.broadcast %cst_9 : f32 to vector<8x16xf32>
    %16 = arith.cmpf oeq, %14, %15 : vector<8x16xf32>
    %cst_10 = arith.constant -1.000000e+00 : f32
    %17 = vector.broadcast %cst_10 : f32 to vector<8x16xf32>
    %18 = arith.select %16, %17, %14 : vector<8x16xi1>, vector<8x16xf32>
    %c0_11 = arith.constant 0 : index
    %c0_12 = arith.constant 0 : index
    %19 = vector.load %arg1[%c0_11, %c0_12] : memref<8x4xf32, #tpu.memory_space<vmem>>, vector<8x4xf32>
    %c0_13 = arith.constant 0 : index
    %c0_14 = arith.constant 0 : index
    %20 = vector.load %arg4[%c0_13, %c0_14] : memref<20x48xf32, #tpu.memory_space<vmem>>, vector<20x48xf32>
    %21 = vector.extract_strided_slice %20 {offsets = [0, 0], sizes = [16, 48], strides = [1, 1]} : vector<20x48xf32> to vector<16x48xf32>
    %cst_15 = arith.constant dense<0.000000e+00> : vector<8x48xf32>
    %22 = tpu.matmul %18, %21, %cst_15 {dimension_numbers = #tpu.dot_dimension_numbers<[1], [0], [0], [1], [0, 0, 1, 1], [], []>} : vector<8x16xf32>, vector<16x48xf32>, vector<8x48xf32> -> vector<8x48xf32>
    %23 = vector.extract_strided_slice %20 {offsets = [16, 0], sizes = [4, 48], strides = [1, 1]} : vector<20x48xf32> to vector<4x48xf32>
    %cst_16 = arith.constant dense<0.000000e+00> : vector<8x48xf32>
    %24 = tpu.matmul %19, %23, %cst_16 {dimension_numbers = #tpu.dot_dimension_numbers<[1], [0], [0], [1], [0, 0, 1, 1], [], []>} : vector<8x4xf32>, vector<4x48xf32>, vector<8x48xf32> -> vector<8x48xf32>
    %25 = arith.addf %22, %24 : vector<8x48xf32>
    %c0_17 = arith.constant 0 : index
    %c0_18 = arith.constant 0 : index
    %26 = vector.load %arg6[%c0_17, %c0_18] : memref<1x48xf32, #tpu.memory_space<vmem>>, vector<1x48xf32>
    %27 = vector.broadcast %26 : vector<1x48xf32> to vector<8x48xf32>
    %28 = arith.addf %25, %27 : vector<8x48xf32>
    %c0_19 = arith.constant 0 : index
    %c0_20 = arith.constant 0 : index
    %29 = vector.load %arg5[%c0_19, %c0_20] : memref<16x48xf32, #tpu.memory_space<vmem>>, vector<16x48xf32>
    %c0_21 = arith.constant 0 : index
    %c0_22 = arith.constant 0 : index
    %30 = vector.load %arg7[%c0_21, %c0_22] : memref<1x48xf32, #tpu.memory_space<vmem>>, vector<1x48xf32>
    %cst_23 = arith.constant 0.000000e+00 : f32
    %31 = vector.broadcast %cst_23 : f32 to vector<2x16xf32>
    %32 = vector.extract_strided_slice %28 {offsets = [0, 0], sizes = [2, 48], strides = [1, 1]} : vector<8x48xf32> to vector<2x48xf32>
    %cst_24 = arith.constant dense<0.000000e+00> : vector<2x48xf32>
    %33 = tpu.matmul %31, %29, %cst_24 {dimension_numbers = #tpu.dot_dimension_numbers<[1], [0], [0], [1], [0, 0, 1, 1], [], []>} : vector<2x16xf32>, vector<16x48xf32>, vector<2x48xf32> -> vector<2x48xf32>
    %34 = vector.broadcast %30 : vector<1x48xf32> to vector<2x48xf32>
    %35 = arith.addf %33, %34 : vector<2x48xf32>
    %36 = vector.extract_strided_slice %32 {offsets = [0, 0], sizes = [2, 16], strides = [1, 1]} : vector<2x48xf32> to vector<2x16xf32>
    %37 = vector.extract_strided_slice %35 {offsets = [0, 0], sizes = [2, 16], strides = [1, 1]} : vector<2x48xf32> to vector<2x16xf32>
    %38 = arith.addf %36, %37 : vector<2x16xf32>
    %39 = arith.negf %38 : vector<2x16xf32>
    %40 = math.exp %39 : vector<2x16xf32>
    %cst_25 = arith.constant 1.000000e+00 : f32
    %41 = vector.broadcast %cst_25 : f32 to vector<2x16xf32>
    %42 = arith.addf %41, %40 : vector<2x16xf32>
    %43 = arith.divf %41, %42 : vector<2x16xf32>
    %44 = vector.extract_strided_slice %32 {offsets = [0, 16], sizes = [2, 16], strides = [1, 1]} : vector<2x48xf32> to vector<2x16xf32>
    %45 = vector.extract_strided_slice %35 {offsets = [0, 16], sizes = [2, 16], strides = [1, 1]} : vector<2x48xf32> to vector<2x16xf32>
    %46 = arith.addf %44, %45 : vector<2x16xf32>
    %47 = arith.negf %46 : vector<2x16xf32>
    %48 = math.exp %47 : vector<2x16xf32>
    %cst_26 = arith.constant 1.000000e+00 : f32
    %49 = vector.broadcast %cst_26 : f32 to vector<2x16xf32>
    %50 = arith.addf %49, %48 : vector<2x16xf32>
    %51 = arith.divf %49, %50 : vector<2x16xf32>
    %52 = vector.extract_strided_slice %32 {offsets = [0, 32], sizes = [2, 16], strides = [1, 1]} : vector<2x48xf32> to vector<2x16xf32>
    %53 = vector.extract_strided_slice %35 {offsets = [0, 32], sizes = [2, 16], strides = [1, 1]} : vector<2x48xf32> to vector<2x16xf32>
    %54 = arith.mulf %43, %53 : vector<2x16xf32>
    %55 = arith.addf %52, %54 : vector<2x16xf32>
    %56 = math.tanh %55 : vector<2x16xf32>
    %cst_27 = arith.constant 1.000000e+00 : f32
    %57 = vector.broadcast %cst_27 : f32 to vector<2x16xf32>
    %58 = arith.subf %57, %51 : vector<2x16xf32>
    %59 = arith.mulf %58, %56 : vector<2x16xf32>
    %60 = arith.mulf %51, %31 : vector<2x16xf32>
    %61 = arith.addf %59, %60 : vector<2x16xf32>
    %62 = vector.extract_strided_slice %28 {offsets = [2, 0], sizes = [2, 48], strides = [1, 1]} : vector<8x48xf32> to vector<2x48xf32>
    %cst_28 = arith.constant dense<0.000000e+00> : vector<2x48xf32>
    %63 = tpu.matmul %61, %29, %cst_28 {dimension_numbers = #tpu.dot_dimension_numbers<[1], [0], [0], [1], [0, 0, 1, 1], [], []>} : vector<2x16xf32>, vector<16x48xf32>, vector<2x48xf32> -> vector<2x48xf32>
    %64 = vector.broadcast %30 : vector<1x48xf32> to vector<2x48xf32>
    %65 = arith.addf %63, %64 : vector<2x48xf32>
    %66 = vector.extract_strided_slice %62 {offsets = [0, 0], sizes = [2, 16], strides = [1, 1]} : vector<2x48xf32> to vector<2x16xf32>
    %67 = vector.extract_strided_slice %65 {offsets = [0, 0], sizes = [2, 16], strides = [1, 1]} : vector<2x48xf32> to vector<2x16xf32>
    %68 = arith.addf %66, %67 : vector<2x16xf32>
    %69 = arith.negf %68 : vector<2x16xf32>
    %70 = math.exp %69 : vector<2x16xf32>
    %cst_29 = arith.constant 1.000000e+00 : f32
    %71 = vector.broadcast %cst_29 : f32 to vector<2x16xf32>
    %72 = arith.addf %71, %70 : vector<2x16xf32>
    %73 = arith.divf %71, %72 : vector<2x16xf32>
    %74 = vector.extract_strided_slice %62 {offsets = [0, 16], sizes = [2, 16], strides = [1, 1]} : vector<2x48xf32> to vector<2x16xf32>
    %75 = vector.extract_strided_slice %65 {offsets = [0, 16], sizes = [2, 16], strides = [1, 1]} : vector<2x48xf32> to vector<2x16xf32>
    %76 = arith.addf %74, %75 : vector<2x16xf32>
    %77 = arith.negf %76 : vector<2x16xf32>
    %78 = math.exp %77 : vector<2x16xf32>
    %cst_30 = arith.constant 1.000000e+00 : f32
    %79 = vector.broadcast %cst_30 : f32 to vector<2x16xf32>
    %80 = arith.addf %79, %78 : vector<2x16xf32>
    %81 = arith.divf %79, %80 : vector<2x16xf32>
    %82 = vector.extract_strided_slice %62 {offsets = [0, 32], sizes = [2, 16], strides = [1, 1]} : vector<2x48xf32> to vector<2x16xf32>
    %83 = vector.extract_strided_slice %65 {offsets = [0, 32], sizes = [2, 16], strides = [1, 1]} : vector<2x48xf32> to vector<2x16xf32>
    %84 = arith.mulf %73, %83 : vector<2x16xf32>
    %85 = arith.addf %82, %84 : vector<2x16xf32>
    %86 = math.tanh %85 : vector<2x16xf32>
    %cst_31 = arith.constant 1.000000e+00 : f32
    %87 = vector.broadcast %cst_31 : f32 to vector<2x16xf32>
    %88 = arith.subf %87, %81 : vector<2x16xf32>
    %89 = arith.mulf %88, %86 : vector<2x16xf32>
    %90 = arith.mulf %81, %61 : vector<2x16xf32>
    %91 = arith.addf %89, %90 : vector<2x16xf32>
    %92 = vector.extract_strided_slice %28 {offsets = [4, 0], sizes = [2, 48], strides = [1, 1]} : vector<8x48xf32> to vector<2x48xf32>
    %cst_32 = arith.constant dense<0.000000e+00> : vector<2x48xf32>
    %93 = tpu.matmul %91, %29, %cst_32 {dimension_numbers = #tpu.dot_dimension_numbers<[1], [0], [0], [1], [0, 0, 1, 1], [], []>} : vector<2x16xf32>, vector<16x48xf32>, vector<2x48xf32> -> vector<2x48xf32>
    %94 = vector.broadcast %30 : vector<1x48xf32> to vector<2x48xf32>
    %95 = arith.addf %93, %94 : vector<2x48xf32>
    %96 = vector.extract_strided_slice %92 {offsets = [0, 0], sizes = [2, 16], strides = [1, 1]} : vector<2x48xf32> to vector<2x16xf32>
    %97 = vector.extract_strided_slice %95 {offsets = [0, 0], sizes = [2, 16], strides = [1, 1]} : vector<2x48xf32> to vector<2x16xf32>
    %98 = arith.addf %96, %97 : vector<2x16xf32>
    %99 = arith.negf %98 : vector<2x16xf32>
    %100 = math.exp %99 : vector<2x16xf32>
    %cst_33 = arith.constant 1.000000e+00 : f32
    %101 = vector.broadcast %cst_33 : f32 to vector<2x16xf32>
    %102 = arith.addf %101, %100 : vector<2x16xf32>
    %103 = arith.divf %101, %102 : vector<2x16xf32>
    %104 = vector.extract_strided_slice %92 {offsets = [0, 16], sizes = [2, 16], strides = [1, 1]} : vector<2x48xf32> to vector<2x16xf32>
    %105 = vector.extract_strided_slice %95 {offsets = [0, 16], sizes = [2, 16], strides = [1, 1]} : vector<2x48xf32> to vector<2x16xf32>
    %106 = arith.addf %104, %105 : vector<2x16xf32>
    %107 = arith.negf %106 : vector<2x16xf32>
    %108 = math.exp %107 : vector<2x16xf32>
    %cst_34 = arith.constant 1.000000e+00 : f32
    %109 = vector.broadcast %cst_34 : f32 to vector<2x16xf32>
    %110 = arith.addf %109, %108 : vector<2x16xf32>
    %111 = arith.divf %109, %110 : vector<2x16xf32>
    %112 = vector.extract_strided_slice %92 {offsets = [0, 32], sizes = [2, 16], strides = [1, 1]} : vector<2x48xf32> to vector<2x16xf32>
    %113 = vector.extract_strided_slice %95 {offsets = [0, 32], sizes = [2, 16], strides = [1, 1]} : vector<2x48xf32> to vector<2x16xf32>
    %114 = arith.mulf %103, %113 : vector<2x16xf32>
    %115 = arith.addf %112, %114 : vector<2x16xf32>
    %116 = math.tanh %115 : vector<2x16xf32>
    %cst_35 = arith.constant 1.000000e+00 : f32
    %117 = vector.broadcast %cst_35 : f32 to vector<2x16xf32>
    %118 = arith.subf %117, %111 : vector<2x16xf32>
    %119 = arith.mulf %118, %116 : vector<2x16xf32>
    %120 = arith.mulf %111, %91 : vector<2x16xf32>
    %121 = arith.addf %119, %120 : vector<2x16xf32>
    %122 = vector.extract_strided_slice %28 {offsets = [6, 0], sizes = [2, 48], strides = [1, 1]} : vector<8x48xf32> to vector<2x48xf32>
    %cst_36 = arith.constant dense<0.000000e+00> : vector<2x48xf32>
    %123 = tpu.matmul %121, %29, %cst_36 {dimension_numbers = #tpu.dot_dimension_numbers<[1], [0], [0], [1], [0, 0, 1, 1], [], []>} : vector<2x16xf32>, vector<16x48xf32>, vector<2x48xf32> -> vector<2x48xf32>
    %124 = vector.broadcast %30 : vector<1x48xf32> to vector<2x48xf32>
    %125 = arith.addf %123, %124 : vector<2x48xf32>
    %126 = vector.extract_strided_slice %122 {offsets = [0, 0], sizes = [2, 16], strides = [1, 1]} : vector<2x48xf32> to vector<2x16xf32>
    %127 = vector.extract_strided_slice %125 {offsets = [0, 0], sizes = [2, 16], strides = [1, 1]} : vector<2x48xf32> to vector<2x16xf32>
    %128 = arith.addf %126, %127 : vector<2x16xf32>
    %129 = arith.negf %128 : vector<2x16xf32>
    %130 = math.exp %129 : vector<2x16xf32>
    %cst_37 = arith.constant 1.000000e+00 : f32
    %131 = vector.broadcast %cst_37 : f32 to vector<2x16xf32>
    %132 = arith.addf %131, %130 : vector<2x16xf32>
    %133 = arith.divf %131, %132 : vector<2x16xf32>
    %134 = vector.extract_strided_slice %122 {offsets = [0, 16], sizes = [2, 16], strides = [1, 1]} : vector<2x48xf32> to vector<2x16xf32>
    %135 = vector.extract_strided_slice %125 {offsets = [0, 16], sizes = [2, 16], strides = [1, 1]} : vector<2x48xf32> to vector<2x16xf32>
    %136 = arith.addf %134, %135 : vector<2x16xf32>
    %137 = arith.negf %136 : vector<2x16xf32>
    %138 = math.exp %137 : vector<2x16xf32>
    %cst_38 = arith.constant 1.000000e+00 : f32
    %139 = vector.broadcast %cst_38 : f32 to vector<2x16xf32>
    %140 = arith.addf %139, %138 : vector<2x16xf32>
    %141 = arith.divf %139, %140 : vector<2x16xf32>
    %142 = vector.extract_strided_slice %122 {offsets = [0, 32], sizes = [2, 16], strides = [1, 1]} : vector<2x48xf32> to vector<2x16xf32>
    %143 = vector.extract_strided_slice %125 {offsets = [0, 32], sizes = [2, 16], strides = [1, 1]} : vector<2x48xf32> to vector<2x16xf32>
    %144 = arith.mulf %133, %143 : vector<2x16xf32>
    %145 = arith.addf %142, %144 : vector<2x16xf32>
    %146 = math.tanh %145 : vector<2x16xf32>
    %cst_39 = arith.constant 1.000000e+00 : f32
    %147 = vector.broadcast %cst_39 : f32 to vector<2x16xf32>
    %148 = arith.subf %147, %141 : vector<2x16xf32>
    %149 = arith.mulf %148, %146 : vector<2x16xf32>
    %150 = arith.mulf %141, %121 : vector<2x16xf32>
    %151 = arith.addf %149, %150 : vector<2x16xf32>
    %c0_40 = arith.constant 0 : index
    %c0_41 = arith.constant 0 : index
    %152 = vector.load %arg8[%c0_40, %c0_41] : memref<20x48xf32, #tpu.memory_space<vmem>>, vector<20x48xf32>
    %153 = vector.extract_strided_slice %18 {offsets = [6, 0], sizes = [2, 16], strides = [1, 1]} : vector<8x16xf32> to vector<2x16xf32>
    %154 = vector.extract_strided_slice %152 {offsets = [0, 0], sizes = [16, 48], strides = [1, 1]} : vector<20x48xf32> to vector<16x48xf32>
    %cst_42 = arith.constant dense<0.000000e+00> : vector<2x48xf32>
    %155 = tpu.matmul %153, %154, %cst_42 {dimension_numbers = #tpu.dot_dimension_numbers<[1], [0], [0], [1], [0, 0, 1, 1], [], []>} : vector<2x16xf32>, vector<16x48xf32>, vector<2x48xf32> -> vector<2x48xf32>
    %156 = vector.extract_strided_slice %19 {offsets = [6, 0], sizes = [2, 4], strides = [1, 1]} : vector<8x4xf32> to vector<2x4xf32>
    %157 = vector.extract_strided_slice %152 {offsets = [16, 0], sizes = [4, 48], strides = [1, 1]} : vector<20x48xf32> to vector<4x48xf32>
    %cst_43 = arith.constant dense<0.000000e+00> : vector<2x48xf32>
    %158 = tpu.matmul %156, %157, %cst_43 {dimension_numbers = #tpu.dot_dimension_numbers<[1], [0], [0], [1], [0, 0, 1, 1], [], []>} : vector<2x4xf32>, vector<4x48xf32>, vector<2x48xf32> -> vector<2x48xf32>
    %159 = arith.addf %155, %158 : vector<2x48xf32>
    %c0_44 = arith.constant 0 : index
    %c0_45 = arith.constant 0 : index
    %160 = vector.load %arg10[%c0_44, %c0_45] : memref<1x48xf32, #tpu.memory_space<vmem>>, vector<1x48xf32>
    %161 = vector.broadcast %160 : vector<1x48xf32> to vector<2x48xf32>
    %162 = arith.addf %159, %161 : vector<2x48xf32>
    %cst_46 = arith.constant 0.000000e+00 : f32
    %163 = vector.broadcast %cst_46 : f32 to vector<2x16xf32>
    %c0_47 = arith.constant 0 : index
    %c0_48 = arith.constant 0 : index
    %164 = vector.load %arg9[%c0_47, %c0_48] : memref<16x48xf32, #tpu.memory_space<vmem>>, vector<16x48xf32>
    %c0_49 = arith.constant 0 : index
    %c0_50 = arith.constant 0 : index
    %165 = vector.load %arg11[%c0_49, %c0_50] : memref<1x48xf32, #tpu.memory_space<vmem>>, vector<1x48xf32>
    %cst_51 = arith.constant dense<0.000000e+00> : vector<2x48xf32>
    %166 = tpu.matmul %163, %164, %cst_51 {dimension_numbers = #tpu.dot_dimension_numbers<[1], [0], [0], [1], [0, 0, 1, 1], [], []>} : vector<2x16xf32>, vector<16x48xf32>, vector<2x48xf32> -> vector<2x48xf32>
    %167 = vector.broadcast %165 : vector<1x48xf32> to vector<2x48xf32>
    %168 = arith.addf %166, %167 : vector<2x48xf32>
    %169 = vector.extract_strided_slice %162 {offsets = [0, 0], sizes = [2, 16], strides = [1, 1]} : vector<2x48xf32> to vector<2x16xf32>
    %170 = vector.extract_strided_slice %168 {offsets = [0, 0], sizes = [2, 16], strides = [1, 1]} : vector<2x48xf32> to vector<2x16xf32>
    %171 = arith.addf %169, %170 : vector<2x16xf32>
    %172 = arith.negf %171 : vector<2x16xf32>
    %173 = math.exp %172 : vector<2x16xf32>
    %cst_52 = arith.constant 1.000000e+00 : f32
    %174 = vector.broadcast %cst_52 : f32 to vector<2x16xf32>
    %175 = arith.addf %174, %173 : vector<2x16xf32>
    %176 = arith.divf %174, %175 : vector<2x16xf32>
    %177 = vector.extract_strided_slice %162 {offsets = [0, 16], sizes = [2, 16], strides = [1, 1]} : vector<2x48xf32> to vector<2x16xf32>
    %178 = vector.extract_strided_slice %168 {offsets = [0, 16], sizes = [2, 16], strides = [1, 1]} : vector<2x48xf32> to vector<2x16xf32>
    %179 = arith.addf %177, %178 : vector<2x16xf32>
    %180 = arith.negf %179 : vector<2x16xf32>
    %181 = math.exp %180 : vector<2x16xf32>
    %cst_53 = arith.constant 1.000000e+00 : f32
    %182 = vector.broadcast %cst_53 : f32 to vector<2x16xf32>
    %183 = arith.addf %182, %181 : vector<2x16xf32>
    %184 = arith.divf %182, %183 : vector<2x16xf32>
    %185 = vector.extract_strided_slice %162 {offsets = [0, 32], sizes = [2, 16], strides = [1, 1]} : vector<2x48xf32> to vector<2x16xf32>
    %186 = vector.extract_strided_slice %168 {offsets = [0, 32], sizes = [2, 16], strides = [1, 1]} : vector<2x48xf32> to vector<2x16xf32>
    %187 = arith.mulf %176, %186 : vector<2x16xf32>
    %188 = arith.addf %185, %187 : vector<2x16xf32>
    %189 = math.tanh %188 : vector<2x16xf32>
    %cst_54 = arith.constant 1.000000e+00 : f32
    %190 = vector.broadcast %cst_54 : f32 to vector<2x16xf32>
    %191 = arith.subf %190, %184 : vector<2x16xf32>
    %192 = arith.mulf %191, %189 : vector<2x16xf32>
    %193 = arith.mulf %184, %163 : vector<2x16xf32>
    %194 = arith.addf %192, %193 : vector<2x16xf32>
    %c0_55 = arith.constant 0 : index
    %c0_56 = arith.constant 0 : index
    %195 = vector.load %arg12[%c0_55, %c0_56] : memref<32x51xf32, #tpu.memory_space<vmem>>, vector<32x51xf32>
    %196 = vector.extract_strided_slice %195 {offsets = [0, 0], sizes = [16, 51], strides = [1, 1]} : vector<32x51xf32> to vector<16x51xf32>
    %cst_57 = arith.constant dense<0.000000e+00> : vector<2x51xf32>
    %197 = tpu.matmul %151, %196, %cst_57 {dimension_numbers = #tpu.dot_dimension_numbers<[1], [0], [0], [1], [0, 0, 1, 1], [], []>} : vector<2x16xf32>, vector<16x51xf32>, vector<2x51xf32> -> vector<2x51xf32>
    %198 = vector.extract_strided_slice %195 {offsets = [16, 0], sizes = [16, 51], strides = [1, 1]} : vector<32x51xf32> to vector<16x51xf32>
    %cst_58 = arith.constant dense<0.000000e+00> : vector<2x51xf32>
    %199 = tpu.matmul %194, %198, %cst_58 {dimension_numbers = #tpu.dot_dimension_numbers<[1], [0], [0], [1], [0, 0, 1, 1], [], []>} : vector<2x16xf32>, vector<16x51xf32>, vector<2x51xf32> -> vector<2x51xf32>
    %200 = arith.addf %197, %199 : vector<2x51xf32>
    %c0_59 = arith.constant 0 : index
    %c0_60 = arith.constant 0 : index
    %201 = vector.load %arg13[%c0_59, %c0_60] : memref<1x51xf32, #tpu.memory_space<vmem>>, vector<1x51xf32>
    %202 = vector.broadcast %201 : vector<1x51xf32> to vector<2x51xf32>
    %203 = arith.addf %200, %202 : vector<2x51xf32>
    %c0_61 = arith.constant 0 : index
    %c0_62 = arith.constant 0 : index
    %204 = vector.load %arg14[%c0_61, %c0_62] : memref<2x51xf32, #tpu.memory_space<vmem>>, vector<2x51xf32>
    tpu.vector_store %arg14[%c0_61, %c0_62], %203 {strides = array<i32>} : memref<2x51xf32, #tpu.memory_space<vmem>>, vector<2x51xf32>,
    return
  }
}

</mosaic_0001>

<bundles_post_ra>
// kernel: encoder_forward.6
= control target key start
LH: loop header
LB: loop body
LE: loop exit
PB: predicated region body
PF: predicated region fallthrough
CT: control target
= control target key end

     0   :  { %s3298_s12 = smov 0   ;;  %s3300_s13 = smov 0   ;;  %s3969_s0 = inlined_call_operand.vmem [shape: bf16[8,48], index: 0, kind: input, shape index: {}]   ;;  %s3970_s1 = inlined_call_operand.vmem [shape: bf16[48,12800], index: 1, kind: input, shape index: {}]   ;;  %s3971_s2 = inlined_call_operand.vmem [shape: f32[8,1], index: 2, kind: input, shape index: {}]   ;;  %s3972_s3 = inlined_call_operand.vmem [shape: bf16[8,12800], index: 3, kind: output, shape index: {}]  }
   0x1   :  { %s3302_s14 = smov 0  }
   0x2 LB: > { %s2765_s15 = sadd.s32 4294967295, %s3275_s14   ;;  %s3315_s16 = sadd.s32 1, %s3275_s14   ;;  %s3275_s14 = sphi %s3302_s14, %s3975_s14   ;;  %s3271_s13 = sphi %s3300_s13, %s3974_s13   ;;  %s3267_s12 = sphi %s3298_s12, %s3973_s12  }
   0x3   : > { %s38_s17 = ssub.s32 %s3275_s14, %s3315_s16  ;;  %s41_s18 = sadd.s32 1, %s3271_s13 }
   0x4   : > { %p39_p0 = scmp.eq.s32.totalorder %s38_s17, 0  ;;  %p48_p1 = scmp.ne.s32.totalorder %s3271_s13, %s3267_s12 }
   0x5   : > { %p49_p2 = scmp.eq.s32.totalorder %s3275_s14, 0  ;;  %p2768_p4 = scmp.ge.s32.totalorder %s3275_s14, 2 }
   0x6   : > { %s3324_s19 = scalar_select %p39_p0, %s3271_s13, %s41_s18  }
   0x7   : > { %p50_p3 = por %p49_p2, %p48_p1  ;;  %127 = sbr.rel (%p2768_p4) target bundleno = 92 (0x5c), region = 24 }
   0xc   : > { %130 = sbr.rel (!%p50_p3) target bundleno = 92 (0x5c), region = 28  ;;  %s132_s20 = sand.u32 (%p50_p3), 1, %s3271_s13  }
   0xd   : > { %s2974_s21 = smul.u32 (%p50_p3), 200, %s3275_s14 }
   0xe   : > { %s3000_s22 = smul.u32 (%p50_p3), 1200, %s132_s20 }
   0xf   : > { %s3332_s25 = scalar_lea.vmem (%p50_p3), %s3970_s1, %s2974_s21 }
  0x10   : > { %v150_v0 = vld [vmem:[%s3332_s25] sm:$0xff] (%p50_p3)  ;;  %v152_v1 = vld [vmem:[%s3332_s25 + $0x8] sm:$0xff] (%p50_p3)  ;;  %v154_v2 = vld [vmem:[%s3332_s25 + $0x10] sm:$0xff] (%p50_p3)  ;;  %s3337_s26 = scalar_lea.vmem (%p50_p3), [#allocation2], %s3000_s22 }
  0x11   : > { %151 = vst [vmem:[%s3337_s26] sm:$0xff] %v150_v0  ;;  %153 = vst [vmem:[%s3337_s26 + $0x8] sm:$0xff] %v152_v1  ;;  %v156_v3 = vld [vmem:[%s3332_s25 + $0x18] sm:$0xff]  ;;  %v158_v4 = vld [vmem:[%s3332_s25 + $0x20] sm:$0xff] }
  0x12   : > { %155 = vst [vmem:[%s3337_s26 + $0x10] sm:$0xff] %v154_v2  ;;  %v160_v5 = vld [vmem:[%s3332_s25 + $0x28] sm:$0xff]  ;;  %157 = vst [vmem:[%s3337_s26 + $0x18] sm:$0xff] %v156_v3  ;;  %v162_v6 = vld [vmem:[%s3332_s25 + $0x30] sm:$0xff] }
  0x13   : > { %159 = vst [vmem:[%s3337_s26 + $0x20] sm:$0xff] %v158_v4  ;;  %161 = vst [vmem:[%s3337_s26 + $0x28] sm:$0xff] %v160_v5  ;;  %v164_v7 = vld [vmem:[%s3332_s25 + $0x38] sm:$0xff]  ;;  %v166_v8 = vld [vmem:[%s3332_s25 + $0x40] sm:$0xff] }
  0x14   : > { %163 = vst [vmem:[%s3337_s26 + $0x30] sm:$0xff] %v162_v6  ;;  %165 = vst [vmem:[%s3337_s26 + $0x38] sm:$0xff] %v164_v7  ;;  %v168_v9 = vld [vmem:[%s3332_s25 + $0x48] sm:$0xff]  ;;  %v170_v10 = vld [vmem:[%s3332_s25 + $0x50] sm:$0xff] }
  0x15   : > { %167 = vst [vmem:[%s3337_s26 + $0x40] sm:$0xff] %v166_v8  ;;  %v172_v11 = vld [vmem:[%s3332_s25 + $0x58] sm:$0xff]  ;;  %169 = vst [vmem:[%s3337_s26 + $0x48] sm:$0xff] %v168_v9  ;;  %v174_v12 = vld [vmem:[%s3332_s25 + $0x60] sm:$0xff] }
  0x16   : > { %171 = vst [vmem:[%s3337_s26 + $0x50] sm:$0xff] %v170_v10  ;;  %173 = vst [vmem:[%s3337_s26 + $0x58] sm:$0xff] %v172_v11  ;;  %v176_v13 = vld [vmem:[%s3332_s25 + $0x68] sm:$0xff]  ;;  %v178_v14 = vld [vmem:[%s3332_s25 + $0x70] sm:$0xff] }
  0x17   : > { %175 = vst [vmem:[%s3337_s26 + $0x60] sm:$0xff] %v174_v12  ;;  %177 = vst [vmem:[%s3337_s26 + $0x68] sm:$0xff] %v176_v13  ;;  %v180_v15 = vld [vmem:[%s3332_s25 + $0x78] sm:$0xff]  ;;  %v182_v16 = vld [vmem:[%s3332_s25 + $0x80] sm:$0xff] }
  0x18   : > { %179 = vst [vmem:[%s3337_s26 + $0x70] sm:$0xff] %v178_v14  ;;  %v184_v17 = vld [vmem:[%s3332_s25 + $0x88] sm:$0xff]  ;;  %181 = vst [vmem:[%s3337_s26 + $0x78] sm:$0xff] %v180_v15  ;;  %v186_v18 = vld [vmem:[%s3332_s25 + $0x90] sm:$0xff] }
  0x19   : > { %183 = vst [vmem:[%s3337_s26 + $0x80] sm:$0xff] %v182_v16  ;;  %185 = vst [vmem:[%s3337_s26 + $0x88] sm:$0xff] %v184_v17  ;;  %v188_v19 = vld [vmem:[%s3332_s25 + $0x98] sm:$0xff]  ;;  %v190_v20 = vld [vmem:[%s3332_s25 + $0xa0] sm:$0xff] }
  0x1a   : > { %187 = vst [vmem:[%s3337_s26 + $0x90] sm:$0xff] %v186_v18  ;;  %189 = vst [vmem:[%s3337_s26 + $0x98] sm:$0xff] %v188_v19  ;;  %v192_v21 = vld [vmem:[%s3332_s25 + $0xa8] sm:$0xff]  ;;  %v194_v22 = vld [vmem:[%s3332_s25 + $0xb0] sm:$0xff] }
  0x1b   : > { %191 = vst [vmem:[%s3337_s26 + $0xa0] sm:$0xff] %v190_v20  ;;  %v196_v23 = vld [vmem:[%s3332_s25 + $0xb8] sm:$0xff]  ;;  %193 = vst [vmem:[%s3337_s26 + $0xa8] sm:$0xff] %v192_v21  ;;  %v198_v24 = vld [vmem:[%s3332_s25 + $0xc0] sm:$0xff] }
  0x1c   : > { %195 = vst [vmem:[%s3337_s26 + $0xb0] sm:$0xff] %v194_v22  ;;  %197 = vst [vmem:[%s3337_s26 + $0xb8] sm:$0xff] %v196_v23  ;;  %v200_v25 = vld [vmem:[%s3332_s25 + $0x190] sm:$0xff]  ;;  %v202_v26 = vld [vmem:[%s3332_s25 + $0x198] sm:$0xff] }
  0x1d   : > { %199 = vst [vmem:[%s3337_s26 + $0xc0] sm:$0xff] %v198_v24  ;;  %201 = vst [vmem:[%s3337_s26 + $0xc8] sm:$0xff] %v200_v25  ;;  %v204_v27 = vld [vmem:[%s3332_s25 + $0x1a0] sm:$0xff]  ;;  %v206_v28 = vld [vmem:[%s3332_s25 + $0x1a8] sm:$0xff] }
  0x1e   : > { %203 = vst [vmem:[%s3337_s26 + $0xd0] sm:$0xff] %v202_v26  ;;  %v208_v29 = vld [vmem:[%s3332_s25 + $0x1b0] sm:$0xff]  ;;  %205 = vst [vmem:[%s3337_s26 + $0xd8] sm:$0xff] %v204_v27  ;;  %v210_v30 = vld [vmem:[%s3332_s25 + $0x1b8] sm:$0xff] }
  0x1f   : > { %207 = vst [vmem:[%s3337_s26 + $0xe0] sm:$0xff] %v206_v28  ;;  %209 = vst [vmem:[%s3337_s26 + $0xe8] sm:$0xff] %v208_v29  ;;  %v212_v31 = vld [vmem:[%s3332_s25 + $0x1c0] sm:$0xff]  ;;  %v214_v32 = vld [vmem:[%s3332_s25 + $0x1c8] sm:$0xff] }
  0x20   : > { %211 = vst [vmem:[%s3337_s26 + $0xf0] sm:$0xff] %v210_v30  ;;  %213 = vst [vmem:[%s3337_s26 + $0xf8] sm:$0xff] %v212_v31  ;;  %v216_v33 = vld [vmem:[%s3332_s25 + $0x1d0] sm:$0xff]  ;;  %v218_v34 = vld [vmem:[%s3332_s25 + $0x1d8] sm:$0xff] }
  0x21   : > { %215 = vst [vmem:[%s3337_s26 + $0x100] sm:$0xff] %v214_v32  ;;  %v220_v35 = vld [vmem:[%s3332_s25 + $0x1e0] sm:$0xff]  ;;  %217 = vst [vmem:[%s3337_s26 + $0x108] sm:$0xff] %v216_v33  ;;  %v222_v36 = vld [vmem:[%s3332_s25 + $0x1e8] sm:$0xff] }
  0x22   : > { %219 = vst [vmem:[%s3337_s26 + $0x110] sm:$0xff] %v218_v34  ;;  %221 = vst [vmem:[%s3337_s26 + $0x118] sm:$0xff] %v220_v35  ;;  %v224_v37 = vld [vmem:[%s3332_s25 + $0x1f0] sm:$0xff]  ;;  %v226_v38 = vld [vmem:[%s3332_s25 + $0x1f8] sm:$0xff] }
  0x23   : > { %223 = vst [vmem:[%s3337_s26 + $0x120] sm:$0xff] %v222_v36  ;;  %225 = vst [vmem:[%s3337_s26 + $0x128] sm:$0xff] %v224_v37  ;;  %v228_v39 = vld [vmem:[%s3332_s25 + $0x200] sm:$0xff]  ;;  %v230_v40 = vld [vmem:[%s3332_s25 + $0x208] sm:$0xff] }
  0x24   : > { %227 = vst [vmem:[%s3337_s26 + $0x130] sm:$0xff] %v226_v38  ;;  %v232_v41 = vld [vmem:[%s3332_s25 + $0x210] sm:$0xff]  ;;  %229 = vst [vmem:[%s3337_s26 + $0x138] sm:$0xff] %v228_v39  ;;  %v234_v42 = vld [vmem:[%s3332_s25 + $0x218] sm:$0xff] }
  0x25   : > { %231 = vst [vmem:[%s3337_s26 + $0x140] sm:$0xff] %v230_v40  ;;  %233 = vst [vmem:[%s3337_s26 + $0x148] sm:$0xff] %v232_v41  ;;  %v236_v43 = vld [vmem:[%s3332_s25 + $0x220] sm:$0xff]  ;;  %v238_v44 = vld [vmem:[%s3332_s25 + $0x228] sm:$0xff] }
  0x26   : > { %235 = vst [vmem:[%s3337_s26 + $0x150] sm:$0xff] %v234_v42  ;;  %237 = vst [vmem:[%s3337_s26 + $0x158] sm:$0xff] %v236_v43  ;;  %v240_v45 = vld [vmem:[%s3332_s25 + $0x230] sm:$0xff]  ;;  %v242_v46 = vld [vmem:[%s3332_s25 + $0x238] sm:$0xff] }
  0x27   : > { %239 = vst [vmem:[%s3337_s26 + $0x160] sm:$0xff] %v238_v44  ;;  %v244_v47 = vld [vmem:[%s3332_s25 + $0x240] sm:$0xff]  ;;  %241 = vst [vmem:[%s3337_s26 + $0x168] sm:$0xff] %v240_v45  ;;  %v246_v48 = vld [vmem:[%s3332_s25 + $0x248] sm:$0xff] }
  0x28   : > { %243 = vst [vmem:[%s3337_s26 + $0x170] sm:$0xff] %v242_v46  ;;  %245 = vst [vmem:[%s3337_s26 + $0x178] sm:$0xff] %v244_v47  ;;  %v248_v49 = vld [vmem:[%s3332_s25 + $0x250] sm:$0xff]  ;;  %v250_v50 = vld [vmem:[%s3332_s25 + $0x320] sm:$0xff] }
  0x29   : > { %247 = vst [vmem:[%s3337_s26 + $0x180] sm:$0xff] %v246_v48  ;;  %249 = vst [vmem:[%s3337_s26 + $0x188] sm:$0xff] %v248_v49  ;;  %v252_v51 = vld [vmem:[%s3332_s25 + $0x328] sm:$0xff]  ;;  %v254_v52 = vld [vmem:[%s3332_s25 + $0x330] sm:$0xff] }
  0x2a   : > { %251 = vst [vmem:[%s3337_s26 + $0x190] sm:$0xff] %v250_v50  ;;  %v256_v53 = vld [vmem:[%s3332_s25 + $0x338] sm:$0xff]  ;;  %253 = vst [vmem:[%s3337_s26 + $0x198] sm:$0xff] %v252_v51  ;;  %v258_v54 = vld [vmem:[%s3332_s25 + $0x340] sm:$0xff] }
  0x2b   : > { %255 = vst [vmem:[%s3337_s26 + $0x1a0] sm:$0xff] %v254_v52  ;;  %257 = vst [vmem:[%s3337_s26 + $0x1a8] sm:$0xff] %v256_v53  ;;  %v260_v55 = vld [vmem:[%s3332_s25 + $0x348] sm:$0xff]  ;;  %v262_v56 = vld [vmem:[%s3332_s25 + $0x350] sm:$0xff] }
  0x2c   : > { %259 = vst [vmem:[%s3337_s26 + $0x1b0] sm:$0xff] %v258_v54  ;;  %261 = vst [vmem:[%s3337_s26 + $0x1b8] sm:$0xff] %v260_v55  ;;  %v264_v57 = vld [vmem:[%s3332_s25 + $0x358] sm:$0xff]  ;;  %v266_v58 = vld [vmem:[%s3332_s25 + $0x360] sm:$0xff] }
  0x2d   : > { %263 = vst [vmem:[%s3337_s26 + $0x1c0] sm:$0xff] %v262_v56  ;;  %v268_v59 = vld [vmem:[%s3332_s25 + $0x368] sm:$0xff]  ;;  %265 = vst [vmem:[%s3337_s26 + $0x1c8] sm:$0xff] %v264_v57  ;;  %v270_v60 = vld [vmem:[%s3332_s25 + $0x370] sm:$0xff] }
  0x2e   : > { %267 = vst [vmem:[%s3337_s26 + $0x1d0] sm:$0xff] %v266_v58  ;;  %269 = vst [vmem:[%s3337_s26 + $0x1d8] sm:$0xff] %v268_v59  ;;  %v272_v61 = vld [vmem:[%s3332_s25 + $0x378] sm:$0xff]  ;;  %v274_v62 = vld [vmem:[%s3332_s25 + $0x380] sm:$0xff] }
  0x2f   : > { %271 = vst [vmem:[%s3337_s26 + $0x1e0] sm:$0xff] %v270_v60  ;;  %273 = vst [vmem:[%s3337_s26 + $0x1e8] sm:$0xff] %v272_v61  ;;  %v276_v63 = vld [vmem:[%s3332_s25 + $0x388] sm:$0xff]  ;;  %v278_v0 = vld [vmem:[%s3332_s25 + $0x390] sm:$0xff] }
  0x30   : > { %275 = vst [vmem:[%s3337_s26 + $0x1f0] sm:$0xff] %v274_v62  ;;  %v280_v1 = vld [vmem:[%s3332_s25 + $0x398] sm:$0xff]  ;;  %277 = vst [vmem:[%s3337_s26 + $0x1f8] sm:$0xff] %v276_v63  ;;  %v282_v2 = vld [vmem:[%s3332_s25 + $0x3a0] sm:$0xff] }
  0x31   : > { %279 = vst [vmem:[%s3337_s26 + $0x200] sm:$0xff] %v278_v0  ;;  %281 = vst [vmem:[%s3337_s26 + $0x208] sm:$0xff] %v280_v1  ;;  %v284_v3 = vld [vmem:[%s3332_s25 + $0x3a8] sm:$0xff]  ;;  %v286_v4 = vld [vmem:[%s3332_s25 + $0x3b0] sm:$0xff] }
  0x32   : > { %283 = vst [vmem:[%s3337_s26 + $0x210] sm:$0xff] %v282_v2  ;;  %285 = vst [vmem:[%s3337_s26 + $0x218] sm:$0xff] %v284_v3  ;;  %v288_v5 = vld [vmem:[%s3332_s25 + $0x3b8] sm:$0xff]  ;;  %v290_v6 = vld [vmem:[%s3332_s25 + $0x3c0] sm:$0xff] }
  0x33   : > { %287 = vst [vmem:[%s3337_s26 + $0x220] sm:$0xff] %v286_v4  ;;  %v292_v7 = vld [vmem:[%s3332_s25 + $0x3c8] sm:$0xff]  ;;  %289 = vst [vmem:[%s3337_s26 + $0x228] sm:$0xff] %v288_v5  ;;  %v294_v8 = vld [vmem:[%s3332_s25 + $0x3d0] sm:$0xff] }
  0x34   : > { %291 = vst [vmem:[%s3337_s26 + $0x230] sm:$0xff] %v290_v6  ;;  %293 = vst [vmem:[%s3337_s26 + $0x238] sm:$0xff] %v292_v7  ;;  %v296_v9 = vld [vmem:[%s3332_s25 + $0x3d8] sm:$0xff]  ;;  %v298_v10 = vld [vmem:[%s3332_s25 + $0x3e0] sm:$0xff] }
  0x35   : > { %295 = vst [vmem:[%s3337_s26 + $0x240] sm:$0xff] %v294_v8  ;;  %297 = vst [vmem:[%s3337_s26 + $0x248] sm:$0xff] %v296_v9  ;;  %v300_v11 = vld [vmem:[%s3332_s25 + $0x4b0] sm:$0xff]  ;;  %v302_v12 = vld [vmem:[%s3332_s25 + $0x4b8] sm:$0xff] }
  0x36   : > { %299 = vst [vmem:[%s3337_s26 + $0x250] sm:$0xff] %v298_v10  ;;  %v304_v13 = vld [vmem:[%s3332_s25 + $0x4c0] sm:$0xff]  ;;  %301 = vst [vmem:[%s3337_s26 + $0x258] sm:$0xff] %v300_v11  ;;  %v306_v14 = vld [vmem:[%s3332_s25 + $0x4c8] sm:$0xff] }
  0x37   : > { %303 = vst [vmem:[%s3337_s26 + $0x260] sm:$0xff] %v302_v12  ;;  %305 = vst [vmem:[%s3337_s26 + $0x268] sm:$0xff] %v304_v13  ;;  %v308_v15 = vld [vmem:[%s3332_s25 + $0x4d0] sm:$0xff]  ;;  %v310_v16 = vld [vmem:[%s3332_s25 + $0x4d8] sm:$0xff] }
  0x38   : > { %307 = vst [vmem:[%s3337_s26 + $0x270] sm:$0xff] %v306_v14  ;;  %309 = vst [vmem:[%s3337_s26 + $0x278] sm:$0xff] %v308_v15  ;;  %v312_v17 = vld [vmem:[%s3332_s25 + $0x4e0] sm:$0xff]  ;;  %v314_v18 = vld [vmem:[%s3332_s25 + $0x4e8] sm:$0xff] }
  0x39   : > { %311 = vst [vmem:[%s3337_s26 + $0x280] sm:$0xff] %v310_v16  ;;  %v316_v19 = vld [vmem:[%s3332_s25 + $0x4f0] sm:$0xff]  ;;  %313 = vst [vmem:[%s3337_s26 + $0x288] sm:$0xff] %v312_v17  ;;  %v318_v20 = vld [vmem:[%s3332_s25 + $0x4f8] sm:$0xff] }
  0x3a   : > { %315 = vst [vmem:[%s3337_s26 + $0x290] sm:$0xff] %v314_v18  ;;  %317 = vst [vmem:[%s3337_s26 + $0x298] sm:$0xff] %v316_v19  ;;  %v320_v21 = vld [vmem:[%s3332_s25 + $0x500] sm:$0xff]  ;;  %v322_v22 = vld [vmem:[%s3332_s25 + $0x508] sm:$0xff] }
  0x3b   : > { %319 = vst [vmem:[%s3337_s26 + $0x2a0] sm:$0xff] %v318_v20  ;;  %321 = vst [vmem:[%s3337_s26 + $0x2a8] sm:$0xff] %v320_v21  ;;  %v324_v23 = vld [vmem:[%s3332_s25 + $0x510] sm:$0xff]  ;;  %v326_v24 = vld [vmem:[%s3332_s25 + $0x518] sm:$0xff] }
  0x3c   : > { %323 = vst [vmem:[%s3337_s26 + $0x2b0] sm:$0xff] %v322_v22  ;;  %v328_v25 = vld [vmem:[%s3332_s25 + $0x520] sm:$0xff]  ;;  %325 = vst [vmem:[%s3337_s26 + $0x2b8] sm:$0xff] %v324_v23  ;;  %v330_v26 = vld [vmem:[%s3332_s25 + $0x528] sm:$0xff] }
  0x3d   : > { %327 = vst [vmem:[%s3337_s26 + $0x2c0] sm:$0xff] %v326_v24  ;;  %329 = vst [vmem:[%s3337_s26 + $0x2c8] sm:$0xff] %v328_v25  ;;  %v332_v27 = vld [vmem:[%s3332_s25 + $0x530] sm:$0xff]  ;;  %v334_v28 = vld [vmem:[%s3332_s25 + $0x538] sm:$0xff] }
  0x3e   : > { %331 = vst [vmem:[%s3337_s26 + $0x2d0] sm:$0xff] %v330_v26  ;;  %333 = vst [vmem:[%s3337_s26 + $0x2d8] sm:$0xff] %v332_v27  ;;  %v336_v29 = vld [vmem:[%s3332_s25 + $0x540] sm:$0xff]  ;;  %v338_v30 = vld [vmem:[%s3332_s25 + $0x548] sm:$0xff] }
  0x3f   : > { %335 = vst [vmem:[%s3337_s26 + $0x2e0] sm:$0xff] %v334_v28  ;;  %v340_v31 = vld [vmem:[%s3332_s25 + $0x550] sm:$0xff]  ;;  %337 = vst [vmem:[%s3337_s26 + $0x2e8] sm:$0xff] %v336_v29  ;;  %v342_v32 = vld [vmem:[%s3332_s25 + $0x558] sm:$0xff] }
  0x40   : > { %339 = vst [vmem:[%s3337_s26 + $0x2f0] sm:$0xff] %v338_v30  ;;  %341 = vst [vmem:[%s3337_s26 + $0x2f8] sm:$0xff] %v340_v31  ;;  %v344_v33 = vld [vmem:[%s3332_s25 + $0x560] sm:$0xff]  ;;  %v346_v34 = vld [vmem:[%s3332_s25 + $0x568] sm:$0xff] }
  0x41   : > { %343 = vst [vmem:[%s3337_s26 + $0x300] sm:$0xff] %v342_v32  ;;  %345 = vst [vmem:[%s3337_s26 + $0x308] sm:$0xff] %v344_v33  ;;  %v348_v35 = vld [vmem:[%s3332_s25 + $0x570] sm:$0xff]  ;;  %v350_v36 = vld [vmem:[%s3332_s25 + $0x640] sm:$0xff] }
  0x42   : > { %347 = vst [vmem:[%s3337_s26 + $0x310] sm:$0xff] %v346_v34  ;;  %v352_v37 = vld [vmem:[%s3332_s25 + $0x648] sm:$0xff]  ;;  %349 = vst [vmem:[%s3337_s26 + $0x318] sm:$0xff] %v348_v35  ;;  %v354_v38 = vld [vmem:[%s3332_s25 + $0x650] sm:$0xff] }
  0x43   : > { %351 = vst [vmem:[%s3337_s26 + $0x320] sm:$0xff] %v350_v36  ;;  %353 = vst [vmem:[%s3337_s26 + $0x328] sm:$0xff] %v352_v37  ;;  %v356_v39 = vld [vmem:[%s3332_s25 + $0x658] sm:$0xff]  ;;  %v358_v40 = vld [vmem:[%s3332_s25 + $0x660] sm:$0xff] }
  0x44   : > { %355 = vst [vmem:[%s3337_s26 + $0x330] sm:$0xff] %v354_v38  ;;  %357 = vst [vmem:[%s3337_s26 + $0x338] sm:$0xff] %v356_v39  ;;  %v360_v41 = vld [vmem:[%s3332_s25 + $0x668] sm:$0xff]  ;;  %v362_v42 = vld [vmem:[%s3332_s25 + $0x670] sm:$0xff] }
  0x45   : > { %359 = vst [vmem:[%s3337_s26 + $0x340] sm:$0xff] %v358_v40  ;;  %v364_v43 = vld [vmem:[%s3332_s25 + $0x678] sm:$0xff]  ;;  %361 = vst [vmem:[%s3337_s26 + $0x348] sm:$0xff] %v360_v41  ;;  %v366_v44 = vld [vmem:[%s3332_s25 + $0x680] sm:$0xff] }
  0x46   : > { %363 = vst [vmem:[%s3337_s26 + $0x350] sm:$0xff] %v362_v42  ;;  %365 = vst [vmem:[%s3337_s26 + $0x358] sm:$0xff] %v364_v43  ;;  %v368_v45 = vld [vmem:[%s3332_s25 + $0x688] sm:$0xff]  ;;  %v370_v46 = vld [vmem:[%s3332_s25 + $0x690] sm:$0xff] }
  0x47   : > { %367 = vst [vmem:[%s3337_s26 + $0x360] sm:$0xff] %v366_v44  ;;  %369 = vst [vmem:[%s3337_s26 + $0x368] sm:$0xff] %v368_v45  ;;  %v372_v47 = vld [vmem:[%s3332_s25 + $0x698] sm:$0xff]  ;;  %v374_v48 = vld [vmem:[%s3332_s25 + $0x6a0] sm:$0xff] }
  0x48   : > { %371 = vst [vmem:[%s3337_s26 + $0x370] sm:$0xff] %v370_v46  ;;  %v376_v49 = vld [vmem:[%s3332_s25 + $0x6a8] sm:$0xff]  ;;  %373 = vst [vmem:[%s3337_s26 + $0x378] sm:$0xff] %v372_v47  ;;  %v378_v50 = vld [vmem:[%s3332_s25 + $0x6b0] sm:$0xff] }
  0x49   : > { %375 = vst [vmem:[%s3337_s26 + $0x380] sm:$0xff] %v374_v48  ;;  %377 = vst [vmem:[%s3337_s26 + $0x388] sm:$0xff] %v376_v49  ;;  %v380_v51 = vld [vmem:[%s3332_s25 + $0x6b8] sm:$0xff]  ;;  %v382_v52 = vld [vmem:[%s3332_s25 + $0x6c0] sm:$0xff] }
  0x4a   : > { %379 = vst [vmem:[%s3337_s26 + $0x390] sm:$0xff] %v378_v50  ;;  %381 = vst [vmem:[%s3337_s26 + $0x398] sm:$0xff] %v380_v51  ;;  %v384_v53 = vld [vmem:[%s3332_s25 + $0x6c8] sm:$0xff]  ;;  %v386_v54 = vld [vmem:[%s3332_s25 + $0x6d0] sm:$0xff] }
  0x4b   : > { %383 = vst [vmem:[%s3337_s26 + $0x3a0] sm:$0xff] %v382_v52  ;;  %v388_v55 = vld [vmem:[%s3332_s25 + $0x6d8] sm:$0xff]  ;;  %385 = vst [vmem:[%s3337_s26 + $0x3a8] sm:$0xff] %v384_v53  ;;  %v390_v56 = vld [vmem:[%s3332_s25 + $0x6e0] sm:$0xff] }
  0x4c   : > { %387 = vst [vmem:[%s3337_s26 + $0x3b0] sm:$0xff] %v386_v54  ;;  %389 = vst [vmem:[%s3337_s26 + $0x3b8] sm:$0xff] %v388_v55  ;;  %v392_v57 = vld [vmem:[%s3332_s25 + $0x6e8] sm:$0xff]  ;;  %v394_v58 = vld [vmem:[%s3332_s25 + $0x6f0] sm:$0xff] }
  0x4d   : > { %391 = vst [vmem:[%s3337_s26 + $0x3c0] sm:$0xff] %v390_v56  ;;  %393 = vst [vmem:[%s3337_s26 + $0x3c8] sm:$0xff] %v392_v57  ;;  %v396_v59 = vld [vmem:[%s3332_s25 + $0x6f8] sm:$0xff]  ;;  %v398_v60 = vld [vmem:[%s3332_s25 + $0x700] sm:$0xff] }
  0x4e   : > { %395 = vst [vmem:[%s3337_s26 + $0x3d0] sm:$0xff] %v394_v58  ;;  %v400_v61 = vld [vmem:[%s3332_s25 + $0x7d0] sm:$0xff]  ;;  %397 = vst [vmem:[%s3337_s26 + $0x3d8] sm:$0xff] %v396_v59  ;;  %v402_v62 = vld [vmem:[%s3332_s25 + $0x7d8] sm:$0xff] }
  0x4f   : > { %399 = vst [vmem:[%s3337_s26 + $0x3e0] sm:$0xff] %v398_v60  ;;  %401 = vst [vmem:[%s3337_s26 + $0x3e8] sm:$0xff] %v400_v61  ;;  %v404_v63 = vld [vmem:[%s3332_s25 + $0x7e0] sm:$0xff]  ;;  %v406_v0 = vld [vmem:[%s3332_s25 + $0x7e8] sm:$0xff] }
  0x50   : > { %403 = vst [vmem:[%s3337_s26 + $0x3f0] sm:$0xff] %v402_v62  ;;  %405 = vst [vmem:[%s3337_s26 + $0x3f8] sm:$0xff] %v404_v63  ;;  %v408_v1 = vld [vmem:[%s3332_s25 + $0x7f0] sm:$0xff]  ;;  %v410_v2 = vld [vmem:[%s3332_s25 + $0x7f8] sm:$0xff] }
  0x51   : > { %407 = vst [vmem:[%s3337_s26 + $0x400] sm:$0xff] %v406_v0  ;;  %v412_v3 = vld [vmem:[%s3332_s25 + $0x800] sm:$0xff]  ;;  %409 = vst [vmem:[%s3337_s26 + $0x408] sm:$0xff] %v408_v1  ;;  %v414_v4 = vld [vmem:[%s3332_s25 + $0x808] sm:$0xff] }
  0x52   : > { %411 = vst [vmem:[%s3337_s26 + $0x410] sm:$0xff] %v410_v2  ;;  %413 = vst [vmem:[%s3337_s26 + $0x418] sm:$0xff] %v412_v3  ;;  %v416_v5 = vld [vmem:[%s3332_s25 + $0x810] sm:$0xff]  ;;  %v418_v6 = vld [vmem:[%s3332_s25 + $0x818] sm:$0xff] }
  0x53   : > { %415 = vst [vmem:[%s3337_s26 + $0x420] sm:$0xff] %v414_v4  ;;  %417 = vst [vmem:[%s3337_s26 + $0x428] sm:$0xff] %v416_v5  ;;  %v420_v7 = vld [vmem:[%s3332_s25 + $0x820] sm:$0xff]  ;;  %v422_v8 = vld [vmem:[%s3332_s25 + $0x828] sm:$0xff] }
  0x54   : > { %419 = vst [vmem:[%s3337_s26 + $0x430] sm:$0xff] %v418_v6  ;;  %v424_v9 = vld [vmem:[%s3332_s25 + $0x830] sm:$0xff]  ;;  %421 = vst [vmem:[%s3337_s26 + $0x438] sm:$0xff] %v420_v7  ;;  %v426_v10 = vld [vmem:[%s3332_s25 + $0x838] sm:$0xff] }
  0x55   : > { %423 = vst [vmem:[%s3337_s26 + $0x440] sm:$0xff] %v422_v8  ;;  %425 = vst [vmem:[%s3337_s26 + $0x448] sm:$0xff] %v424_v9  ;;  %v428_v11 = vld [vmem:[%s3332_s25 + $0x840] sm:$0xff]  ;;  %v430_v12 = vld [vmem:[%s3332_s25 + $0x848] sm:$0xff] }
  0x56   : > { %427 = vst [vmem:[%s3337_s26 + $0x450] sm:$0xff] %v426_v10  ;;  %429 = vst [vmem:[%s3337_s26 + $0x458] sm:$0xff] %v428_v11  ;;  %v432_v13 = vld [vmem:[%s3332_s25 + $0x850] sm:$0xff]  ;;  %v434_v14 = vld [vmem:[%s3332_s25 + $0x858] sm:$0xff] }
  0x57   : > { %431 = vst [vmem:[%s3337_s26 + $0x460] sm:$0xff] %v430_v12  ;;  %v436_v15 = vld [vmem:[%s3332_s25 + $0x860] sm:$0xff]  ;;  %433 = vst [vmem:[%s3337_s26 + $0x468] sm:$0xff] %v432_v13  ;;  %v438_v16 = vld [vmem:[%s3332_s25 + $0x868] sm:$0xff] }
  0x58   : > { %435 = vst [vmem:[%s3337_s26 + $0x470] sm:$0xff] %v434_v14  ;;  %437 = vst [vmem:[%s3337_s26 + $0x478] sm:$0xff] %v436_v15  ;;  %v440_v17 = vld [vmem:[%s3332_s25 + $0x870] sm:$0xff]  ;;  %v442_v18 = vld [vmem:[%s3332_s25 + $0x878] sm:$0xff] }
  0x59   : > { %439 = vst [vmem:[%s3337_s26 + $0x480] sm:$0xff] %v438_v16  ;;  %441 = vst [vmem:[%s3337_s26 + $0x488] sm:$0xff] %v440_v17  ;;  %v444_v19 = vld [vmem:[%s3332_s25 + $0x880] sm:$0xff]  ;;  %v446_v20 = vld [vmem:[%s3332_s25 + $0x888] sm:$0xff] }
  0x5a   : > { %443 = vst [vmem:[%s3337_s26 + $0x490] sm:$0xff] %v442_v18  ;;  %v448_v21 = vld [vmem:[%s3332_s25 + $0x890] sm:$0xff]  ;;  %445 = vst [vmem:[%s3337_s26 + $0x498] sm:$0xff] %v444_v19 }
  0x5b   : > { %447 = vst [vmem:[%s3337_s26 + $0x4a0] sm:$0xff] %v446_v20  ;;  %449 = vst [vmem:[%s3337_s26 + $0x4a8] sm:$0xff] %v448_v21 }
  0x5c PF: > { %p2770_p5 = scmp.ge.s32.totalorder %s3275_s14, 1  ;;  %p454_p6 = scmp.lt.s32.totalorder %s3275_s14, 3 }
  0x5e   : > { %p455_p7 = pnand %p2770_p5, %p454_p6 }
  0x5f   : > { %s461_s27 = sand.u32 (!%p455_p7), 1, %s3267_s12   ;;  %s485_s7 = smul.u32 (!%p455_p7), 50, %s2765_s15 }
  0x60   : > { %458 = sbr.rel (%p455_p7) target bundleno = 461 (0x1cd), region = 51 }
  0x61   : > { %s3001_s30 = smul.u32 (!%p455_p7), 1200, %s461_s27  ;;  %p486_p8 = scmp.lt.s32.totalorder (!%p455_p7), %s485_s7, 99 }
  0x63   : > { %s3645_s4 = scalar_lea.vmem (!%p455_p7), [#allocation2], %s3001_s30 }
  0x65   : > { %v643_v22 = vld [vmem:[%s3971_s2] sm:$0xff]  ;;  %v3277_v23 = vmov 0   ;;  %vm1399_vm0 = vcmask 392192   ;;  %s3977_s7 = smov (!%p486_p8, %s485_s7), 99 }
  0x66   : > { %1435 = vmatprep.mubr.bf16.mxu0 %v3277_v23  ;;  %1476 = vmatprep.mubr.bf16.mxu1 %v3277_v23  ;;  %v3028_v24 = vld [vmem:[%s3645_s4 + $0x324] ss:$200 sps:$4 sm:$0xff]   ;;  %v3030_v25 = vld [vmem:[%s3645_s4 + $0x320] ss:$200 sps:$4 sm:$0xff]   ;;  %v3031_v26 = vld [vmem:[%s3645_s4 + $0x194] ss:$200 sps:$4 sm:$0xff]  }
  0x67   : > { %3027 = vset.pattern.permute.xlu0 %v3277_v23  ;;  %1413 = vmatprep.subr.bf16.mxu0 %v3028_v24  ;;  %v3033_v27 = vld [vmem:[%s3645_s4 + $0x190] ss:$200 sps:$4 sm:$0xff]   ;;  %v3034_v28 = vld [vmem:[%s3645_s4 + $0x32c] ss:$200 sps:$4 sm:$0xff]   ;;  %v3040_v31 = vld [vmem:[%s3645_s4 + $0x19c] ss:$200 sps:$4 sm:$0xff]  }
  0x68   : > { %646 = vperm.xlu0 %3027, %v643_v22   ;;  %1414 = vmatpush1.bf16.msra.mxu0 %v3030_v25  ;;  %v3036_v29 = vld [vmem:[%s3645_s4 + $0x328] ss:$200 sps:$4 sm:$0xff]   ;;  %v3037_v30 = vld [vmem:[%s3645_s4 + $0x4] ss:$200 sps:$4 sm:$0xff]   ;;  %v3042_v32 = vld [vmem:[%s3645_s4 + $0x198] ss:$200 sps:$4 sm:$0xff]  }
  0x69   : > { %1415 = vmatprep.subr.bf16.mxu0 %v3031_v26  ;;  %1454 = vmatprep.subr.bf16.mxu1 %v3034_v28  ;;  %v3039_v33 = vld [vmem:[%s3645_s4] ss:$200 sps:$4 sm:$0xff]   ;;  %v3045_v34 = vld [vmem:[%s3645_s4 + $0x334] ss:$200 sps:$4 sm:$0xff]   ;;  %v3043_v38 = vld [vmem:[%s3645_s4 + $0x330] ss:$200 sps:$4 sm:$0xff]  }
  0x6a   : > { %1455 = vmatpush1.bf16.msra.mxu1 %v3036_v29  ;;  %v3046_v35 = vld [vmem:[%s3645_s4 + $0xc] ss:$200 sps:$4 sm:$0xff]   ;;  %v3662_v36 = vld [vmem:[%s3969_s0] sm:$0xf]  ;;  %v3054_v39 = vld [vmem:[%s3645_s4 + $0x33c] ss:$200 sps:$4 sm:$0xff]  }
  0x6b   : > { %1456 = vmatprep.subr.bf16.mxu1 %v3040_v31  ;;  %v3048_v37 = vld [vmem:[%s3645_s4 + $0x8] ss:$200 sps:$4 sm:$0xff]   ;;  %v3051_v40 = vld [vmem:[%s3645_s4 + $0x1a4] ss:$200 sps:$4 sm:$0xff]   ;;  %v3052_v41 = vld [vmem:[%s3645_s4 + $0x338] ss:$200 sps:$4 sm:$0xff]  }
  0x6c   : > { %1416 = vmatpush1.bf16.msra.mxu0 %v3033_v27  ;;  %v3049_v42 = vld [vmem:[%s3645_s4 + $0x1a0] ss:$200 sps:$4 sm:$0xff]   ;;  %v3060_v43 = vld [vmem:[%s3645_s4 + $0x1ac] ss:$200 sps:$4 sm:$0xff]   ;;  %v3055_v46 = vld [vmem:[%s3645_s4 + $0x10] ss:$200 sps:$4 sm:$0xff]  }
  0x6d   : > { %1417 = vmatprep.subr.bf16.mxu0 %v3037_v30  ;;  %v3057_v44 = vld [vmem:[%s3645_s4 + $0x14] ss:$200 sps:$4 sm:$0xff]   ;;  %v3058_v45 = vld [vmem:[%s3645_s4 + $0x1a8] ss:$200 sps:$4 sm:$0xff]   ;;  %v3063_v48 = vld [vmem:[%s3645_s4 + $0x344] ss:$200 sps:$4 sm:$0xff]  }
  0x6e   : > { %1457 = vmatpush1.bf16.msra.mxu1 %v3042_v32  ;;  %v3066_v47 = vld [vmem:[%s3645_s4 + $0x1c] ss:$200 sps:$4 sm:$0xff]   ;;  %v3064_v49 = vld [vmem:[%s3645_s4 + $0x18] ss:$200 sps:$4 sm:$0xff]   ;;  %v3072_v51 = vld [vmem:[%s3645_s4 + $0x34c] ss:$200 sps:$4 sm:$0xff]  }
  0x6f   : > { %1458 = vmatprep.subr.bf16.mxu1 %v3046_v35  ;;  %v3061_v50 = vld [vmem:[%s3645_s4 + $0x340] ss:$200 sps:$4 sm:$0xff]   ;;  %v3069_v52 = vld [vmem:[%s3645_s4 + $0x1b4] ss:$200 sps:$4 sm:$0xff]   ;;  %v3067_v54 = vld [vmem:[%s3645_s4 + $0x1b0] ss:$200 sps:$4 sm:$0xff]  }
  0x70   : > { %1418 = vmatpush1.bf16.msra.mxu0 %v3039_v33  ;;  %v3070_v53 = vld [vmem:[%s3645_s4 + $0x348] ss:$200 sps:$4 sm:$0xff]   ;;  %v3078_v55 = vld [vmem:[%s3645_s4 + $0x1bc] ss:$200 sps:$4 sm:$0xff]   ;;  %v3076_v57 = vld [vmem:[%s3645_s4 + $0x1b8] ss:$200 sps:$4 sm:$0xff]  }
  0x71   : > { %1495 = vmatprep.subr.bf16.mxu0 %v3045_v34  ;;  %v3075_v56 = vld [vmem:[%s3645_s4 + $0x24] ss:$200 sps:$4 sm:$0xff]   ;;  %v3073_v58 = vld [vmem:[%s3645_s4 + $0x20] ss:$200 sps:$4 sm:$0xff]   ;;  %v3081_v60 = vld [vmem:[%s3645_s4 + $0x354] ss:$200 sps:$4 sm:$0xff]  }
  0x72   : > { %1459 = vmatpush1.bf16.msra.mxu1 %v3048_v37  ;;  %v3084_v59 = vld [vmem:[%s3645_s4 + $0x2c] ss:$200 sps:$4 sm:$0xff]   ;;  %v3082_v61 = vld [vmem:[%s3645_s4 + $0x28] ss:$200 sps:$4 sm:$0xff]   ;;  %v3090_v63 = vld [vmem:[%s3645_s4 + $0x35c] ss:$200 sps:$4 sm:$0xff]  }
  0x73   : > { %2922 = vmatmul.mubr.msk.bf16.vlgmr.msra.gmra.mxu0 %vm1399_vm0, %v3662_v36  ;;  %1536 = vmatprep.subr.bf16.mxu1 %v3054_v39  ;;  %v3079_v62 = vld [vmem:[%s3645_s4 + $0x350] ss:$200 sps:$4 sm:$0xff]   ;;  %v3087_v0 = vld [vmem:[%s3645_s4 + $0x1c4] ss:$200 sps:$4 sm:$0xff]   ;;  %v3085_v2 = vld [vmem:[%s3645_s4 + $0x1c0] ss:$200 sps:$4 sm:$0xff]  }
  0x74   : > { %1496 = vmatpush1.bf16.msra.mxu0 %v3043_v38  ;;  %1517 = vmatprep.mubr.bf16.mxu0 %v3277_v23  ;;  %v3088_v1 = vld [vmem:[%s3645_s4 + $0x358] ss:$200 sps:$4 sm:$0xff]   ;;  %v3096_v3 = vld [vmem:[%s3645_s4 + $0x1cc] ss:$200 sps:$4 sm:$0xff]   ;;  %v3094_v5 = vld [vmem:[%s3645_s4 + $0x1c8] ss:$200 sps:$4 sm:$0xff]  }
  0x75   : > { %1497 = vmatprep.subr.bf16.mxu0 %v3051_v40  ;;  %2923 = vmatmul.mubr.msk.bf16.vlgmr.msra.gmra.mxu1 %vm1399_vm0, %v3662_v36  ;;  %v3093_v4 = vld [vmem:[%s3645_s4 + $0x34] ss:$200 sps:$4 sm:$0xff]   ;;  %v3091_v6 = vld [vmem:[%s3645_s4 + $0x30] ss:$200 sps:$4 sm:$0xff]   ;;  %v3099_v8 = vld [vmem:[%s3645_s4 + $0x364] ss:$200 sps:$4 sm:$0xff]  }
  0x76   : > { %1537 = vmatpush1.bf16.msra.mxu1 %v3052_v41  ;;  %1558 = vmatprep.mubr.bf16.mxu1 %v3277_v23  ;;  %v3102_v7 = vld [vmem:[%s3645_s4 + $0x3c] ss:$200 sps:$4 sm:$0xff]   ;;  %v3100_v9 = vld [vmem:[%s3645_s4 + $0x38] ss:$200 sps:$4 sm:$0xff]   ;;  %v3108_v11 = vld [vmem:[%s3645_s4 + $0x36c] ss:$200 sps:$4 sm:$0xff]  }
  0x77   : > { %1538 = vmatprep.subr.bf16.mxu1 %v3060_v43  ;;  %v3097_v10 = vld [vmem:[%s3645_s4 + $0x360] ss:$200 sps:$4 sm:$0xff]   ;;  %v3105_v12 = vld [vmem:[%s3645_s4 + $0x1d4] ss:$200 sps:$4 sm:$0xff]   ;;  %v3103_v14 = vld [vmem:[%s3645_s4 + $0x1d0] ss:$200 sps:$4 sm:$0xff]  }
  0x78   : > { %1498 = vmatpush1.bf16.msra.mxu0 %v3049_v42  ;;  %v3106_v13 = vld [vmem:[%s3645_s4 + $0x368] ss:$200 sps:$4 sm:$0xff]   ;;  %v3114_v15 = vld [vmem:[%s3645_s4 + $0x1dc] ss:$200 sps:$4 sm:$0xff]   ;;  %v3112_v17 = vld [vmem:[%s3645_s4 + $0x1d8] ss:$200 sps:$4 sm:$0xff]  }
  0x79   : > { %1499 = vmatprep.subr.bf16.mxu0 %v3057_v44  ;;  %v3111_v16 = vld [vmem:[%s3645_s4 + $0x44] ss:$200 sps:$4 sm:$0xff]   ;;  %v3109_v18 = vld [vmem:[%s3645_s4 + $0x40] ss:$200 sps:$4 sm:$0xff]   ;;  %v3117_v20 = vld [vmem:[%s3645_s4 + $0x374] ss:$200 sps:$4 sm:$0xff]  }
  0x7a   : > { %1539 = vmatpush1.bf16.msra.mxu1 %v3058_v45  ;;  %v3120_v19 = vld [vmem:[%s3645_s4 + $0x4c] ss:$200 sps:$4 sm:$0xff]   ;;  %v3118_v21 = vld [vmem:[%s3645_s4 + $0x48] ss:$200 sps:$4 sm:$0xff]   ;;  %v3126_v24 = vld [vmem:[%s3645_s4 + $0x37c] ss:$200 sps:$4 sm:$0xff]  }
  0x7b   : > { %1540 = vmatprep.subr.bf16.mxu1 %v3066_v47  ;;  %v3115_v22 = vld [vmem:[%s3645_s4 + $0x370] ss:$200 sps:$4 sm:$0xff]   ;;  %v3123_v25 = vld [vmem:[%s3645_s4 + $0x1e4] ss:$200 sps:$4 sm:$0xff]   ;;  %v3121_v27 = vld [vmem:[%s3645_s4 + $0x1e0] ss:$200 sps:$4 sm:$0xff]  }
  0x7c   : > { %1500 = vmatpush1.bf16.msra.mxu0 %v3055_v46  ;;  %v3124_v26 = vld [vmem:[%s3645_s4 + $0x378] ss:$200 sps:$4 sm:$0xff]   ;;  %v3132_v28 = vld [vmem:[%s3645_s4 + $0x1ec] ss:$200 sps:$4 sm:$0xff]   ;;  %v3130_v30 = vld [vmem:[%s3645_s4 + $0x1e8] ss:$200 sps:$4 sm:$0xff]  }
  0x7d   : > { %1577 = vmatprep.subr.bf16.mxu0 %v3063_v48  ;;  %v3129_v29 = vld [vmem:[%s3645_s4 + $0x54] ss:$200 sps:$4 sm:$0xff]   ;;  %v3127_v31 = vld [vmem:[%s3645_s4 + $0x50] ss:$200 sps:$4 sm:$0xff]   ;;  %v3135_v33 = vld [vmem:[%s3645_s4 + $0x384] ss:$200 sps:$4 sm:$0xff]  }
  0x7e   : > { %1541 = vmatpush1.bf16.msra.mxu1 %v3064_v49  ;;  %v3138_v32 = vld [vmem:[%s3645_s4 + $0x5c] ss:$200 sps:$4 sm:$0xff]   ;;  %v3136_v34 = vld [vmem:[%s3645_s4 + $0x58] ss:$200 sps:$4 sm:$0xff]   ;;  %v3144_v37 = vld [vmem:[%s3645_s4 + $0x38c] ss:$200 sps:$4 sm:$0xff]  }
  0x7f   : > { %2924 = vmatmul.mubr.msk.bf16.vlgmr.msra.gmra.mxu0 %vm1399_vm0, %v3662_v36  ;;  %1618 = vmatprep.subr.bf16.mxu1 %v3072_v51  ;;  %v3133_v35 = vld [vmem:[%s3645_s4 + $0x380] ss:$200 sps:$4 sm:$0xff]   ;;  %v3141_v38 = vld [vmem:[%s3645_s4 + $0x1f4] ss:$200 sps:$4 sm:$0xff]   ;;  %v3139_v40 = vld [vmem:[%s3645_s4 + $0x1f0] ss:$200 sps:$4 sm:$0xff]  }
  0x80   : > { %1578 = vmatpush1.bf16.msra.mxu0 %v3061_v50  ;;  %1599 = vmatprep.mubr.bf16.mxu0 %v3277_v23  ;;  %v3142_v39 = vld [vmem:[%s3645_s4 + $0x388] ss:$200 sps:$4 sm:$0xff]   ;;  %v3150_v41 = vld [vmem:[%s3645_s4 + $0x1fc] ss:$200 sps:$4 sm:$0xff]   ;;  %v3148_v43 = vld [vmem:[%s3645_s4 + $0x1f8] ss:$200 sps:$4 sm:$0xff]  }
  0x81   : > { %1579 = vmatprep.subr.bf16.mxu0 %v3069_v52  ;;  %2925 = vmatmul.mubr.msk.bf16.vlgmr.msra.gmra.mxu1 %vm1399_vm0, %v3662_v36  ;;  %v3147_v42 = vld [vmem:[%s3645_s4 + $0x64] ss:$200 sps:$4 sm:$0xff]   ;;  %v3145_v44 = vld [vmem:[%s3645_s4 + $0x60] ss:$200 sps:$4 sm:$0xff]   ;;  %v3153_v46 = vld [vmem:[%s3645_s4 + $0x394] ss:$200 sps:$4 sm:$0xff]  }
  0x82   : > { %1619 = vmatpush1.bf16.msra.mxu1 %v3070_v53  ;;  %1640 = vmatprep.mubr.bf16.mxu1 %v3277_v23  ;;  %v3156_v45 = vld [vmem:[%s3645_s4 + $0x6c] ss:$200 sps:$4 sm:$0xff]   ;;  %v3154_v47 = vld [vmem:[%s3645_s4 + $0x68] ss:$200 sps:$4 sm:$0xff]   ;;  %v3162_v49 = vld [vmem:[%s3645_s4 + $0x39c] ss:$200 sps:$4 sm:$0xff]  }
  0x83   : > { %1620 = vmatprep.subr.bf16.mxu1 %v3078_v55  ;;  %v3151_v48 = vld [vmem:[%s3645_s4 + $0x390] ss:$200 sps:$4 sm:$0xff]   ;;  %v3159_v50 = vld [vmem:[%s3645_s4 + $0x204] ss:$200 sps:$4 sm:$0xff]   ;;  %v3157_v52 = vld [vmem:[%s3645_s4 + $0x200] ss:$200 sps:$4 sm:$0xff]  }
  0x84   : > { %1580 = vmatpush1.bf16.msra.mxu0 %v3067_v54  ;;  %v3160_v51 = vld [vmem:[%s3645_s4 + $0x398] ss:$200 sps:$4 sm:$0xff]   ;;  %v3168_v53 = vld [vmem:[%s3645_s4 + $0x20c] ss:$200 sps:$4 sm:$0xff]   ;;  %v3166_v55 = vld [vmem:[%s3645_s4 + $0x208] ss:$200 sps:$4 sm:$0xff]  }
  0x85   : > { %1581 = vmatprep.subr.bf16.mxu0 %v3075_v56  ;;  %v3165_v54 = vld [vmem:[%s3645_s4 + $0x74] ss:$200 sps:$4 sm:$0xff]   ;;  %v3163_v56 = vld [vmem:[%s3645_s4 + $0x70] ss:$200 sps:$4 sm:$0xff]   ;;  %s2771_s8 = sshll.u32 %s3977_s7, 2 }
  0x86   : > { %1621 = vmatpush1.bf16.msra.mxu1 %v3076_v57  ;;  %v3174_v57 = vld [vmem:[%s3645_s4 + $0x7c] ss:$200 sps:$4 sm:$0xff]   ;;  %s3885_s11 = scalar_lea.vmem %s3972_s3, %s2771_s8 }
  0x87   : > { %1622 = vmatprep.subr.bf16.mxu1 %v3084_v59  ;;  %v3172_v59 = vld [vmem:[%s3645_s4 + $0x78] ss:$200 sps:$4 sm:$0xff]  }
  0x88   : > { %1582 = vmatpush1.bf16.msra.mxu0 %v3073_v58  ;;  %v3171_v58 = vld [vmem:[%s3645_s4 + $0x3a4] ss:$200 sps:$4 sm:$0xff]  }
  0x89   : > { %1659 = vmatprep.subr.bf16.mxu0 %v3081_v60  ;;  %v3169_v60 = vld [vmem:[%s3645_s4 + $0x3a0] ss:$200 sps:$4 sm:$0xff]  }
  0x8a   : > { %1623 = vmatpush1.bf16.msra.mxu1 %v3082_v61  ;;  %v3180_v61 = vld [vmem:[%s3645_s4 + $0x3ac] ss:$200 sps:$4 sm:$0xff]  }
  0x8b   : > { %2926 = vmatmul.mubr.msk.bf16.vlgmr.msra.gmra.mxu0 %vm1399_vm0, %v3662_v36  ;;  %1700 = vmatprep.subr.bf16.mxu1 %v3090_v63  ;;  %v3178_v63 = vld [vmem:[%s3645_s4 + $0x3a8] ss:$200 sps:$4 sm:$0xff]  }
  0x8c   : > { %1660 = vmatpush1.bf16.msra.mxu0 %v3079_v62  ;;  %1681 = vmatprep.mubr.bf16.mxu0 %v3277_v23  ;;  %v3177_v62 = vld [vmem:[%s3645_s4 + $0x214] ss:$200 sps:$4 sm:$0xff]  }
  0x8d   : > { %1661 = vmatprep.subr.bf16.mxu0 %v3087_v0  ;;  %2927 = vmatmul.mubr.msk.bf16.vlgmr.msra.gmra.mxu1 %vm1399_vm0, %v3662_v36  ;;  %v3175_v0 = vld [vmem:[%s3645_s4 + $0x210] ss:$200 sps:$4 sm:$0xff]  }
  0x8e   : > { %1701 = vmatpush1.bf16.msra.mxu1 %v3088_v1  ;;  %1722 = vmatprep.mubr.bf16.mxu1 %v3277_v23  ;;  %v3186_v1 = vld [vmem:[%s3645_s4 + $0x21c] ss:$200 sps:$4 sm:$0xff]  }
  0x8f   : > { %1702 = vmatprep.subr.bf16.mxu1 %v3096_v3  ;;  %v3184_v3 = vld [vmem:[%s3645_s4 + $0x218] ss:$200 sps:$4 sm:$0xff]  }
  0x90   : > { %1662 = vmatpush1.bf16.msra.mxu0 %v3085_v2  ;;  %v3183_v2 = vld [vmem:[%s3645_s4 + $0x84] ss:$200 sps:$4 sm:$0xff]  }
  0x91   : > { %1663 = vmatprep.subr.bf16.mxu0 %v3093_v4  ;;  %v3181_v4 = vld [vmem:[%s3645_s4 + $0x80] ss:$200 sps:$4 sm:$0xff]  }
  0x92   : > { %1703 = vmatpush1.bf16.msra.mxu1 %v3094_v5  ;;  %v3192_v5 = vld [vmem:[%s3645_s4 + $0x8c] ss:$200 sps:$4 sm:$0xff]  }
  0x93   : > { %1704 = vmatprep.subr.bf16.mxu1 %v3102_v7  ;;  %v3190_v7 = vld [vmem:[%s3645_s4 + $0x88] ss:$200 sps:$4 sm:$0xff]  }
  0x94   : > { %1664 = vmatpush1.bf16.msra.mxu0 %v3091_v6  ;;  %v3189_v6 = vld [vmem:[%s3645_s4 + $0x3b4] ss:$200 sps:$4 sm:$0xff]  }
  0x95   : > { %1741 = vmatprep.subr.bf16.mxu0 %v3099_v8  ;;  %v3187_v8 = vld [vmem:[%s3645_s4 + $0x3b0] ss:$200 sps:$4 sm:$0xff]  }
  0x96   : > { %1705 = vmatpush1.bf16.msra.mxu1 %v3100_v9  ;;  %v3198_v9 = vld [vmem:[%s3645_s4 + $0x3bc] ss:$200 sps:$4 sm:$0xff]  }
  0x97   : > { %2928 = vmatmul.mubr.msk.bf16.vlgmr.msra.gmra.mxu0 %vm1399_vm0, %v3662_v36  ;;  %1782 = vmatprep.subr.bf16.mxu1 %v3108_v11  ;;  %v3196_v11 = vld [vmem:[%s3645_s4 + $0x3b8] ss:$200 sps:$4 sm:$0xff]  }
  0x98   : > { %1742 = vmatpush1.bf16.msra.mxu0 %v3097_v10  ;;  %1763 = vmatprep.mubr.bf16.mxu0 %v3277_v23  ;;  %v3195_v10 = vld [vmem:[%s3645_s4 + $0x224] ss:$200 sps:$4 sm:$0xff]  }
  0x99   : > { %1743 = vmatprep.subr.bf16.mxu0 %v3105_v12  ;;  %2929 = vmatmul.mubr.msk.bf16.vlgmr.msra.gmra.mxu1 %vm1399_vm0, %v3662_v36  ;;  %v3193_v12 = vld [vmem:[%s3645_s4 + $0x220] ss:$200 sps:$4 sm:$0xff]  }
  0x9a   : > { %1783 = vmatpush1.bf16.msra.mxu1 %v3106_v13  ;;  %1804 = vmatprep.mubr.bf16.mxu1 %v3277_v23  ;;  %v3204_v13 = vld [vmem:[%s3645_s4 + $0x22c] ss:$200 sps:$4 sm:$0xff]  }
  0x9b   : > { %1784 = vmatprep.subr.bf16.mxu1 %v3114_v15  ;;  %v3202_v15 = vld [vmem:[%s3645_s4 + $0x228] ss:$200 sps:$4 sm:$0xff]  }
  0x9c   : > { %1744 = vmatpush1.bf16.msra.mxu0 %v3103_v14  ;;  %v3201_v14 = vld [vmem:[%s3645_s4 + $0x94] ss:$200 sps:$4 sm:$0xff]  }
  0x9d   : > { %1745 = vmatprep.subr.bf16.mxu0 %v3111_v16  ;;  %v3199_v16 = vld [vmem:[%s3645_s4 + $0x90] ss:$200 sps:$4 sm:$0xff]  }
  0x9e   : > { %1785 = vmatpush1.bf16.msra.mxu1 %v3112_v17  ;;  %v3210_v17 = vld [vmem:[%s3645_s4 + $0x9c] ss:$200 sps:$4 sm:$0xff]  }
  0x9f   : > { %1786 = vmatprep.subr.bf16.mxu1 %v3120_v19  ;;  %v3208_v19 = vld [vmem:[%s3645_s4 + $0x98] ss:$200 sps:$4 sm:$0xff]  }
  0xa0   : > { %1746 = vmatpush1.bf16.msra.mxu0 %v3109_v18  ;;  %v3207_v18 = vld [vmem:[%s3645_s4 + $0x3c4] ss:$200 sps:$4 sm:$0xff]  }
  0xa1   : > { %1823 = vmatprep.subr.bf16.mxu0 %v3117_v20  ;;  %v3205_v20 = vld [vmem:[%s3645_s4 + $0x3c0] ss:$200 sps:$4 sm:$0xff]  }
  0xa2   : > { %1787 = vmatpush1.bf16.msra.mxu1 %v3118_v21  ;;  %v3216_v21 = vld [vmem:[%s3645_s4 + $0x3cc] ss:$200 sps:$4 sm:$0xff]  }
  0xa3   : > { %2930 = vmatmul.mubr.msk.bf16.vlgmr.msra.gmra.mxu0 %vm1399_vm0, %v3662_v36  ;;  %1864 = vmatprep.subr.bf16.mxu1 %v3126_v24  ;;  %v3214_v24 = vld [vmem:[%s3645_s4 + $0x3c8] ss:$200 sps:$4 sm:$0xff]  }
  0xa4   : > { %1824 = vmatpush1.bf16.msra.mxu0 %v3115_v22  ;;  %1845 = vmatprep.mubr.bf16.mxu0 %v3277_v23  ;;  %v3213_v22 = vld [vmem:[%s3645_s4 + $0x234] ss:$200 sps:$4 sm:$0xff]  }
  0xa5   : > { %1825 = vmatprep.subr.bf16.mxu0 %v3123_v25  ;;  %2931 = vmatmul.mubr.msk.bf16.vlgmr.msra.gmra.mxu1 %vm1399_vm0, %v3662_v36  ;;  %v3211_v25 = vld [vmem:[%s3645_s4 + $0x230] ss:$200 sps:$4 sm:$0xff]  }
  0xa6   : > { %1865 = vmatpush1.bf16.msra.mxu1 %v3124_v26  ;;  %1886 = vmatprep.mubr.bf16.mxu1 %v3277_v23  ;;  %v3222_v26 = vld [vmem:[%s3645_s4 + $0x23c] ss:$200 sps:$4 sm:$0xff]  }
  0xa7   : > { %1866 = vmatprep.subr.bf16.mxu1 %v3132_v28  ;;  %v3220_v28 = vld [vmem:[%s3645_s4 + $0x238] ss:$200 sps:$4 sm:$0xff]  }
  0xa8   : > { %1826 = vmatpush1.bf16.msra.mxu0 %v3121_v27  ;;  %v3219_v27 = vld [vmem:[%s3645_s4 + $0xa4] ss:$200 sps:$4 sm:$0xff]  }
  0xa9   : > { %1827 = vmatprep.subr.bf16.mxu0 %v3129_v29  ;;  %v3217_v29 = vld [vmem:[%s3645_s4 + $0xa0] ss:$200 sps:$4 sm:$0xff]  }
  0xaa   : > { %1867 = vmatpush1.bf16.msra.mxu1 %v3130_v30  ;;  %v3228_v30 = vld [vmem:[%s3645_s4 + $0xac] ss:$200 sps:$4 sm:$0xff]  }
  0xab   : > { %1868 = vmatprep.subr.bf16.mxu1 %v3138_v32  ;;  %v3226_v32 = vld [vmem:[%s3645_s4 + $0xa8] ss:$200 sps:$4 sm:$0xff]  }
  0xac   : > { %1828 = vmatpush1.bf16.msra.mxu0 %v3127_v31  ;;  %v3225_v31 = vld [vmem:[%s3645_s4 + $0x3d4] ss:$200 sps:$4 sm:$0xff]  }
  0xad   : > { %1905 = vmatprep.subr.bf16.mxu0 %v3135_v33  ;;  %v3223_v33 = vld [vmem:[%s3645_s4 + $0x3d0] ss:$200 sps:$4 sm:$0xff]  }
  0xae   : > { %1869 = vmatpush1.bf16.msra.mxu1 %v3136_v34  ;;  %v3234_v34 = vld [vmem:[%s3645_s4 + $0x3dc] ss:$200 sps:$4 sm:$0xff]  }
  0xaf   : > { %2932 = vmatmul.mubr.msk.bf16.vlgmr.msra.gmra.mxu0 %vm1399_vm0, %v3662_v36  ;;  %1946 = vmatprep.subr.bf16.mxu1 %v3144_v37  ;;  %v3232_v37 = vld [vmem:[%s3645_s4 + $0x3d8] ss:$200 sps:$4 sm:$0xff]  }
  0xb0   : > { %1906 = vmatpush1.bf16.msra.mxu0 %v3133_v35  ;;  %1927 = vmatprep.mubr.bf16.mxu0 %v3277_v23  ;;  %v3231_v35 = vld [vmem:[%s3645_s4 + $0x244] ss:$200 sps:$4 sm:$0xff]  }
  0xb1   : > { %1907 = vmatprep.subr.bf16.mxu0 %v3141_v38  ;;  %2933 = vmatmul.mubr.msk.bf16.vlgmr.msra.gmra.mxu1 %vm1399_vm0, %v3662_v36  ;;  %v3229_v38 = vld [vmem:[%s3645_s4 + $0x240] ss:$200 sps:$4 sm:$0xff]  }
  0xb2   : > { %1947 = vmatpush1.bf16.msra.mxu1 %v3142_v39  ;;  %1968 = vmatprep.mubr.bf16.mxu1 %v3277_v23  ;;  %v3240_v39 = vld [vmem:[%s3645_s4 + $0x24c] ss:$200 sps:$4 sm:$0xff]  }
  0xb3   : > { %1948 = vmatprep.subr.bf16.mxu1 %v3150_v41  ;;  %v3238_v41 = vld [vmem:[%s3645_s4 + $0x248] ss:$200 sps:$4 sm:$0xff]  }
  0xb4   : > { %1908 = vmatpush1.bf16.msra.mxu0 %v3139_v40  ;;  %v3237_v40 = vld [vmem:[%s3645_s4 + $0xb4] ss:$200 sps:$4 sm:$0xff]  }
  0xb5   : > { %1909 = vmatprep.subr.bf16.mxu0 %v3147_v42  ;;  %v3235_v42 = vld [vmem:[%s3645_s4 + $0xb0] ss:$200 sps:$4 sm:$0xff]  }
  0xb6   : > { %1949 = vmatpush1.bf16.msra.mxu1 %v3148_v43  ;;  %v3246_v43 = vld [vmem:[%s3645_s4 + $0xbc] ss:$200 sps:$4 sm:$0xff]  }
  0xb7   : > { %1950 = vmatprep.subr.bf16.mxu1 %v3156_v45  ;;  %v3244_v45 = vld [vmem:[%s3645_s4 + $0xb8] ss:$200 sps:$4 sm:$0xff]  }
  0xb8   : > { %1910 = vmatpush1.bf16.msra.mxu0 %v3145_v44  ;;  %v3243_v44 = vld [vmem:[%s3645_s4 + $0x3e4] ss:$200 sps:$4 sm:$0xff]  }
  0xb9   : > { %1987 = vmatprep.subr.bf16.mxu0 %v3153_v46  ;;  %v3241_v46 = vld [vmem:[%s3645_s4 + $0x3e0] ss:$200 sps:$4 sm:$0xff]  }
  0xba   : > { %1951 = vmatpush1.bf16.msra.mxu1 %v3154_v47  ;;  %v3249_v47 = vld [vmem:[%s3645_s4 + $0x254] ss:$200 sps:$4 sm:$0xff]  }
  0xbb   : > { %2934 = vmatmul.mubr.msk.bf16.vlgmr.msra.gmra.mxu0 %vm1399_vm0, %v3662_v36  ;;  %2028 = vmatprep.subr.bf16.mxu1 %v3162_v49  ;;  %v3252_v49 = vld [vmem:[%s3645_s4 + $0xc4] ss:$200 sps:$4 sm:$0xff]  }
  0xbc   : > { %1988 = vmatpush1.bf16.msra.mxu0 %v3151_v48  ;;  %2009 = vmatprep.mubr.bf16.mxu0 %v3277_v23  ;;  %v3247_v48 = vld [vmem:[%s3645_s4 + $0x250] ss:$200 sps:$4 sm:$0xff]  }
  0xbd   : > { %1989 = vmatprep.subr.bf16.mxu0 %v3159_v50  ;;  %2935 = vmatmul.mubr.msk.bf16.vlgmr.msra.gmra.mxu1 %vm1399_vm0, %v3662_v36  ;;  %v3250_v50 = vld [vmem:[%s3645_s4 + $0xc0] ss:$200 sps:$4 sm:$0xff]  }
  0xbe   : > { %2029 = vmatpush1.bf16.msra.mxu1 %v3160_v51  ;;  %2050 = vmatprep.mubr.bf16.mxu1 %v3277_v23 }
  0xbf   : > { %2030 = vmatprep.subr.bf16.mxu1 %v3168_v53 }
  0xc0   : > { %1990 = vmatpush1.bf16.msra.mxu0 %v3157_v52 }
  0xc1   : > { %1991 = vmatprep.subr.bf16.mxu0 %v3165_v54 }
  0xc2   : > { %2031 = vmatpush1.bf16.msra.mxu1 %v3166_v55 }
  0xc3   : > { %2032 = vmatprep.subr.bf16.mxu1 %v3174_v57 }
  0xc4   : > { %1992 = vmatpush1.bf16.msra.mxu0 %v3163_v56 }
  0xc5   : > { %2069 = vmatprep.subr.bf16.mxu0 %v3171_v58 }
  0xc6   : > { %2033 = vmatpush1.bf16.msra.mxu1 %v3172_v59 }
  0xc7   : > { %2936 = vmatmul.mubr.msk.bf16.vlgmr.msra.gmra.mxu0 %vm1399_vm0, %v3662_v36  ;;  %2110 = vmatprep.subr.bf16.mxu1 %v3180_v61 }
  0xc8   : > { %2070 = vmatpush1.bf16.msra.mxu0 %v3169_v60  ;;  %2091 = vmatprep.mubr.bf16.mxu0 %v3277_v23 }
  0xc9   : > { %2071 = vmatprep.subr.bf16.mxu0 %v3177_v62  ;;  %2937 = vmatmul.mubr.msk.bf16.vlgmr.msra.gmra.mxu1 %vm1399_vm0, %v3662_v36 }
  0xca   : > { %2111 = vmatpush1.bf16.msra.mxu1 %v3178_v63  ;;  %2132 = vmatprep.mubr.bf16.mxu1 %v3277_v23 }
  0xcb   : > { %2112 = vmatprep.subr.bf16.mxu1 %v3186_v1 }
  0xcc   : > { %2072 = vmatpush1.bf16.msra.mxu0 %v3175_v0 }
  0xcd   : > { %2073 = vmatprep.subr.bf16.mxu0 %v3183_v2 }
  0xce   : > { %2113 = vmatpush1.bf16.msra.mxu1 %v3184_v3 }
  0xcf   : > { %2114 = vmatprep.subr.bf16.mxu1 %v3192_v5 }
  0xd0   : > { %2074 = vmatpush1.bf16.msra.mxu0 %v3181_v4 }
  0xd1   : > { %2151 = vmatprep.subr.bf16.mxu0 %v3189_v6 }
  0xd2   : > { %2115 = vmatpush1.bf16.msra.mxu1 %v3190_v7 }
  0xd3   : > { %2938 = vmatmul.mubr.msk.bf16.vlgmr.msra.gmra.mxu0 %vm1399_vm0, %v3662_v36  ;;  %2192 = vmatprep.subr.bf16.mxu1 %v3198_v9 }
  0xd4   : > { %2152 = vmatpush1.bf16.msra.mxu0 %v3187_v8  ;;  %2173 = vmatprep.mubr.bf16.mxu0 %v3277_v23 }
  0xd5   : > { %2153 = vmatprep.subr.bf16.mxu0 %v3195_v10  ;;  %2939 = vmatmul.mubr.msk.bf16.vlgmr.msra.gmra.mxu1 %vm1399_vm0, %v3662_v36 }
  0xd6   : > { %2193 = vmatpush1.bf16.msra.mxu1 %v3196_v11  ;;  %2214 = vmatprep.mubr.bf16.mxu1 %v3277_v23 }
  0xd7   : > { %2194 = vmatprep.subr.bf16.mxu1 %v3204_v13 }
  0xd8   : > { %2154 = vmatpush1.bf16.msra.mxu0 %v3193_v12 }
  0xd9   : > { %2155 = vmatprep.subr.bf16.mxu0 %v3201_v14 }
  0xda   : > { %2195 = vmatpush1.bf16.msra.mxu1 %v3202_v15 }
  0xdb   : > { %2196 = vmatprep.subr.bf16.mxu1 %v3210_v17 }
  0xdc   : > { %2156 = vmatpush1.bf16.msra.mxu0 %v3199_v16 }
  0xdd   : > { %2233 = vmatprep.subr.bf16.mxu0 %v3207_v18 }
  0xde   : > { %2197 = vmatpush1.bf16.msra.mxu1 %v3208_v19 }
  0xdf   : > { %2940 = vmatmul.mubr.msk.bf16.vlgmr.msra.gmra.mxu0 %vm1399_vm0, %v3662_v36  ;;  %2274 = vmatprep.subr.bf16.mxu1 %v3216_v21 }
  0xe0   : > { %2234 = vmatpush1.bf16.msra.mxu0 %v3205_v20  ;;  %2255 = vmatprep.mubr.bf16.mxu0 %v3277_v23 }
  0xe1   : > { %2235 = vmatprep.subr.bf16.mxu0 %v3213_v22  ;;  %2941 = vmatmul.mubr.msk.bf16.vlgmr.msra.gmra.mxu1 %vm1399_vm0, %v3662_v36 }
  0xe2   : > { %2275 = vmatpush1.bf16.msra.mxu1 %v3214_v24  ;;  %2296 = vmatprep.mubr.bf16.mxu1 %v3277_v23 }
  0xe3   : > { %2276 = vmatprep.subr.bf16.mxu1 %v3222_v26  ;;  %v3877_v51 = vpop.permute.xlu0 %646 }
  0xe4   : > { %2236 = vmatpush1.bf16.msra.mxu0 %v3211_v25 }
  0xe5   : > { %2237 = vmatprep.subr.bf16.mxu0 %v3219_v27 }
  0xe6   : > { %2277 = vmatpush1.bf16.msra.mxu1 %v3220_v28 }
  0xe7   : > { %2278 = vmatprep.subr.bf16.mxu1 %v3228_v30 }
  0xe8   : > { %2238 = vmatpush1.bf16.msra.mxu0 %v3217_v29 }
  0xe9   : > { %2315 = vmatprep.subr.bf16.mxu0 %v3225_v31 }
  0xea   : > { %2279 = vmatpush1.bf16.msra.mxu1 %v3226_v32 }
  0xeb   : > { %2942 = vmatmul.mubr.msk.bf16.vlgmr.msra.gmra.mxu0 %vm1399_vm0, %v3662_v36  ;;  %2356 = vmatprep.subr.bf16.mxu1 %v3234_v34 }
  0xec   : > { %2316 = vmatpush1.bf16.msra.mxu0 %v3223_v33  ;;  %2337 = vmatprep.mubr.bf16.mxu0 %v3277_v23 }
  0xed   : > { %2317 = vmatprep.subr.bf16.mxu0 %v3231_v35  ;;  %2943 = vmatmul.mubr.msk.bf16.vlgmr.msra.gmra.mxu1 %vm1399_vm0, %v3662_v36 }
  0xee   : > { %2357 = vmatpush1.bf16.msra.mxu1 %v3232_v37  ;;  %2378 = vmatprep.mubr.bf16.mxu1 %v3277_v23 }
  0xef   : > { %2358 = vmatprep.subr.bf16.mxu1 %v3240_v39 }
  0xf0   : > { %2318 = vmatpush1.bf16.msra.mxu0 %v3229_v38 }
  0xf1   : > { %2319 = vmatprep.subr.bf16.mxu0 %v3237_v40 }
  0xf2   : > { %2359 = vmatpush1.bf16.msra.mxu1 %v3238_v41 }
  0xf3   : > { %2360 = vmatprep.subr.bf16.mxu1 %v3246_v43 }
  0xf4   : > { %2320 = vmatpush1.bf16.msra.mxu0 %v3235_v42 }
  0xf5   : > { %2397 = vmatprep.subr.bf16.mxu0 %v3243_v44 }
  0xf6   : > { %2361 = vmatpush1.bf16.msra.mxu1 %v3244_v45 }
  0xf7   : > { %2944 = vmatmul.mubr.msk.bf16.vlgmr.msra.gmra.mxu0 %vm1399_vm0, %v3662_v36 }
  0xf8   : > { %2398 = vmatpush1.bf16.msra.mxu0 %v3241_v46  ;;  %2419 = vmatprep.mubr.bf16.mxu0 %v3277_v23 }
  0xf9   : > { %2399 = vmatprep.subr.bf16.mxu0 %v3249_v47  ;;  %2945 = vmatmul.mubr.msk.bf16.vlgmr.msra.gmra.mxu1 %vm1399_vm0, %v3662_v36 }
  0xfc   : > { %2400 = vmatpush1.bf16.msra.mxu0 %v3247_v48 }
  0xfd   : > { %2401 = vmatprep.subr.bf16.mxu0 %v3252_v49 }
 0x100   : > { %2402 = vmatpush1.bf16.msra.mxu0 %v3250_v50 }
 0x103   : > { %2946 = vmatmul.mubr.msk.bf16.vlgmr.msra.gmra.mxu0 %vm1399_vm0, %v3662_v36 }
 0x133   : > { %v1437_v52 = vpop.f32.mrf.mxu0 }
 0x134   : > { %v1438_v23 = vadd.f32 %v1437_v52, %v3877_v51 }
 0x135   : > { %v1439_v53 = vpop.f32.mrf.mxu0  ;;  %v1478_v56 = vpop.f32.mrf.mxu1 }
 0x136   : > { %v1440_v54 = vadd.f32 %v1439_v53, %v3877_v51  ;;  %v2428_v55 = vmax.f32 %v1438_v23, 0.0  ;;  %v1479_v58 = vadd.f32 %v1478_v56, %v3877_v51 }
 0x137   : > { %v1441_v57 = vpop.f32.mrf.mxu0  ;;  %v1480_v36 = vpop.f32.mrf.mxu1 }
 0x138   : > { %v2429_v59 = vmax.f32 %v1440_v54, 0.0  ;;  %v2430_v61 = vmax.f32 %v1479_v58, 0.0  ;;  %v1481_v62 = vadd.f32 %v1480_v36, %v3877_v51 }
 0x139   : > { %v1442_v60 = vpop.f32.mrf.mxu0  ;;  %v1482_v0 = vpop.f32.mrf.mxu1 }
 0x13a   : > { %v2975_v63 = vpack.c.bf16 %v2429_v59, %v2428_v55  ;;  %v2431_v1 = vmax.f32 %v1481_v62, 0.0 }
 0x13b   : > { %v1483_v2 = vpop.f32.mrf.mxu1 }
 0x13c   : > { %2678 = vst [vmem:[%s3885_s11] sm:$0xff] %v2975_v63  ;;  %v2976_v3 = vpack.c.bf16 %v2431_v1, %v2430_v61 }
 0x13e   : > { %2679 = vst [vmem:[%s3885_s11 + $0x8] sm:$0xff] %v2976_v3 }
 0x13f   : > { %v1519_v4 = vpop.f32.mrf.mxu0 }
 0x140   : > { %v1520_v5 = vadd.f32 %v1519_v4, %v3877_v51 }
 0x141   : > { %v1521_v6 = vpop.f32.mrf.mxu0  ;;  %v1560_v9 = vpop.f32.mrf.mxu1 }
 0x142   : > { %v2432_v7 = vmax.f32 %v1520_v5, 0.0  ;;  %v1522_v8 = vadd.f32 %v1521_v6, %v3877_v51  ;;  %v1561_v11 = vadd.f32 %v1560_v9, %v3877_v51 }
 0x143   : > { %v1523_v10 = vpop.f32.mrf.mxu0  ;;  %v1562_v13 = vpop.f32.mrf.mxu1 }
 0x144   : > { %v2433_v12 = vmax.f32 %v1522_v8, 0.0  ;;  %v2434_v15 = vmax.f32 %v1561_v11, 0.0  ;;  %v1563_v16 = vadd.f32 %v1562_v13, %v3877_v51 }
 0x145   : > { %v1524_v14 = vpop.f32.mrf.mxu0  ;;  %v1564_v18 = vpop.f32.mrf.mxu1 }
 0x146   : > { %v2977_v17 = vpack.c.bf16 %v2433_v12, %v2432_v7  ;;  %v2435_v19 = vmax.f32 %v1563_v16, 0.0 }
 0x147   : > { %v1565_v20 = vpop.f32.mrf.mxu1 }
 0x148   : > { %2680 = vst [vmem:[%s3885_s11 + $0x10] sm:$0xff] %v2977_v17  ;;  %v2978_v21 = vpack.c.bf16 %v2435_v19, %v2434_v15 }
 0x14a   : > { %2681 = vst [vmem:[%s3885_s11 + $0x18] sm:$0xff] %v2978_v21 }
 0x14b   : > { %v1601_v22 = vpop.f32.mrf.mxu0 }
 0x14c   : > { %v1602_v24 = vadd.f32 %v1601_v22, %v3877_v51 }
 0x14d   : > { %v1603_v25 = vpop.f32.mrf.mxu0  ;;  %v1642_v28 = vpop.f32.mrf.mxu1 }
 0x14e   : > { %v2436_v26 = vmax.f32 %v1602_v24, 0.0  ;;  %v1604_v27 = vadd.f32 %v1603_v25, %v3877_v51  ;;  %v1643_v30 = vadd.f32 %v1642_v28, %v3877_v51 }
 0x14f   : > { %v1605_v29 = vpop.f32.mrf.mxu0  ;;  %v1644_v32 = vpop.f32.mrf.mxu1 }
 0x150   : > { %v2437_v31 = vmax.f32 %v1604_v27, 0.0  ;;  %v2438_v34 = vmax.f32 %v1643_v30, 0.0  ;;  %v1645_v35 = vadd.f32 %v1644_v32, %v3877_v51 }
 0x151   : > { %v1606_v33 = vpop.f32.mrf.mxu0  ;;  %v1646_v38 = vpop.f32.mrf.mxu1 }
 0x152   : > { %v2979_v37 = vpack.c.bf16 %v2437_v31, %v2436_v26  ;;  %v2439_v39 = vmax.f32 %v1645_v35, 0.0 }
 0x153   : > { %v1647_v40 = vpop.f32.mrf.mxu1 }
 0x154   : > { %2682 = vst [vmem:[%s3885_s11 + $0x20] sm:$0xff] %v2979_v37  ;;  %v2980_v41 = vpack.c.bf16 %v2439_v39, %v2438_v34 }
 0x156   : > { %2683 = vst [vmem:[%s3885_s11 + $0x28] sm:$0xff] %v2980_v41 }
 0x157   : > { %v1683_v42 = vpop.f32.mrf.mxu0 }
 0x158   : > { %v1684_v43 = vadd.f32 %v1683_v42, %v3877_v51 }
 0x159   : > { %v1685_v44 = vpop.f32.mrf.mxu0  ;;  %v1724_v47 = vpop.f32.mrf.mxu1 }
 0x15a   : > { %v2440_v45 = vmax.f32 %v1684_v43, 0.0  ;;  %v1686_v46 = vadd.f32 %v1685_v44, %v3877_v51  ;;  %v1725_v49 = vadd.f32 %v1724_v47, %v3877_v51 }
 0x15b   : > { %v1687_v48 = vpop.f32.mrf.mxu0  ;;  %v1726_v52 = vpop.f32.mrf.mxu1 }
 0x15c   : > { %v2441_v50 = vmax.f32 %v1686_v46, 0.0  ;;  %v2442_v53 = vmax.f32 %v1725_v49, 0.0  ;;  %v1727_v54 = vadd.f32 %v1726_v52, %v3877_v51 }
 0x15d   : > { %v1688_v23 = vpop.f32.mrf.mxu0  ;;  %v1728_v56 = vpop.f32.mrf.mxu1 }
 0x15e   : > { %v2981_v55 = vpack.c.bf16 %v2441_v50, %v2440_v45  ;;  %v2443_v57 = vmax.f32 %v1727_v54, 0.0 }
 0x15f   : > { %v1729_v58 = vpop.f32.mrf.mxu1 }
 0x160   : > { %2684 = vst [vmem:[%s3885_s11 + $0x30] sm:$0xff] %v2981_v55  ;;  %v2982_v59 = vpack.c.bf16 %v2443_v57, %v2442_v53 }
 0x162   : > { %2685 = vst [vmem:[%s3885_s11 + $0x38] sm:$0xff] %v2982_v59 }
 0x163   : > { %v1765_v36 = vpop.f32.mrf.mxu0 }
 0x164   : > { %v1766_v60 = vadd.f32 %v1765_v36, %v3877_v51 }
 0x165   : > { %v1767_v61 = vpop.f32.mrf.mxu0  ;;  %v1806_v0 = vpop.f32.mrf.mxu1 }
 0x166   : > { %v2444_v62 = vmax.f32 %v1766_v60, 0.0  ;;  %v1768_v63 = vadd.f32 %v1767_v61, %v3877_v51  ;;  %v1807_v2 = vadd.f32 %v1806_v0, %v3877_v51 }
 0x167   : > { %v1769_v1 = vpop.f32.mrf.mxu0  ;;  %v1808_v4 = vpop.f32.mrf.mxu1 }
 0x168   : > { %v2445_v3 = vmax.f32 %v1768_v63, 0.0  ;;  %v2446_v6 = vmax.f32 %v1807_v2, 0.0  ;;  %v1809_v7 = vadd.f32 %v1808_v4, %v3877_v51 }
 0x169   : > { %v1770_v5 = vpop.f32.mrf.mxu0  ;;  %v1810_v9 = vpop.f32.mrf.mxu1 }
 0x16a   : > { %v2983_v8 = vpack.c.bf16 %v2445_v3, %v2444_v62  ;;  %v2447_v10 = vmax.f32 %v1809_v7, 0.0 }
 0x16b   : > { %v1811_v11 = vpop.f32.mrf.mxu1 }
 0x16c   : > { %2686 = vst [vmem:[%s3885_s11 + $0x40] sm:$0xff] %v2983_v8  ;;  %v2984_v12 = vpack.c.bf16 %v2447_v10, %v2446_v6 }
 0x16e   : > { %2687 = vst [vmem:[%s3885_s11 + $0x48] sm:$0xff] %v2984_v12 }
 0x16f   : > { %v1847_v13 = vpop.f32.mrf.mxu0 }
 0x170   : > { %v1848_v14 = vadd.f32 %v1847_v13, %v3877_v51 }
 0x171   : > { %v1849_v15 = vpop.f32.mrf.mxu0  ;;  %v1888_v18 = vpop.f32.mrf.mxu1 }
 0x172   : > { %v2448_v16 = vmax.f32 %v1848_v14, 0.0  ;;  %v1850_v17 = vadd.f32 %v1849_v15, %v3877_v51  ;;  %v1889_v20 = vadd.f32 %v1888_v18, %v3877_v51 }
 0x173   : > { %v1851_v19 = vpop.f32.mrf.mxu0  ;;  %v1890_v22 = vpop.f32.mrf.mxu1 }
 0x174   : > { %v2449_v21 = vmax.f32 %v1850_v17, 0.0  ;;  %v2450_v25 = vmax.f32 %v1889_v20, 0.0  ;;  %v1891_v26 = vadd.f32 %v1890_v22, %v3877_v51 }
 0x175   : > { %v1852_v24 = vpop.f32.mrf.mxu0  ;;  %v1892_v28 = vpop.f32.mrf.mxu1 }
 0x176   : > { %v2985_v27 = vpack.c.bf16 %v2449_v21, %v2448_v16  ;;  %v2451_v29 = vmax.f32 %v1891_v26, 0.0 }
 0x177   : > { %v1893_v30 = vpop.f32.mrf.mxu1 }
 0x178   : > { %2688 = vst [vmem:[%s3885_s11 + $0x50] sm:$0xff] %v2985_v27  ;;  %v2986_v31 = vpack.c.bf16 %v2451_v29, %v2450_v25 }
 0x17a   : > { %2689 = vst [vmem:[%s3885_s11 + $0x58] sm:$0xff] %v2986_v31 }
 0x17b   : > { %v1929_v32 = vpop.f32.mrf.mxu0 }
 0x17c   : > { %v1930_v33 = vadd.f32 %v1929_v32, %v3877_v51 }
 0x17d   : > { %v1931_v34 = vpop.f32.mrf.mxu0  ;;  %v1970_v38 = vpop.f32.mrf.mxu1 }
 0x17e   : > { %v2452_v35 = vmax.f32 %v1930_v33, 0.0  ;;  %v1932_v37 = vadd.f32 %v1931_v34, %v3877_v51  ;;  %v1971_v40 = vadd.f32 %v1970_v38, %v3877_v51 }
 0x17f   : > { %v1933_v39 = vpop.f32.mrf.mxu0  ;;  %v1972_v42 = vpop.f32.mrf.mxu1 }
 0x180   : > { %v2453_v41 = vmax.f32 %v1932_v37, 0.0  ;;  %v2454_v44 = vmax.f32 %v1971_v40, 0.0  ;;  %v1973_v45 = vadd.f32 %v1972_v42, %v3877_v51 }
 0x181   : > { %v1934_v43 = vpop.f32.mrf.mxu0  ;;  %v1974_v47 = vpop.f32.mrf.mxu1 }
 0x182   : > { %v2987_v46 = vpack.c.bf16 %v2453_v41, %v2452_v35  ;;  %v2455_v48 = vmax.f32 %v1973_v45, 0.0 }
 0x183   : > { %v1975_v49 = vpop.f32.mrf.mxu1 }
 0x184   : > { %2690 = vst [vmem:[%s3885_s11 + $0x60] sm:$0xff] %v2987_v46  ;;  %v2988_v50 = vpack.c.bf16 %v2455_v48, %v2454_v44 }
 0x186   : > { %2691 = vst [vmem:[%s3885_s11 + $0x68] sm:$0xff] %v2988_v50 }
 0x187   : > { %v2011_v52 = vpop.f32.mrf.mxu0 }
 0x188   : > { %v2012_v23 = vadd.f32 %v2011_v52, %v3877_v51 }
 0x189   : > { %v2013_v53 = vpop.f32.mrf.mxu0  ;;  %v2052_v56 = vpop.f32.mrf.mxu1 }
 0x18a   : > { %v2456_v54 = vmax.f32 %v2012_v23, 0.0  ;;  %v2014_v55 = vadd.f32 %v2013_v53, %v3877_v51  ;;  %v2053_v58 = vadd.f32 %v2052_v56, %v3877_v51 }
 0x18b   : > { %v2015_v57 = vpop.f32.mrf.mxu0  ;;  %v2054_v36 = vpop.f32.mrf.mxu1 }
 0x18c   : > { %v2457_v59 = vmax.f32 %v2014_v55, 0.0  ;;  %v2458_v61 = vmax.f32 %v2053_v58, 0.0  ;;  %v2055_v62 = vadd.f32 %v2054_v36, %v3877_v51 }
 0x18d   : > { %v2016_v60 = vpop.f32.mrf.mxu0  ;;  %v2056_v0 = vpop.f32.mrf.mxu1 }
 0x18e   : > { %v2989_v63 = vpack.c.bf16 %v2457_v59, %v2456_v54  ;;  %v2459_v1 = vmax.f32 %v2055_v62, 0.0 }
 0x18f   : > { %v2057_v2 = vpop.f32.mrf.mxu1 }
 0x190   : > { %2692 = vst [vmem:[%s3885_s11 + $0x70] sm:$0xff] %v2989_v63  ;;  %v2990_v3 = vpack.c.bf16 %v2459_v1, %v2458_v61 }
 0x192   : > { %2693 = vst [vmem:[%s3885_s11 + $0x78] sm:$0xff] %v2990_v3 }
 0x193   : > { %v2093_v4 = vpop.f32.mrf.mxu0 }
 0x194   : > { %v2094_v5 = vadd.f32 %v2093_v4, %v3877_v51 }
 0x195   : > { %v2095_v6 = vpop.f32.mrf.mxu0  ;;  %v2134_v9 = vpop.f32.mrf.mxu1 }
 0x196   : > { %v2460_v7 = vmax.f32 %v2094_v5, 0.0  ;;  %v2096_v8 = vadd.f32 %v2095_v6, %v3877_v51  ;;  %v2135_v11 = vadd.f32 %v2134_v9, %v3877_v51 }
 0x197   : > { %v2097_v10 = vpop.f32.mrf.mxu0  ;;  %v2136_v13 = vpop.f32.mrf.mxu1 }
 0x198   : > { %v2461_v12 = vmax.f32 %v2096_v8, 0.0  ;;  %v2462_v15 = vmax.f32 %v2135_v11, 0.0  ;;  %v2137_v16 = vadd.f32 %v2136_v13, %v3877_v51 }
 0x199   : > { %v2098_v14 = vpop.f32.mrf.mxu0  ;;  %v2138_v18 = vpop.f32.mrf.mxu1 }
 0x19a   : > { %v2991_v17 = vpack.c.bf16 %v2461_v12, %v2460_v7  ;;  %v2463_v19 = vmax.f32 %v2137_v16, 0.0 }
 0x19b   : > { %v2139_v20 = vpop.f32.mrf.mxu1 }
 0x19c   : > { %2694 = vst [vmem:[%s3885_s11 + $0x80] sm:$0xff] %v2991_v17  ;;  %v2992_v21 = vpack.c.bf16 %v2463_v19, %v2462_v15 }
 0x19e   : > { %2695 = vst [vmem:[%s3885_s11 + $0x88] sm:$0xff] %v2992_v21 }
 0x19f   : > { %v2175_v22 = vpop.f32.mrf.mxu0 }
 0x1a0   : > { %v2176_v24 = vadd.f32 %v2175_v22, %v3877_v51 }
 0x1a1   : > { %v2177_v25 = vpop.f32.mrf.mxu0  ;;  %v2216_v28 = vpop.f32.mrf.mxu1 }
 0x1a2   : > { %v2464_v26 = vmax.f32 %v2176_v24, 0.0  ;;  %v2178_v27 = vadd.f32 %v2177_v25, %v3877_v51  ;;  %v2217_v30 = vadd.f32 %v2216_v28, %v3877_v51 }
 0x1a3   : > { %v2179_v29 = vpop.f32.mrf.mxu0  ;;  %v2218_v32 = vpop.f32.mrf.mxu1 }
 0x1a4   : > { %v2465_v31 = vmax.f32 %v2178_v27, 0.0  ;;  %v2466_v34 = vmax.f32 %v2217_v30, 0.0  ;;  %v2219_v35 = vadd.f32 %v2218_v32, %v3877_v51 }
 0x1a5   : > { %v2180_v33 = vpop.f32.mrf.mxu0  ;;  %v2220_v38 = vpop.f32.mrf.mxu1 }
 0x1a6   : > { %v2993_v37 = vpack.c.bf16 %v2465_v31, %v2464_v26  ;;  %v2467_v39 = vmax.f32 %v2219_v35, 0.0 }
 0x1a7   : > { %v2221_v40 = vpop.f32.mrf.mxu1 }
 0x1a8   : > { %2696 = vst [vmem:[%s3885_s11 + $0x90] sm:$0xff] %v2993_v37  ;;  %v2994_v41 = vpack.c.bf16 %v2467_v39, %v2466_v34 }
 0x1aa   : > { %2697 = vst [vmem:[%s3885_s11 + $0x98] sm:$0xff] %v2994_v41 }
 0x1ab   : > { %v2257_v42 = vpop.f32.mrf.mxu0 }
 0x1ac   : > { %v2258_v43 = vadd.f32 %v2257_v42, %v3877_v51 }
 0x1ad   : > { %v2259_v44 = vpop.f32.mrf.mxu0  ;;  %v2298_v47 = vpop.f32.mrf.mxu1 }
 0x1ae   : > { %v2468_v45 = vmax.f32 %v2258_v43, 0.0  ;;  %v2260_v46 = vadd.f32 %v2259_v44, %v3877_v51  ;;  %v2299_v49 = vadd.f32 %v2298_v47, %v3877_v51 }
 0x1af   : > { %v2261_v48 = vpop.f32.mrf.mxu0  ;;  %v2300_v52 = vpop.f32.mrf.mxu1 }
 0x1b0   : > { %v2469_v50 = vmax.f32 %v2260_v46, 0.0  ;;  %v2470_v53 = vmax.f32 %v2299_v49, 0.0  ;;  %v2301_v54 = vadd.f32 %v2300_v52, %v3877_v51 }
 0x1b1   : > { %v2262_v23 = vpop.f32.mrf.mxu0  ;;  %v2302_v56 = vpop.f32.mrf.mxu1 }
 0x1b2   : > { %v2995_v55 = vpack.c.bf16 %v2469_v50, %v2468_v45  ;;  %v2471_v57 = vmax.f32 %v2301_v54, 0.0 }
 0x1b3   : > { %v2303_v58 = vpop.f32.mrf.mxu1 }
 0x1b4   : > { %2698 = vst [vmem:[%s3885_s11 + $0xa0] sm:$0xff] %v2995_v55  ;;  %v2996_v59 = vpack.c.bf16 %v2471_v57, %v2470_v53 }
 0x1b6   : > { %2699 = vst [vmem:[%s3885_s11 + $0xa8] sm:$0xff] %v2996_v59 }
 0x1b7   : > { %v2339_v36 = vpop.f32.mrf.mxu0 }
 0x1b8   : > { %v2340_v60 = vadd.f32 %v2339_v36, %v3877_v51 }
 0x1b9   : > { %v2341_v61 = vpop.f32.mrf.mxu0  ;;  %v2380_v0 = vpop.f32.mrf.mxu1 }
 0x1ba   : > { %v2472_v62 = vmax.f32 %v2340_v60, 0.0  ;;  %v2342_v63 = vadd.f32 %v2341_v61, %v3877_v51  ;;  %v2381_v2 = vadd.f32 %v2380_v0, %v3877_v51 }
 0x1bb   : > { %v2343_v1 = vpop.f32.mrf.mxu0  ;;  %v2382_v4 = vpop.f32.mrf.mxu1 }
 0x1bc   : > { %v2473_v3 = vmax.f32 %v2342_v63, 0.0  ;;  %v2474_v6 = vmax.f32 %v2381_v2, 0.0  ;;  %v2383_v7 = vadd.f32 %v2382_v4, %v3877_v51 }
 0x1bd   : > { %v2344_v5 = vpop.f32.mrf.mxu0  ;;  %v2384_v9 = vpop.f32.mrf.mxu1 }
 0x1be   : > { %v2997_v8 = vpack.c.bf16 %v2473_v3, %v2472_v62  ;;  %v2475_v10 = vmax.f32 %v2383_v7, 0.0 }
 0x1bf   : > { %v2385_v11 = vpop.f32.mrf.mxu1 }
 0x1c0   : > { %2700 = vst [vmem:[%s3885_s11 + $0xb0] sm:$0xff] %v2997_v8  ;;  %v2998_v12 = vpack.c.bf16 %v2475_v10, %v2474_v6 }
 0x1c2   : > { %2701 = vst [vmem:[%s3885_s11 + $0xb8] sm:$0xff] %v2998_v12 }
 0x1c3   : > { %v2421_v13 = vpop.f32.mrf.mxu0 }
 0x1c4   : > { %v2422_v14 = vadd.f32 %v2421_v13, %v3877_v51 }
 0x1c5   : > { %v2423_v15 = vpop.f32.mrf.mxu0 }
 0x1c6   : > { %v2424_v16 = vadd.f32 %v2423_v15, %v3877_v51  ;;  %v2476_v18 = vmax.f32 %v2422_v14, 0.0 }
 0x1c7   : > { %v2425_v17 = vpop.f32.mrf.mxu0 }
 0x1c8   : > { %v2477_v19 = vmax.f32 %v2424_v16, 0.0 }
 0x1c9   : > { %v2426_v20 = vpop.f32.mrf.mxu0 }
 0x1ca   : > { %v2999_v21 = vpack.c.bf16 %v2477_v19, %v2476_v18 }
 0x1cc   : > { %2702 = vst [vmem:[%s3885_s11 + $0xc0] sm:$0xff] %v2999_v21 }
 0x1cd PF: > { %p10_p9 = scmp.ge.s32.totalorder %s3315_s16, 4   ;;  %s3973_s12 = smov %s3271_s13 }
 0x1ce   : > { %s3974_s13 = smov %s3324_s19  ;;  %s3975_s14 = smov %s3315_s16 }
 0x1cf   :  { %12 = sbr.rel (!%p10_p9) target bundleno = 2 (0x2), region = 90 }

// kernel: encoder_forward.7
= control target key start
LH: loop header
LB: loop body
LE: loop exit
PB: predicated region body
PF: predicated region fallthrough
CT: control target
= control target key end

     0   :  { %v815_v1 = vmov 0   ;;  %v816_v37 = vmov 0.0   ;;  %vm817_vm0 = vmmov 0   ;;  %vm618_vm1 = vcmask 257024   ;;  %s1051_s1 = inlined_call_operand.vmem [shape: bf16[128,800], index: 1, kind: input, shape index: {}]   ;;  %s1052_s0 = inlined_call_operand.vmem [shape: bf16[16,128], index: 0, kind: input, shape index: {}]   ;;  %s1053_s2 = inlined_call_operand.vmem [shape: f32[16,1], index: 2, kind: input, shape index: {}]   ;;  %s1054_s3 = inlined_call_operand.vmem [shape: bf16[16,800], index: 3, kind: output, shape index: {}]  }
   0x1   :  { %v734_v0 = vld [vmem:[%s1051_s1 + $0x18c] ss:$28 sps:$4 sm:$0xff]   ;;  %419 = vmatprep.mubr.bf16.mxu0 %v815_v1  ;;  %462 = vmatprep.mubr.bf16.mxu1 %v815_v1  ;;  %v736_v2 = vld [vmem:[%s1051_s1 + $0x194] ss:$28 sps:$4 sm:$0xff]   ;;  %v742_v6 = vld [vmem:[%s1051_s1 + $0x15c] ss:$28 sps:$4 sm:$0xff]  }
   0x2   :  { %733 = vset.pattern.permute.xlu0 %v815_v1  ;;  %387 = vmatprep.subr.bf16.mxu0 %v734_v0  ;;  %v738_v3 = vld [vmem:[%s1051_s1 + $0x188] ss:$28 sps:$4 sm:$0xff]   ;;  %v739_v4 = vld [vmem:[%s1051_s1 + $0x190] ss:$28 sps:$4 sm:$0xff]   ;;  %v745_v8 = vld [vmem:[%s1051_s1 + $0x158] ss:$28 sps:$4 sm:$0xff]  }
   0x3   :  { %430 = vmatprep.subr.bf16.mxu1 %v736_v2  ;;  %v740_v5 = vld [vmem:[%s1051_s1 + $0x154] ss:$28 sps:$4 sm:$0xff]   ;;  %388 = vmatpush1.bf16.msra.mxu0 %v738_v3  ;;  %v746_v9 = vld [vmem:[%s1051_s1 + $0x11c] ss:$28 sps:$4 sm:$0xff]   ;;  %v748_v10 = vld [vmem:[%s1051_s1 + $0x124] ss:$28 sps:$4 sm:$0xff]  }
   0x4   :  { %431 = vmatpush1.bf16.msra.mxu1 %v739_v4  ;;  %v744_v7 = vld [vmem:[%s1051_s1 + $0x150] ss:$28 sps:$4 sm:$0xff]   ;;  %389 = vmatprep.subr.bf16.mxu0 %v740_v5  ;;  %v750_v11 = vld [vmem:[%s1051_s1 + $0x118] ss:$28 sps:$4 sm:$0xff]   ;;  %v751_v12 = vld [vmem:[%s1051_s1 + $0x120] ss:$28 sps:$4 sm:$0xff]  }
   0x5   :  { %432 = vmatprep.subr.bf16.mxu1 %v742_v6  ;;  %v752_v13 = vld [vmem:[%s1051_s1 + $0xe4] ss:$28 sps:$4 sm:$0xff]   ;;  %v754_v14 = vld [vmem:[%s1051_s1 + $0xec] ss:$28 sps:$4 sm:$0xff]   ;;  %v760_v18 = vld [vmem:[%s1051_s1 + $0xb4] ss:$28 sps:$4 sm:$0xff]  }
   0x6   :  { %v756_v15 = vld [vmem:[%s1051_s1 + $0xe0] ss:$28 sps:$4 sm:$0xff]   ;;  %v757_v16 = vld [vmem:[%s1051_s1 + $0xe8] ss:$28 sps:$4 sm:$0xff]   ;;  %v763_v20 = vld [vmem:[%s1051_s1 + $0xb0] ss:$28 sps:$4 sm:$0xff]  }
   0x7   :  { %390 = vmatpush1.bf16.msra.mxu0 %v744_v7  ;;  %v758_v17 = vld [vmem:[%s1051_s1 + $0xac] ss:$28 sps:$4 sm:$0xff]   ;;  %v764_v21 = vld [vmem:[%s1051_s1 + $0x74] ss:$28 sps:$4 sm:$0xff]   ;;  %v766_v22 = vld [vmem:[%s1051_s1 + $0x7c] ss:$28 sps:$4 sm:$0xff]  }
   0x8   :  { %433 = vmatpush1.bf16.msra.mxu1 %v745_v8  ;;  %391 = vmatprep.subr.bf16.mxu0 %v746_v9  ;;  %v762_v19 = vld [vmem:[%s1051_s1 + $0xa8] ss:$28 sps:$4 sm:$0xff]   ;;  %v768_v23 = vld [vmem:[%s1051_s1 + $0x70] ss:$28 sps:$4 sm:$0xff]   ;;  %v769_v24 = vld [vmem:[%s1051_s1 + $0x78] ss:$28 sps:$4 sm:$0xff]  }
   0x9   :  { %434 = vmatprep.subr.bf16.mxu1 %v748_v10  ;;  %v770_v25 = vld [vmem:[%s1051_s1 + $0x3c] ss:$28 sps:$4 sm:$0xff]   ;;  %v772_v26 = vld [vmem:[%s1051_s1 + $0x44] ss:$28 sps:$4 sm:$0xff]   ;;  %v778_v30 = vld [vmem:[%s1051_s1 + $0xc] ss:$28 sps:$4 sm:$0xff]  }
   0xa   :  { %v774_v27 = vld [vmem:[%s1051_s1 + $0x38] ss:$28 sps:$4 sm:$0xff]   ;;  %v775_v28 = vld [vmem:[%s1051_s1 + $0x40] ss:$28 sps:$4 sm:$0xff]   ;;  %v781_v32 = vld [vmem:[%s1051_s1 + $0x8] ss:$28 sps:$4 sm:$0xff]  }
   0xb   :  { %392 = vmatpush1.bf16.msra.mxu0 %v750_v11  ;;  %v776_v29 = vld [vmem:[%s1051_s1 + $0x4] ss:$28 sps:$4 sm:$0xff]   ;;  %v785_v33 = vld [vmem:[%s1051_s1 + $0x19c] ss:$28 sps:$4 sm:$0xff]   ;;  %v793_v41 = vld [vmem:[%s1051_s1 + $0x12c] ss:$28 sps:$4 sm:$0xff]  }
   0xc   :  { %435 = vmatpush1.bf16.msra.mxu1 %v751_v12  ;;  %393 = vmatprep.subr.bf16.mxu0 %v752_v13  ;;  %v780_v31 = vld [vmem:[%s1051_s1] ss:$28 sps:$4 sm:$0xff]   ;;  %v783_v35 = vld [vmem:[%s1051_s1 + $0x198] ss:$28 sps:$4 sm:$0xff]   ;;  %v790_v40 = vld [vmem:[%s1051_s1 + $0x168] ss:$28 sps:$4 sm:$0xff]  }
   0xd   :  { %436 = vmatprep.subr.bf16.mxu1 %v754_v14  ;;  %v943_v34 = vld [vmem:[%s1052_s0] sm:$0xff]   ;;  %v794_v43 = vld [vmem:[%s1051_s1 + $0x130] ss:$28 sps:$4 sm:$0xff]   ;;  %v798_v48 = vld [vmem:[%s1051_s1 + $0xf8] ss:$28 sps:$4 sm:$0xff]  }
   0xe   :  { %v786_v36 = vld [vmem:[%s1051_s1 + $0x1a0] ss:$28 sps:$4 sm:$0xff]   ;;  %v791_v42 = vld [vmem:[%s1051_s1 + $0x128] ss:$28 sps:$4 sm:$0xff]   ;;  %v797_v44 = vld [vmem:[%s1051_s1 + $0xf4] ss:$28 sps:$4 sm:$0xff]  }
   0xf   :  { %394 = vmatpush1.bf16.msra.mxu0 %v756_v15  ;;  %v789_v38 = vld [vmem:[%s1051_s1 + $0x164] ss:$28 sps:$4 sm:$0xff]   ;;  %v82_v46 = vld [vmem:[%s1053_s2 + $0x8] sm:$0xff]  ;;  %v801_v49 = vld [vmem:[%s1051_s1 + $0xbc] ss:$28 sps:$4 sm:$0xff]  }
  0x10   :  { %437 = vmatpush1.bf16.msra.mxu1 %v757_v16  ;;  %395 = vmatprep.subr.bf16.mxu0 %v758_v17  ;;  %v787_v39 = vld [vmem:[%s1051_s1 + $0x160] ss:$28 sps:$4 sm:$0xff]   ;;  %v795_v47 = vld [vmem:[%s1051_s1 + $0xf0] ss:$28 sps:$4 sm:$0xff]   ;;  %v799_v50 = vld [vmem:[%s1051_s1 + $0xb8] ss:$28 sps:$4 sm:$0xff]  }
  0x11   :  { %438 = vmatprep.subr.bf16.mxu1 %v760_v18  ;;  %v81_v45 = vld [vmem:[%s1053_s2] sm:$0xff]  ;;  %v809_v55 = vld [vmem:[%s1051_s1 + $0x4c] ss:$28 sps:$4 sm:$0xff]   ;;  %v813_v58 = vld [vmem:[%s1051_s1 + $0x14] ss:$28 sps:$4 sm:$0xff]  }
  0x12   :  { %85 = vperm.xlu0 %733, %v81_v45   ;;  %v802_v51 = vld [vmem:[%s1051_s1 + $0xc0] ss:$28 sps:$4 sm:$0xff]   ;;  %v806_v54 = vld [vmem:[%s1051_s1 + $0x88] ss:$28 sps:$4 sm:$0xff]   ;;  %v810_v57 = vld [vmem:[%s1051_s1 + $0x50] ss:$28 sps:$4 sm:$0xff]  }
  0x13   :  { %396 = vmatpush1.bf16.msra.mxu0 %v762_v19  ;;  %v805_v52 = vld [vmem:[%s1051_s1 + $0x84] ss:$28 sps:$4 sm:$0xff]   ;;  %v811_v59 = vld [vmem:[%s1051_s1 + $0x10] ss:$28 sps:$4 sm:$0xff]   ;;  %v814_v60 = vld [vmem:[%s1051_s1 + $0x18] ss:$28 sps:$4 sm:$0xff]  }
  0x14   :  { %439 = vmatpush1.bf16.msra.mxu1 %v763_v20  ;;  %397 = vmatprep.subr.bf16.mxu0 %v764_v21  ;;  %v803_v53 = vld [vmem:[%s1051_s1 + $0x80] ss:$28 sps:$4 sm:$0xff]   ;;  %v807_v56 = vld [vmem:[%s1051_s1 + $0x48] ss:$28 sps:$4 sm:$0xff]  }
  0x15   :  { %440 = vmatprep.subr.bf16.mxu1 %v766_v22 }
  0x16   :  { %90 = vperm.xlu0 %733, %v82_v46  }
  0x17   :  { %398 = vmatpush1.bf16.msra.mxu0 %v768_v23 }
  0x18   :  { %441 = vmatpush1.bf16.msra.mxu1 %v769_v24  ;;  %399 = vmatprep.subr.bf16.mxu0 %v770_v25 }
  0x19   :  { %442 = vmatprep.subr.bf16.mxu1 %v772_v26 }
  0x1b   :  { %400 = vmatpush1.bf16.msra.mxu0 %v774_v27 }
  0x1c   :  { %443 = vmatpush1.bf16.msra.mxu1 %v775_v28  ;;  %401 = vmatprep.subr.bf16.mxu0 %v776_v29 }
  0x1d   :  { %444 = vmatprep.subr.bf16.mxu1 %v778_v30 }
  0x1f   :  { %402 = vmatpush1.bf16.msra.mxu0 %v780_v31 }
  0x20   :  { %445 = vmatpush1.bf16.msra.mxu1 %v781_v32  ;;  %473 = vmatprep.subr.bf16.mxu0 %v785_v33 }
  0x21   :  { %710 = vmatprep.subr.bf16.mxu1 %v816_v37 }
  0x22   :  { %420 = vmatmul.mubr.bf16.vlgmr.msra.gmra.mxu0 %v943_v34 }
  0x23   :  { %463 = vmatmul.mubr.bf16.vlgmr.msra.gmra.mxu1 %v943_v34  ;;  %474 = vmatpush1.bf16.msra.mxu0 %v783_v35 }
  0x24   :  { %711 = vmatpush3.bf16.msra.mxu1 %v786_v36  ;;  %475 = vmatprep.subr.bf16.mxu0 %v789_v38 }
  0x25   :  { %712 = vmatprep.subr.bf16.mxu1 %v816_v37  ;;  %505 = vmatprep.mubr.bf16.mxu0 %v815_v1 }
  0x26   :  { %726 = vmatprep.mubr.msk.bf16.mxu1 %vm817_vm0, %v816_v37 }
  0x27   :  { %476 = vmatpush1.bf16.msra.mxu0 %v787_v39 }
  0x28   :  { %713 = vmatpush3.bf16.msra.mxu1 %v790_v40  ;;  %477 = vmatprep.subr.bf16.mxu0 %v793_v41 }
  0x29   :  { %714 = vmatprep.subr.bf16.mxu1 %v816_v37 }
  0x2b   :  { %478 = vmatpush1.bf16.msra.mxu0 %v791_v42 }
  0x2c   :  { %715 = vmatpush3.bf16.msra.mxu1 %v794_v43  ;;  %479 = vmatprep.subr.bf16.mxu0 %v797_v44 }
  0x2d   :  { %716 = vmatprep.subr.bf16.mxu1 %v816_v37 }
  0x2f   :  { %480 = vmatpush1.bf16.msra.mxu0 %v795_v47 }
  0x30   :  { %717 = vmatpush3.bf16.msra.mxu1 %v798_v48  ;;  %481 = vmatprep.subr.bf16.mxu0 %v801_v49 }
  0x31   :  { %718 = vmatprep.subr.bf16.mxu1 %v816_v37 }
  0x33   :  { %482 = vmatpush1.bf16.msra.mxu0 %v799_v50 }
  0x34   :  { %719 = vmatpush3.bf16.msra.mxu1 %v802_v51  ;;  %483 = vmatprep.subr.bf16.mxu0 %v805_v52 }
  0x35   :  { %720 = vmatprep.subr.bf16.mxu1 %v816_v37 }
  0x37   :  { %484 = vmatpush1.bf16.msra.mxu0 %v803_v53 }
  0x38   :  { %721 = vmatpush3.bf16.msra.mxu1 %v806_v54  ;;  %485 = vmatprep.subr.bf16.mxu0 %v809_v55 }
  0x39   :  { %722 = vmatprep.subr.bf16.mxu1 %v816_v37 }
  0x3b   :  { %486 = vmatpush1.bf16.msra.mxu0 %v807_v56 }
  0x3c   :  { %723 = vmatpush3.bf16.msra.mxu1 %v810_v57  ;;  %487 = vmatprep.subr.bf16.mxu0 %v813_v58 }
  0x3d   :  { %724 = vmatprep.subr.bf16.mxu1 %v816_v37 }
  0x3f   :  { %488 = vmatpush1.bf16.msra.mxu0 %v811_v59 }
  0x40   :  { %725 = vmatpush3.bf16.msra.mxu1 %v814_v60 }
  0x42   :  { %506 = vmatmul.mubr.bf16.vlgmr.msra.gmra.mxu0 %v943_v34 }
  0x43   :  { %727 = vmatmul.mubr.bf16.vlgmr.msra.gmra.mxu1 %v943_v34 }
  0x8d   :  { %v86_v61 = vpop.permute.xlu0 %85 }
  0x91   :  { %v91_v8 = vpop.permute.xlu0 %90 }
  0xe2   :  { %v421_v62 = vpop.f32.mrf.mxu0 }
  0xe3   :  { %v464_v63 = vpop.f32.mrf.mxu1  ;;  %v422_v0 = vadd.f32 %v421_v62, %v86_v61 }
  0xe4   :  { %v465_v1 = vadd.f32 %v464_v63, %v86_v61  ;;  %v423_v2 = vpop.f32.mrf.mxu0 }
  0xe5   :  { %v466_v3 = vpop.f32.mrf.mxu1  ;;  %v557_v4 = vmax.f32 %v422_v0, 0.0  ;;  %v424_v6 = vadd.f32 %v423_v2, %v86_v61 }
  0xe6   :  { %v559_v5 = vmax.f32 %v465_v1, 0.0  ;;  %v467_v7 = vadd.f32 %v466_v3, %v86_v61  ;;  %v425_v9 = vpop.f32.mrf.mxu0 }
  0xe7   :  { %v468_v10 = vpop.f32.mrf.mxu1  ;;  %v558_v11 = vmax.f32 %v424_v6, 0.0  ;;  %v426_v13 = vadd.f32 %v425_v9, %v91_v8 }
  0xe8   :  { %v560_v12 = vmax.f32 %v467_v7, 0.0  ;;  %v469_v14 = vadd.f32 %v468_v10, %v91_v8  ;;  %v427_v15 = vpop.f32.mrf.mxu0 }
  0xe9   :  { %v470_v16 = vpop.f32.mrf.mxu1  ;;  %v693_v17 = vpack.c.bf16 %v558_v11, %v557_v4  ;;  %v428_v19 = vadd.f32 %v427_v15, %v91_v8  ;;  %v564_v21 = vmax.f32 %v426_v13, 0.0 }
  0xea   :  { %v694_v18 = vpack.c.bf16 %v560_v12, %v559_v5  ;;  %v471_v20 = vadd.f32 %v470_v16, %v91_v8  ;;  %v566_v22 = vmax.f32 %v469_v14, 0.0 }
  0xeb   :  { %615 = vst [vmem:[%s1054_s3] sm:$0xff] %v693_v17  ;;  %v565_v23 = vmax.f32 %v428_v19, 0.0 }
  0xec   :  { %616 = vst [vmem:[%s1054_s3 + $0x8] sm:$0xff] %v694_v18  ;;  %v567_v24 = vmax.f32 %v471_v20, 0.0 }
  0xed   :  { %v697_v25 = vpack.c.bf16 %v565_v23, %v564_v21 }
  0xee   :  { %v698_v26 = vpack.c.bf16 %v567_v24, %v566_v22 }
  0xef   :  { %620 = vst [vmem:[%s1054_s3 + $0x1c] sm:$0xff] %v697_v25 }
  0xf0   :  { %621 = vst [vmem:[%s1054_s3 + $0x24] sm:$0xff] %v698_v26 }
 0x102   :  { %v507_v27 = vpop.f32.mrf.mxu0 }
 0x103   :  { %v550_v28 = vpop.f32.mrf.mxu1  ;;  %v508_v29 = vadd.f32 %v507_v27, %v86_v61 }
 0x104   :  { %v551_v30 = vadd.f32 %v550_v28, %v86_v61  ;;  %v509_v31 = vpop.f32.mrf.mxu0 }
 0x105   :  { %v728_v32 = vpop.f32.mrf.mxu1  ;;  %v510_v34 = vadd.f32 %v509_v31, %v86_v61  ;;  %v561_v35 = vmax.f32 %v508_v29, 0.0 }
 0x106   :  { %v563_v33 = vmax.f32 %v551_v30, 0.0  ;;  %v511_v36 = vpop.f32.mrf.mxu0 }
 0x107   :  { %v553_v37 = vpop.f32.mrf.mxu1  ;;  %v562_v39 = vmax.f32 %v510_v34, 0.0  ;;  %v512_v40 = vadd.f32 %v511_v36, %v91_v8 }
 0x108   :  { %v696_v38 = vpack.c.bf16 %v563_v33, %v563_v33  ;;  %v554_v41 = vadd.f32 %v553_v37, %v91_v8  ;;  %v513_v42 = vpop.f32.mrf.mxu0 }
 0x109   :  { %v729_v43 = vpop.f32.mrf.mxu1  ;;  %v695_v44 = vpack.c.bf16 %v562_v39, %v561_v35  ;;  %v514_v46 = vadd.f32 %v513_v42, %v91_v8  ;;  %v568_v47 = vmax.f32 %v512_v40, 0.0 }
 0x10a   :  { %619 = vst.msk [vmem:[%s1054_s3 + $0x18] sm:$0xf] %vm618_vm1, %v696_v38  ;;  %v570_v45 = vmax.f32 %v554_v41, 0.0 }
 0x10b   :  { %617 = vst [vmem:[%s1054_s3 + $0x10] sm:$0xff] %v695_v44  ;;  %v569_v49 = vmax.f32 %v514_v46, 0.0 }
 0x10c   :  { %v700_v48 = vpack.c.bf16 %v570_v45, %v570_v45 }
 0x10d   :  { %v699_v50 = vpack.c.bf16 %v569_v49, %v568_v47 }
 0x10e   :  { %623 = vst.msk [vmem:[%s1054_s3 + $0x34] sm:$0xf] %vm618_vm1, %v700_v48 }
 0x10f   :  { %622 = vst [vmem:[%s1054_s3 + $0x2c] sm:$0xff] %v699_v50 }

// kernel: encoder_forward.8
= control target key start
LH: loop header
LB: loop body
LE: loop exit
PB: predicated region body
PF: predicated region fallthrough
CT: control target
= control target key end

     0   :  { %v341_v1 = vmov 0   ;;  %s446_s1 = inlined_call_operand.vmem [shape: bf16[256,128], index: 1, kind: input, shape index: {}]   ;;  %s447_s0 = inlined_call_operand.vmem [shape: bf16[32,256], index: 0, kind: input, shape index: {}]   ;;  %s448_s2 = inlined_call_operand.vmem [shape: f32[32,1], index: 2, kind: input, shape index: {}]   ;;  %s449_s3 = inlined_call_operand.vmem [shape: f32[32,128], index: 3, kind: output, shape index: {}]  }
   0x1   :  { %v319_v0 = vld [vmem:[%s446_s1 + $0x78] sm:$0xff]   ;;  %318 = vset.pattern.permute.xlu1 %v341_v1  ;;  %317 = vset.pattern.permute.xlu0 %v341_v1  ;;  %v321_v3 = vld [vmem:[%s446_s1 + $0x70] sm:$0xff]   ;;  %v323_v5 = vld [vmem:[%s446_s1 + $0x68] sm:$0xff]  }
   0x2   :  { %v320_v2 = vld [vmem:[%s446_s1 + $0x38] sm:$0xff]   ;;  %272 = vmatprep.subr.bf16.mxu0 %v319_v0  ;;  %300 = vmatprep.subr.bf16.mxu1 %v319_v0  ;;  %v322_v4 = vld [vmem:[%s446_s1 + $0x30] sm:$0xff]   ;;  %v324_v6 = vld [vmem:[%s446_s1 + $0x28] sm:$0xff]  }
   0x3   :  { %273 = vmatpush3.bf16.msra.mxu0 %v320_v2  ;;  %308 = vmatpush3.bf16.msra.mxu1 %v320_v2  ;;  %v325_v7 = vld [vmem:[%s446_s1 + $0x60] sm:$0xff]   ;;  %v327_v9 = vld [vmem:[%s446_s1 + $0x58] sm:$0xff]   ;;  %v329_v11 = vld [vmem:[%s446_s1 + $0x50] sm:$0xff]  }
   0x4   :  { %274 = vmatprep.subr.bf16.mxu0 %v321_v3  ;;  %301 = vmatprep.subr.bf16.mxu1 %v321_v3  ;;  %v326_v8 = vld [vmem:[%s446_s1 + $0x20] sm:$0xff]   ;;  %v328_v10 = vld [vmem:[%s446_s1 + $0x18] sm:$0xff]   ;;  %v330_v14 = vld [vmem:[%s446_s1 + $0x10] sm:$0xff]  }
   0x5   :  { %v337_v12 = vld [vmem:[%s447_s0 + $0x4] ss:$8 sps:$4 sm:$0xff]   ;;  %v340_v13 = vld [vmem:[%s447_s0 + $0x14] ss:$8 sps:$4 sm:$0xff]   ;;  %v335_v23 = vld [vmem:[%s447_s0] ss:$8 sps:$4 sm:$0xff]  }
   0x6   :  { %v53_v15 = vld [vmem:[%s448_s2 + $0x10] sm:$0xff]  ;;  %v51_v16 = vld [vmem:[%s448_s2] sm:$0xff]  ;;  %v331_v17 = vld [vmem:[%s446_s1 + $0x48] sm:$0xff]   ;;  %223 = vmatprep.mubr.bf16.mxu0 %v337_v12  ;;  %231 = vmatprep.mubr.bf16.mxu1 %v340_v13 }
   0x7   :  { %275 = vmatpush3.bf16.msra.mxu0 %v322_v4  ;;  %309 = vmatpush3.bf16.msra.mxu1 %v322_v4  ;;  %v332_v18 = vld [vmem:[%s446_s1 + $0x8] sm:$0xff]   ;;  %v54_v19 = vld [vmem:[%s448_s2 + $0x18] sm:$0xff]  ;;  %v333_v21 = vld [vmem:[%s446_s1 + $0x40] sm:$0xff]  }
   0x8   :  { %276 = vmatprep.subr.bf16.mxu0 %v323_v5  ;;  %302 = vmatprep.subr.bf16.mxu1 %v323_v5  ;;  %v52_v20 = vld [vmem:[%s448_s2 + $0x8] sm:$0xff]  ;;  %v334_v22 = vld [vmem:[%s446_s1] sm:$0xff]   ;;  %v338_v24 = vld [vmem:[%s447_s0 + $0x10] ss:$8 sps:$4 sm:$0xff]  }
   0x9   :  { %67 = vperm.xlu1 %318, %v53_v15   ;;  %57 = vperm.xlu0 %317, %v51_v16  }
   0xb   :  { %277 = vmatpush3.bf16.msra.mxu0 %v324_v6  ;;  %310 = vmatpush3.bf16.msra.mxu1 %v324_v6 }
   0xc   :  { %278 = vmatprep.subr.bf16.mxu0 %v325_v7  ;;  %303 = vmatprep.subr.bf16.mxu1 %v325_v7 }
   0xd   :  { %72 = vperm.xlu1 %318, %v54_v19   ;;  %62 = vperm.xlu0 %317, %v52_v20  }
   0xf   :  { %279 = vmatpush3.bf16.msra.mxu0 %v326_v8  ;;  %311 = vmatpush3.bf16.msra.mxu1 %v326_v8 }
  0x10   :  { %280 = vmatprep.subr.bf16.mxu0 %v327_v9  ;;  %304 = vmatprep.subr.bf16.mxu1 %v327_v9 }
  0x13   :  { %281 = vmatpush3.bf16.msra.mxu0 %v328_v10  ;;  %312 = vmatpush3.bf16.msra.mxu1 %v328_v10 }
  0x14   :  { %282 = vmatprep.subr.bf16.mxu0 %v329_v11  ;;  %305 = vmatprep.subr.bf16.mxu1 %v329_v11 }
  0x17   :  { %283 = vmatpush3.bf16.msra.mxu0 %v330_v14  ;;  %313 = vmatpush3.bf16.msra.mxu1 %v330_v14 }
  0x18   :  { %284 = vmatprep.subr.bf16.mxu0 %v331_v17  ;;  %306 = vmatprep.subr.bf16.mxu1 %v331_v17 }
  0x1b   :  { %285 = vmatpush3.bf16.msra.mxu0 %v332_v18  ;;  %314 = vmatpush3.bf16.msra.mxu1 %v332_v18 }
  0x1c   :  { %286 = vmatprep.subr.bf16.mxu0 %v333_v21  ;;  %307 = vmatprep.subr.bf16.mxu1 %v333_v21 }
  0x1f   :  { %287 = vmatpush3.bf16.msra.mxu0 %v334_v22  ;;  %315 = vmatpush3.bf16.msra.mxu1 %v334_v22 }
  0x22   :  { %224 = vmatmul.mubr.bf16.vlgmr.msra.gmra.mxu0 %v335_v23  ;;  %232 = vmatmul.mubr.bf16.vlgmr.msra.gmra.mxu1 %v338_v24 }
  0x84   :  { %v68_v27 = vpop.permute.xlu1 %67  ;;  %v58_v28 = vpop.permute.xlu0 %57 }
  0x88   :  { %v73_v43 = vpop.permute.xlu1 %72  ;;  %v63_v44 = vpop.permute.xlu0 %62 }
  0xe2   :  { %v288_v25 = vpop.f32.mrf.mxu0  ;;  %v294_v26 = vpop.f32.mrf.mxu1 }
  0xe4   :  { %v289_v29 = vpop.f32.mrf.mxu0  ;;  %v295_v30 = vpop.f32.mrf.mxu1 }
  0xe5   :  { %v290_v31 = vadd.f32 %v289_v29, %v288_v25  ;;  %v296_v32 = vadd.f32 %v295_v30, %v294_v26 }
  0xe6   :  { %v291_v33 = vpop.f32.mrf.mxu0  ;;  %v297_v34 = vpop.f32.mrf.mxu1 }
  0xe7   :  { %v226_v35 = vadd.f32 %v290_v31, %v58_v28  ;;  %v234_v36 = vadd.f32 %v296_v32, %v68_v27 }
  0xe8   :  { %v292_v37 = vpop.f32.mrf.mxu0  ;;  %v298_v38 = vpop.f32.mrf.mxu1 }
  0xe9   :  { %v240_v39 = vmax.f32 %v226_v35, 0.0  ;;  %v242_v40 = vmax.f32 %v234_v36, 0.0  ;;  %v293_v41 = vadd.f32 %v292_v37, %v291_v33  ;;  %v299_v42 = vadd.f32 %v298_v38, %v297_v34 }
  0xeb   :  { %244 = vst [vmem:[%s449_s3] sm:$0xff] %v240_v39  ;;  %246 = vst [vmem:[%s449_s3 + $0x10] sm:$0xff] %v242_v40  ;;  %v229_v45 = vadd.f32 %v293_v41, %v63_v44  ;;  %v237_v46 = vadd.f32 %v299_v42, %v73_v43 }
  0xed   :  { %v241_v47 = vmax.f32 %v229_v45, 0.0  ;;  %v243_v48 = vmax.f32 %v237_v46, 0.0 }
  0xef   :  { %245 = vst [vmem:[%s449_s3 + $0x8] sm:$0xff] %v241_v47  ;;  %247 = vst [vmem:[%s449_s3 + $0x18] sm:$0xff] %v243_v48 }

// kernel: encoder_forward.9
= control target key start
LH: loop header
LB: loop body
LE: loop exit
PB: predicated region body
PF: predicated region fallthrough
CT: control target
= control target key end

     0   :  { %vm277_vm0 = vcmask 1043456   ;;  %vm1524_vm1 = vmmov 0   ;;  %vm273_vm2 = vcmask 31744   ;;  %vm351_vm5 = vcmask 130048   ;;  %s1526_s17 = smov 32   ;;  %s1988_s2 = inlined_call_operand.vmem [shape: f32[512,16], index: 2, kind: input, shape index: {}]   ;;  %s1989_s0 = inlined_call_operand.vmem [shape: f32[8,512], index: 0, kind: input, shape index: {}]   ;;  %s1990_s4 = inlined_call_operand.vmem [shape: f32[20,48], index: 4, kind: input, shape index: {}]   ;;  %s1991_s1 = inlined_call_operand.vmem [shape: f32[8,4], index: 1, kind: input, shape index: {}]   ;;  %s1992_s5 = inlined_call_operand.vmem [shape: f32[16,48], index: 5, kind: input, shape index: {}]   ;;  %s1993_s3 = inlined_call_operand.vmem [shape: f32[1,16], index: 3, kind: input, shape index: {}]   ;;  %s1994_s7 = inlined_call_operand.vmem [shape: f32[1,48], index: 7, kind: input, shape index: {}]   ;;  %s1995_s6 = inlined_call_operand.vmem [shape: f32[1,48], index: 6, kind: input, shape index: {}]   ;;  %s1996_s8 = inlined_call_operand.vmem [shape: f32[20,48], index: 8, kind: input, shape index: {}]   ;;  %s1997_s9 = inlined_call_operand.vmem [shape: f32[16,48], index: 9, kind: input, shape index: {}]   ;;  %s1998_s11 = inlined_call_operand.vmem [shape: f32[1,48], index: 11, kind: input, shape index: {}]   ;;  %s1999_s10 = inlined_call_operand.vmem [shape: f32[1,48], index: 10, kind: input, shape index: {}]   ;;  %s2000_s12 = inlined_call_operand.vmem [shape: f32[32,51], index: 12, kind: input, shape index: {}]   ;;  %s2001_s13 = inlined_call_operand.vmem [shape: f32[1,51], index: 13, kind: input, shape index: {}]   ;;  %s2002_s14 = inlined_call_operand.vmem [shape: f32[2,51], index: 14, kind: output, shape index: {}]  }
   0x1   :  { %v82_v0 = vld [vmem:[%s1988_s2 + $0xf8] sm:$0xff]  ;;  %v81_v4 = vld [vmem:[%s1988_s2 + $0xf0] sm:$0xff]  ;;  %v80_v8 = vld [vmem:[%s1988_s2 + $0xe8] sm:$0xff]  ;;  %vm1286_vm7 = vcmask 410624  }
   0x2   :  { %v114_v1 = vld [vmem:[%s1988_s2 + $0x1f8] sm:$0xff]  ;;  %1314 = vmatprep.subr.mxu0 %v82_v0  ;;  %v113_v5 = vld [vmem:[%s1988_s2 + $0x1f0] sm:$0xff]  ;;  %v112_v9 = vld [vmem:[%s1988_s2 + $0x1e8] sm:$0xff] }
   0x3   :  { %v66_v2 = vld [vmem:[%s1988_s2 + $0x78] sm:$0xff]  ;;  %1349 = vmatprep.subr.mxu1 %v114_v1  ;;  %v65_v6 = vld [vmem:[%s1988_s2 + $0x70] sm:$0xff]  ;;  %v64_v10 = vld [vmem:[%s1988_s2 + $0x68] sm:$0xff] }
   0x4   :  { %v98_v3 = vld [vmem:[%s1988_s2 + $0x178] sm:$0xff]  ;;  %1315 = vmatpush3.msra.mxu0 %v66_v2  ;;  %v97_v7 = vld [vmem:[%s1988_s2 + $0x170] sm:$0xff]  ;;  %v96_v11 = vld [vmem:[%s1988_s2 + $0x168] sm:$0xff] }
   0x5   :  { %1350 = vmatpush3.msra.mxu1 %v98_v3  ;;  %1316 = vmatprep.subr.mxu0 %v81_v4  ;;  %v79_v12 = vld [vmem:[%s1988_s2 + $0xe0] sm:$0xff]  ;;  %v78_v16 = vld [vmem:[%s1988_s2 + $0xd8] sm:$0xff]  ;;  %v77_v20 = vld [vmem:[%s1988_s2 + $0xd0] sm:$0xff] }
   0x6   :  { %1351 = vmatprep.subr.mxu1 %v113_v5  ;;  %1317 = vmatpush3.msra.mxu0 %v65_v6  ;;  %v111_v13 = vld [vmem:[%s1988_s2 + $0x1e0] sm:$0xff]  ;;  %v110_v17 = vld [vmem:[%s1988_s2 + $0x1d8] sm:$0xff]  ;;  %v109_v21 = vld [vmem:[%s1988_s2 + $0x1d0] sm:$0xff]  ;;  %v1523_v5 = vmov 0.0  }
   0x7   :  { %1352 = vmatpush3.msra.mxu1 %v97_v7  ;;  %1318 = vmatprep.subr.mxu0 %v80_v8  ;;  %v63_v14 = vld [vmem:[%s1988_s2 + $0x60] sm:$0xff]  ;;  %v62_v18 = vld [vmem:[%s1988_s2 + $0x58] sm:$0xff]  ;;  %v61_v22 = vld [vmem:[%s1988_s2 + $0x50] sm:$0xff] }
   0x8   :  { %1353 = vmatprep.subr.mxu1 %v112_v9  ;;  %v95_v15 = vld [vmem:[%s1988_s2 + $0x160] sm:$0xff]  ;;  %1319 = vmatpush3.msra.mxu0 %v64_v10  ;;  %v94_v19 = vld [vmem:[%s1988_s2 + $0x158] sm:$0xff]  ;;  %v93_v23 = vld [vmem:[%s1988_s2 + $0x150] sm:$0xff] }
   0x9   :  { %1354 = vmatpush3.msra.mxu1 %v96_v11  ;;  %1320 = vmatprep.subr.mxu0 %v79_v12  ;;  %v76_v24 = vld [vmem:[%s1988_s2 + $0xc8] sm:$0xff]  ;;  %v75_v28 = vld [vmem:[%s1988_s2 + $0xc0] sm:$0xff]  ;;  %v74_v32 = vld [vmem:[%s1988_s2 + $0xb8] sm:$0xff] }
   0xa   :  { %1355 = vmatprep.subr.mxu1 %v111_v13  ;;  %1321 = vmatpush3.msra.mxu0 %v63_v14  ;;  %v108_v25 = vld [vmem:[%s1988_s2 + $0x1c8] sm:$0xff]  ;;  %v107_v29 = vld [vmem:[%s1988_s2 + $0x1c0] sm:$0xff]  ;;  %v106_v33 = vld [vmem:[%s1988_s2 + $0x1b8] sm:$0xff] }
   0xb   :  { %1356 = vmatpush3.msra.mxu1 %v95_v15  ;;  %1322 = vmatprep.subr.mxu0 %v78_v16  ;;  %v60_v26 = vld [vmem:[%s1988_s2 + $0x48] sm:$0xff]  ;;  %v59_v30 = vld [vmem:[%s1988_s2 + $0x40] sm:$0xff]  ;;  %v58_v34 = vld [vmem:[%s1988_s2 + $0x38] sm:$0xff] }
   0xc   :  { %1357 = vmatprep.subr.mxu1 %v110_v17  ;;  %1323 = vmatpush3.msra.mxu0 %v62_v18  ;;  %v92_v27 = vld [vmem:[%s1988_s2 + $0x148] sm:$0xff]  ;;  %v91_v31 = vld [vmem:[%s1988_s2 + $0x140] sm:$0xff]  ;;  %v90_v35 = vld [vmem:[%s1988_s2 + $0x138] sm:$0xff] }
   0xd   :  { %1358 = vmatpush3.msra.mxu1 %v94_v19  ;;  %1324 = vmatprep.subr.mxu0 %v77_v20  ;;  %v73_v36 = vld [vmem:[%s1988_s2 + $0xb0] sm:$0xff]  ;;  %v72_v40 = vld [vmem:[%s1988_s2 + $0xa8] sm:$0xff]  ;;  %v71_v44 = vld [vmem:[%s1988_s2 + $0xa0] sm:$0xff] }
   0xe   :  { %1359 = vmatprep.subr.mxu1 %v109_v21  ;;  %1325 = vmatpush3.msra.mxu0 %v61_v22  ;;  %v105_v37 = vld [vmem:[%s1988_s2 + $0x1b0] sm:$0xff]  ;;  %v104_v41 = vld [vmem:[%s1988_s2 + $0x1a8] sm:$0xff]  ;;  %v103_v45 = vld [vmem:[%s1988_s2 + $0x1a0] sm:$0xff] }
   0xf   :  { %1360 = vmatpush3.msra.mxu1 %v93_v23  ;;  %1326 = vmatprep.subr.mxu0 %v76_v24  ;;  %v57_v38 = vld [vmem:[%s1988_s2 + $0x30] sm:$0xff]  ;;  %v56_v42 = vld [vmem:[%s1988_s2 + $0x28] sm:$0xff]  ;;  %v55_v46 = vld [vmem:[%s1988_s2 + $0x20] sm:$0xff] }
  0x10   :  { %1361 = vmatprep.subr.mxu1 %v108_v25  ;;  %1327 = vmatpush3.msra.mxu0 %v60_v26  ;;  %v89_v39 = vld [vmem:[%s1988_s2 + $0x130] sm:$0xff]  ;;  %v88_v43 = vld [vmem:[%s1988_s2 + $0x128] sm:$0xff]  ;;  %v87_v47 = vld [vmem:[%s1988_s2 + $0x120] sm:$0xff] }
  0x11   :  { %1362 = vmatpush3.msra.mxu1 %v92_v27  ;;  %1328 = vmatprep.subr.mxu0 %v75_v28  ;;  %v70_v48 = vld [vmem:[%s1988_s2 + $0x98] sm:$0xff]  ;;  %v69_v52 = vld [vmem:[%s1988_s2 + $0x90] sm:$0xff]  ;;  %v68_v56 = vld [vmem:[%s1988_s2 + $0x88] sm:$0xff] }
  0x12   :  { %1363 = vmatprep.subr.mxu1 %v107_v29  ;;  %1329 = vmatpush3.msra.mxu0 %v59_v30  ;;  %v102_v49 = vld [vmem:[%s1988_s2 + $0x198] sm:$0xff]  ;;  %v101_v53 = vld [vmem:[%s1988_s2 + $0x190] sm:$0xff]  ;;  %v100_v57 = vld [vmem:[%s1988_s2 + $0x188] sm:$0xff] }
  0x13   :  { %1364 = vmatpush3.msra.mxu1 %v91_v31  ;;  %1330 = vmatprep.subr.mxu0 %v74_v32  ;;  %v54_v50 = vld [vmem:[%s1988_s2 + $0x18] sm:$0xff]  ;;  %v53_v54 = vld [vmem:[%s1988_s2 + $0x10] sm:$0xff]  ;;  %v52_v58 = vld [vmem:[%s1988_s2 + $0x8] sm:$0xff] }
  0x14   :  { %1365 = vmatprep.subr.mxu1 %v106_v33  ;;  %1331 = vmatpush3.msra.mxu0 %v58_v34  ;;  %v86_v51 = vld [vmem:[%s1988_s2 + $0x118] sm:$0xff]  ;;  %v85_v55 = vld [vmem:[%s1988_s2 + $0x110] sm:$0xff]  ;;  %v84_v59 = vld [vmem:[%s1988_s2 + $0x108] sm:$0xff] }
  0x15   :  { %1366 = vmatpush3.msra.mxu1 %v90_v35  ;;  %1332 = vmatprep.subr.mxu0 %v73_v36  ;;  %v67_v60 = vld [vmem:[%s1988_s2 + $0x80] sm:$0xff]  ;;  %v48_v63 = vld [vmem:[%s1989_s0 + $0x8] sm:$0xff]  ;;  %v50_v1 = vld [vmem:[%s1989_s0 + $0x18] sm:$0xff] }
  0x16   :  { %1367 = vmatprep.subr.mxu1 %v105_v37  ;;  %1333 = vmatpush3.msra.mxu0 %v57_v38  ;;  %v99_v61 = vld [vmem:[%s1988_s2 + $0x180] sm:$0xff]  ;;  %v49_v3 = vld [vmem:[%s1989_s0 + $0x10] sm:$0xff]  ;;  %v1822_v7 = vld [vmem:[%s1992_s5 + $0x8] sm:$0xff] }
  0x17   :  { %1368 = vmatpush3.msra.mxu1 %v89_v39  ;;  %1334 = vmatprep.subr.mxu0 %v72_v40  ;;  %v51_v62 = vld [vmem:[%s1988_s2] sm:$0xff]  ;;  %v272_v4 = vld [vmem:[%s1990_s4 + $0x10] sm:$0xf]  ;;  %v271_v9 = vld [vmem:[%s1990_s4 + $0x8] sm:$0xff] }
  0x18   :  { %1369 = vmatprep.subr.mxu1 %v104_v41  ;;  %1335 = vmatpush3.msra.mxu0 %v56_v42  ;;  %v83_v0 = vld [vmem:[%s1988_s2 + $0x100] sm:$0xff] }
  0x19   :  { %1370 = vmatpush3.msra.mxu1 %v88_v43  ;;  %1336 = vmatprep.subr.mxu0 %v71_v44  ;;  %v47_v2 = vld [vmem:[%s1989_s0] sm:$0xff] }
  0x1a   :  { %1371 = vmatprep.subr.mxu1 %v103_v45  ;;  %1337 = vmatpush3.msra.mxu0 %v55_v46  ;;  %v1816_v6 = vld [vmem:[%s1991_s1] sm:$0xff] }
  0x1b   :  { %1372 = vmatpush3.msra.mxu1 %v87_v47  ;;  %1338 = vmatprep.subr.mxu0 %v70_v48  ;;  %v1833_v8 = vld [vmem:[%s1992_s5] sm:$0xff] }
  0x1c   :  { %1373 = vmatprep.subr.mxu1 %v102_v49  ;;  %1339 = vmatpush3.msra.mxu0 %v54_v50  ;;  %v270_v10 = vld [vmem:[%s1990_s4] sm:$0xff] }
  0x1d   :  { %1374 = vmatpush3.msra.mxu1 %v86_v51  ;;  %1340 = vmatprep.subr.mxu0 %v69_v52  ;;  %v1292_v13 = vld [vmem:[%s1993_s3] ss:$0 sm:$0xff]  ;;  %s1525_s3 = smov 96  }
  0x1e   :  { %1375 = vmatprep.subr.mxu1 %v101_v53  ;;  %1341 = vmatpush3.msra.mxu0 %v53_v54  ;;  %v1862_v21 = vld [vmem:[%s1994_s7] ss:$0 sm:$0xff] }
  0x1f   :  { %1376 = vmatpush3.msra.mxu1 %v85_v55  ;;  %1342 = vmatprep.subr.mxu0 %v68_v56  ;;  %v1296_v31 = vld [vmem:[%s1995_s6] ss:$0 sm:$0xff]  ;;  %s1527_s6 = smov 112  }
  0x20   :  { %1377 = vmatprep.subr.mxu1 %v100_v57  ;;  %1343 = vmatpush3.msra.mxu0 %v52_v58 }
  0x21   :  { %1378 = vmatpush3.msra.mxu1 %v84_v59  ;;  %1344 = vmatprep.subr.mxu0 %v67_v60 }
  0x22   :  { %1379 = vmatprep.subr.mxu1 %v99_v61  ;;  %1345 = vmatpush3.msra.mxu0 %v51_v62 }
  0x23   :  { %186 = vmatprep.mubr.f32.mxu0 %v48_v63  ;;  %1380 = vmatpush3.msra.mxu1 %v83_v0 }
  0x24   :  { %256 = vmatprep.mubr.f32.mxu1 %v50_v1  ;;  %187 = vmatmul.mubr.f32.vlgmr.msra.gmra.mxu0 %v47_v2 }
  0x25   :  { %257 = vmatmul.mubr.f32.vlgmr.msra.gmra.mxu1 %v49_v3  ;;  %1415 = vmatprep.subr.mxu0 %v1523_v5 }
  0x26   :  { %1417 = vmatprep.mubr.msk.f32.mxu0 %vm1524_vm1, %v1523_v5  ;;  %1416 = vmatpush3.msk.msra.mxu0 %vm277_vm0, %v272_v4 }
  0x27   :  { %1420 = vmatprep.subr.mxu1 %v1523_v5  ;;  %1427 = vmatprep.subr.mxu0 %v1523_v5 }
  0x28   :  { %1424 = vmatprep.mubr.msk.f32.mxu1 %vm1524_vm1, %v1523_v5  ;;  %1418 = vmatmul.mubr.msk.f32.vlgmr.msra.gmra.mxu0 %vm273_vm2, %v1816_v6 }
  0x29   :  { %1428 = vmatpush3.msra.mxu0 %v1822_v7  ;;  %1431 = vmatprep.mubr.msk.f32.mxu0 %vm1524_vm1, %v1523_v5 }
  0x2a   :  { %1429 = vmatprep.subr.mxu0 %v1523_v5  ;;  %1421 = vmatpush3.msra.mxu1 %v271_v9 }
  0x2b   :  { %1430 = vmatpush3.msra.mxu0 %v1833_v8  ;;  %1422 = vmatprep.subr.mxu1 %v1523_v5 }
  0x2c   :  { %1432 = vmatmul.mubr.f32.vlgmr.msra.gmra.mxu0 %v1523_v5  ;;  %1441 = vmatprep.subr.mxu0 %v1523_v5 }
  0x2d   :  { %1442 = vmatpush3.msra.mxu0 %v1822_v7  ;;  %1445 = vmatprep.mubr.msk.f32.mxu0 %vm1524_vm1, %v1523_v5 }
  0x2e   :  { %1443 = vmatprep.subr.mxu0 %v1523_v5  ;;  %1423 = vmatpush3.msra.mxu1 %v270_v10 }
  0x2f   :  { %1444 = vmatpush3.msra.mxu0 %v1833_v8  ;;  %1434 = vmatprep.subr.mxu1 %v1523_v5 }
  0x30   :  { %1455 = vmatprep.subr.mxu0 %v1523_v5 }
  0xe4   :  { %v1346_v11 = vpop.f32.mrf.mxu0 }
  0xe5   :  { %v1381_v12 = vpop.f32.mrf.mxu1 }
  0xe6   :  { %v1347_v14 = vpop.f32.mrf.mxu0 }
  0xe7   :  { %v1382_v15 = vpop.f32.mrf.mxu1  ;;  %v1348_v16 = vadd.f32 %v1347_v14, %v1346_v11 }
  0xe8   :  { %v347_v17 = vpop.f32.mrf.mxu0  ;;  %v1383_v19 = vadd.f32 %v1382_v15, %v1381_v12 }
  0xe9   :  { %v189_v18 = vadd.f32 %v1348_v16, %v1292_v13 }
  0xea   :  { %v1419_v20 = vpop.f32.mrf.mxu0 }
  0xeb   :  { %v259_v22 = vadd.f32 %v1383_v19, %v189_v18 }
  0xec   :  { %v511_v23 = vpop.f32.mrf.mxu0 }
  0xed   :  { %v262_v24 = vmax.f32 %v259_v22, 0.0  ;;  %v512_v25 = vadd.f32 %v1862_v21, %v511_v23 }
  0xee   :  { %v1433_v26 = vpop.f32.mrf.mxu0 }
  0xef   :  { %vm263_vm3 = vcmp.ne.f32.partialorder %v262_v24, %v262_v24  ;;  %523 = vrot.lane.b32.xlu0 %v512_v25, %s1525_s3  ;;  %v860_v26 = vld [vmem:[%s1996_s8 + $0x10] sm:$0xf] }
  0xf0   :  { %v264_v27 = vsel %vm263_vm3, 0.0, %v262_v24 }
  0xf1   :  { %vm265_vm4 = vcmp.eq.f32.partialorder %v264_v27, inf }
  0xf2   :  { %v266_v28 = vsel %vm265_vm4, 1.0, %v264_v27  ;;  %v1019_v27 = vld [vmem:[%s1997_s9 + $0x8] sm:$0xff] }
  0xf3   :  { %vm267_vm6 = vcmp.eq.f32.partialorder %v266_v28, -inf }
  0xf4   :  { %v1866_v29 = vsel %vm267_vm6, -1.0, %v266_v28  ;;  %v1018_v28 = vld [vmem:[%s1997_s9] sm:$0xff] }
  0xf5   :  { %1425 = vmatmul.mubr.msk.f32.vlgmr.msra.gmra.mxu1 %vm351_vm5, %v1866_v29 }
  0xf6   :  { %1435 = vmatpush3.msra.mxu1 %v1822_v7  ;;  %1438 = vmatprep.mubr.msk.f32.mxu1 %vm1524_vm1, %v1523_v5 }
  0xf7   :  { %1436 = vmatprep.subr.mxu1 %v1523_v5 }
  0xf8   :  { %1437 = vmatpush3.msra.mxu1 %v1833_v8 }
  0xf9   :  { %1448 = vmatprep.subr.mxu1 %v1523_v5 }
 0x161   :  { %v524_v39 = vpop.permute.xlu0 %523 }
 0x1b5   :  { %v421_v30 = vpop.f32.mrf.mxu1 }
 0x1b6   :  { %v422_v32 = vadd.f32 %v421_v30, %v347_v17 }
 0x1b7   :  { %v1426_v33 = vpop.f32.mrf.mxu1 }
 0x1b8   :  { %v1879_v34 = vadd.f32 %v1296_v31, %v422_v32 }
 0x1ba   :  { %v515_v35 = vadd.f32 %v512_v25, %v1879_v34  ;;  %v861_v25 = vrot.slane %v1816_v6, 6 }
 0x1bc   :  { %v1298_v36 = vmul.f32 -1.442695, %v515_v35 }
 0x1be   :  { %1493 = vpow2.f32 %v1298_v36 }
 0x1cb   :  { %v1494_v37 = vpop.eup %1493 }
 0x1cc   :  { %v519_v38 = vadd.f32 1.0, %v1494_v37 }
 0x1ce   :  { %1495 = vrcp.f32 %v519_v38 }
 0x1db   :  { %v1496_v40 = vpop.eup %1495 }
 0x1dc   :  { %v526_v41 = vmul.f32 %v1496_v40, %v524_v39  ;;  %v533_v45 = vsub.f32 1.0, %v1496_v40  ;;  %v539_v47 = vmul.f32 0.0, %v1496_v40  ;;  %v1309_v40 = vld [vmem:[%s1998_s11] ss:$0 sm:$0xff] }
 0x1de   :  { %528 = vrot.lane.b32.xlu0 %v526_v41, %s1526_s17 }
 0x250   :  { %v529_v42 = vpop.permute.xlu0 %528 }
 0x251   :  { %v531_v43 = vadd.f32 %v529_v42, %v1879_v34 }
 0x253   :  { %1497 = vtanh.f32 %v531_v43 }
 0x260   :  { %v1498_v44 = vpop.eup %1497 }
 0x261   :  { %535 = vrot.lane.b32.xlu1 %v1498_v44, %s1527_s6  ;;  %v859_v44 = vld [vmem:[%s1996_s8 + $0x8] sm:$0xff] }
 0x2d3   :  { %v536_v46 = vpop.permute.xlu1 %535 }
 0x2d4   :  { %v538_v48 = vmul.f32 %v536_v46, %v533_v45  ;;  %v858_v46 = vld [vmem:[%s1996_s8] sm:$0xff] }
 0x2d6   :  { %v540_v49 = vadd.f32 %v539_v47, %v538_v48  ;;  %v937_v47 = vrot.slane %v1866_v29, 6  ;;  %v1308_v29 = vld [vmem:[%s1999_s10] ss:$0 sm:$0xff] }
 0x2d8   :  { %542 = vrot.lane.b32.xlu1 %v540_v49, %s1527_s6  ;;  %v642_v1 = vrot.slane %v540_v49, 6 }
 0x34a   :  { %v543_v50 = vpop.permute.xlu1 %542 }
 0x34b   :  { %1439 = vmatmul.mubr.msk.f32.vlgmr.msra.gmra.mxu1 %vm351_vm5, %v543_v50 }
 0x34c   :  { %1449 = vmatpush3.msra.mxu1 %v1822_v7  ;;  %1452 = vmatprep.mubr.msk.f32.mxu1 %vm1524_vm1, %v1523_v5 }
 0x34d   :  { %1450 = vmatprep.subr.mxu1 %v1523_v5 }
 0x34e   :  { %1451 = vmatpush3.msra.mxu1 %v1833_v8 }
 0x34f   :  { %1460 = vmatprep.subr.mxu1 %v1523_v5 }
 0x40b   :  { %v612_v51 = vpop.f32.mrf.mxu1 }
 0x40c   :  { %v613_v52 = vadd.f32 %v1862_v21, %v612_v51 }
 0x40d   :  { %v1440_v53 = vpop.f32.mrf.mxu1 }
 0x40e   :  { %v617_v54 = vrot.slane %v613_v52, 6 }
 0x410   :  { %626 = vrot.lane.b32.xlu0 %v617_v54, %s1525_s3  ;;  %v619_v55 = vadd.f32 %v617_v54, %v1879_v34 }
 0x412   :  { %v1300_v56 = vmul.f32 -1.442695, %v619_v55 }
 0x414   :  { %1499 = vpow2.f32 %v1300_v56 }
 0x421   :  { %v1500_v57 = vpop.eup %1499 }
 0x422   :  { %v623_v58 = vadd.f32 1.0, %v1500_v57 }
 0x424   :  { %1501 = vrcp.f32 %v623_v58 }
 0x431   :  { %v1502_v59 = vpop.eup %1501 }
 0x432   :  { %v636_v2 = vsub.f32 1.0, %v1502_v59  ;;  %v644_v4 = vmul.f32 %v1502_v59, %v642_v1 }
 0x482   :  { %v627_v60 = vpop.permute.xlu0 %626 }
 0x483   :  { %v629_v61 = vmul.f32 %v1502_v59, %v627_v60 }
 0x485   :  { %631 = vrot.lane.b32.xlu1 %v629_v61, %s1526_s17 }
 0x4f7   :  { %v632_v62 = vpop.permute.xlu1 %631 }
 0x4f8   :  { %v634_v63 = vadd.f32 %v632_v62, %v1879_v34 }
 0x4fa   :  { %1503 = vtanh.f32 %v634_v63 }
 0x507   :  { %v1504_v0 = vpop.eup %1503 }
 0x508   :  { %638 = vrot.lane.b32.xlu0 %v1504_v0, %s1527_s6 }
 0x57a   :  { %v639_v3 = vpop.permute.xlu0 %638 }
 0x57b   :  { %v641_v7 = vmul.f32 %v639_v3, %v636_v2 }
 0x57d   :  { %v645_v8 = vadd.f32 %v644_v4, %v641_v7 }
 0x57f   :  { %v647_v9 = vrot.slane %v645_v8, 2  ;;  %v748_v30 = vrot.slane %v645_v8, 6 }
 0x581   :  { %648 = vrot.lane.b32.xlu1 %v647_v9, %s1527_s6 }
 0x5f3   :  { %v649_v10 = vpop.permute.xlu1 %648 }
 0x5f4   :  { %1446 = vmatmul.mubr.msk.f32.vlgmr.msra.gmra.mxu0 %vm351_vm5, %v649_v10 }
 0x5f5   :  { %1457 = vmatprep.mubr.msk.f32.mxu0 %vm1524_vm1, %v1523_v5  ;;  %1456 = vmatpush3.msk.msra.mxu0 %vm277_vm0, %v860_v26 }
 0x5f6   :  { %1467 = vmatprep.subr.mxu0 %v1523_v5 }
 0x5f8   :  { %1458 = vmatmul.mubr.msk.f32.vlgmr.msra.gmra.mxu0 %vm273_vm2, %v861_v25 }
 0x5f9   :  { %1468 = vmatpush3.msra.mxu0 %v1019_v27  ;;  %1471 = vmatprep.mubr.msk.f32.mxu0 %vm1524_vm1, %v1523_v5 }
 0x5fa   :  { %1469 = vmatprep.subr.mxu0 %v1523_v5 }
 0x5fb   :  { %1470 = vmatpush3.msra.mxu0 %v1018_v28 }
 0x5fc   :  { %1472 = vmatmul.mubr.f32.vlgmr.msra.gmra.mxu0 %v1523_v5  ;;  %1481 = vmatprep.subr.mxu0 %v1523_v5 }
 0x5fd   :  { %1485 = vmatprep.mubr.msk.f32.mxu0 %vm1524_vm1, %v1523_v5 }
 0x6b4   :  { %v718_v11 = vpop.f32.mrf.mxu0 }
 0x6b5   :  { %v719_v12 = vadd.f32 %v1862_v21, %v718_v11 }
 0x6b6   :  { %v1447_v13 = vpop.f32.mrf.mxu0 }
 0x6b7   :  { %v723_v14 = vrot.slane %v719_v12, 4  ;;  %v1126_v12 = vld [vmem:[%s2000_s12 + $0x18] sm:$0xff]  ;;  %v1125_v13 = vld [vmem:[%s2000_s12 + $0x10] sm:$0xff] }
 0x6b8   :  { %v933_v38 = vpop.f32.mrf.mxu0 }
 0x6b9   :  { %732 = vrot.lane.b32.xlu0 %v723_v14, %s1525_s3  ;;  %v725_v15 = vadd.f32 %v723_v14, %v1879_v34 }
 0x6ba   :  { %v1459_v39 = vpop.f32.mrf.mxu0 }
 0x6bb   :  { %v1302_v16 = vmul.f32 -1.442695, %v725_v15  ;;  %v1123_v15 = vld [vmem:[%s2000_s12] sm:$0xff] }
 0x6bc   :  { %v1093_v41 = vpop.f32.mrf.mxu0 }
 0x6bd   :  { %1505 = vpow2.f32 %v1302_v16  ;;  %v1094_v42 = vadd.f32 %v1309_v40, %v1093_v41 }
 0x6be   :  { %v1473_v43 = vpop.f32.mrf.mxu0 }
 0x6ca   :  { %v1506_v17 = vpop.eup %1505 }
 0x6cb   :  { %v729_v18 = vadd.f32 1.0, %v1506_v17 }
 0x6cd   :  { %1507 = vrcp.f32 %v729_v18 }
 0x6da   :  { %v1508_v19 = vpop.eup %1507 }
 0x6db   :  { %v742_v31 = vsub.f32 1.0, %v1508_v19  ;;  %v750_v33 = vmul.f32 %v1508_v19, %v748_v30 }
 0x72b   :  { %v733_v20 = vpop.permute.xlu0 %732 }
 0x72c   :  { %v735_v22 = vmul.f32 %v1508_v19, %v733_v20 }
 0x72e   :  { %737 = vrot.lane.b32.xlu1 %v735_v22, %s1526_s17 }
 0x7a0   :  { %v738_v23 = vpop.permute.xlu1 %737 }
 0x7a1   :  { %v740_v24 = vadd.f32 %v738_v23, %v1879_v34 }
 0x7a3   :  { %1509 = vtanh.f32 %v740_v24 }
 0x7b0   :  { %v1510_v6 = vpop.eup %1509 }
 0x7b1   :  { %744 = vrot.lane.b32.xlu0 %v1510_v6, %s1527_s6 }
 0x823   :  { %v745_v32 = vpop.permute.xlu0 %744 }
 0x824   :  { %v747_v35 = vmul.f32 %v745_v32, %v742_v31 }
 0x826   :  { %v1929_v36 = vadd.f32 %v750_v33, %v747_v35  ;;  %v1313_v33 = vld [vmem:[%s2001_s13] ss:$0 sm:$0xff] }
 0x828   :  { %v753_v37 = vrot.slane %v1929_v36, 4  ;;  %v854_v22 = vrot.slane %v1929_v36, 6 }
 0x82a   :  { %754 = vrot.lane.b32.xlu1 %v753_v37, %s1527_s6 }
 0x82e   :  { %1105 = vrot.lane.b32.xlu1 %v1094_v42, %s1525_s3 }
 0x89c   :  { %v755_v45 = vpop.permute.xlu1 %754 }
 0x89d   :  { %1453 = vmatmul.mubr.msk.f32.vlgmr.msra.gmra.mxu1 %vm351_vm5, %v755_v45 }
 0x89e   :  { %1461 = vmatpush3.msra.mxu1 %v859_v44  ;;  %1464 = vmatprep.mubr.msk.f32.mxu1 %vm1524_vm1, %v1523_v5 }
 0x89f   :  { %1462 = vmatprep.subr.mxu1 %v1523_v5 }
 0x8a0   :  { %1463 = vmatpush3.msra.mxu1 %v858_v46  ;;  %v1106_v60 = vpop.permute.xlu1 %1105 }
 0x8a1   :  { %1465 = vmatmul.mubr.msk.f32.vlgmr.msra.gmra.mxu1 %vm351_vm5, %v937_v47  ;;  %1474 = vmatprep.subr.mxu1 %v1523_v5 }
 0x8a2   :  { %1478 = vmatprep.mubr.msk.f32.mxu1 %vm1524_vm1, %v1523_v5  ;;  %1475 = vmatpush3.msra.mxu1 %v1126_v12 }
 0x8a3   :  { %1476 = vmatprep.subr.mxu1 %v1523_v5 }
 0x8a4   :  { %1477 = vmatpush3.msra.mxu1 %v1125_v13 }
 0x95d   :  { %v824_v48 = vpop.f32.mrf.mxu1 }
 0x95e   :  { %v825_v49 = vadd.f32 %v1862_v21, %v824_v48 }
 0x95f   :  { %v1454_v50 = vpop.f32.mrf.mxu1 }
 0x960   :  { %v829_v51 = vrot.slane %v825_v49, 2 }
 0x961   :  { %v1006_v52 = vpop.f32.mrf.mxu1 }
 0x962   :  { %v1007_v53 = vadd.f32 %v1006_v52, %v933_v38  ;;  %838 = vrot.lane.b32.xlu0 %v829_v51, %s1525_s3  ;;  %v831_v62 = vadd.f32 %v829_v51, %v1879_v34 }
 0x963   :  { %v1466_v54 = vpop.f32.mrf.mxu1 }
 0x964   :  { %v1017_v55 = vadd.f32 %v1308_v29, %v1007_v53  ;;  %v1304_v63 = vmul.f32 -1.442695, %v831_v62 }
 0x966   :  { %v1097_v56 = vadd.f32 %v1094_v42, %v1017_v55 }
 0x968   :  { %v1310_v57 = vmul.f32 -1.442695, %v1097_v56 }
 0x96a   :  { %1511 = vpow2.f32 %v1310_v57 }
 0x977   :  { %v1512_v58 = vpop.eup %1511 }
 0x978   :  { %v1101_v59 = vadd.f32 1.0, %v1512_v58 }
 0x97a   :  { %1513 = vrcp.f32 %v1101_v59 }
 0x97b   :  { %1515 = vpow2.f32 %v1304_v63 }
 0x987   :  { %v1514_v21 = vpop.eup %1513 }
 0x988   :  { %v1108_v61 = vmul.f32 %v1514_v21, %v1106_v60  ;;  %v1516_v0 = vpop.eup %1515  ;;  %v1115_v16 = vsub.f32 1.0, %v1514_v21  ;;  %v1121_v18 = vmul.f32 0.0, %v1514_v21 }
 0x989   :  { %v835_v1 = vadd.f32 1.0, %v1516_v0 }
 0x98a   :  { %1110 = vrot.lane.b32.xlu1 %v1108_v61, %s1526_s17 }
 0x98b   :  { %1517 = vrcp.f32 %v835_v1 }
 0x998   :  { %v1518_v2 = vpop.eup %1517 }
 0x999   :  { %v848_v23 = vsub.f32 1.0, %v1518_v2  ;;  %v856_v25 = vmul.f32 %v1518_v2, %v854_v22 }
 0x9d4   :  { %v839_v3 = vpop.permute.xlu0 %838 }
 0x9d5   :  { %v841_v4 = vmul.f32 %v1518_v2, %v839_v3 }
 0x9d7   :  { %843 = vrot.lane.b32.xlu0 %v841_v4, %s1526_s17 }
 0x9fc   :  { %v1111_v7 = vpop.permute.xlu1 %1110 }
 0x9fd   :  { %v1113_v8 = vadd.f32 %v1111_v7, %v1017_v55 }
 0x9ff   :  { %1519 = vtanh.f32 %v1113_v8 }
 0xa0c   :  { %v1520_v9 = vpop.eup %1519 }
 0xa0d   :  { %1117 = vrot.lane.b32.xlu1 %v1520_v9, %s1527_s6 }
 0xa49   :  { %v844_v10 = vpop.permute.xlu0 %843 }
 0xa4a   :  { %v846_v11 = vadd.f32 %v844_v10, %v1879_v34  ;;  %v1124_v34 = vld [vmem:[%s2000_s12 + $0x8] sm:$0xff] }
 0xa4b   :  { %1482 = vmatpush3.msra.mxu0 %v1124_v34 }
 0xa4c   :  { %1521 = vtanh.f32 %v846_v11  ;;  %1483 = vmatprep.subr.mxu0 %v1523_v5 }
 0xa4d   :  { %1484 = vmatpush3.msra.mxu0 %v1123_v15 }
 0xa59   :  { %v1522_v14 = vpop.eup %1521 }
 0xa5a   :  { %850 = vrot.lane.b32.xlu0 %v1522_v14, %s1527_s6 }
 0xa7f   :  { %v1118_v17 = vpop.permute.xlu1 %1117 }
 0xa80   :  { %v1120_v19 = vmul.f32 %v1118_v17, %v1115_v16 }
 0xa82   :  { %v1122_v20 = vadd.f32 %v1121_v18, %v1120_v19 }
 0xa84   :  { %1128 = vrot.lane.b32.xlu0 %v1122_v20, %s1527_s6 }
 0xacc   :  { %v851_v24 = vpop.permute.xlu0 %850 }
 0xacd   :  { %v853_v26 = vmul.f32 %v851_v24, %v848_v23 }
 0xacf   :  { %v857_v27 = vadd.f32 %v856_v25, %v853_v26 }
 0xad1   :  { %v1203_v28 = vrot.slane %v857_v27, 6 }
 0xad3   :  { %1204 = vrot.lane.b32.xlu1 %v1203_v28, %s1527_s6 }
 0xaf6   :  { %v1129_v6 = vpop.permute.xlu0 %1128 }
 0xaf7   :  { %1479 = vmatmul.mubr.msk.f32.vlgmr.msra.gmra.mxu1 %vm351_vm5, %v1129_v6 }
 0xb45   :  { %v1205_v5 = vpop.permute.xlu1 %1204 }
 0xb46   :  { %1486 = vmatmul.mubr.msk.f32.vlgmr.msra.gmra.mxu0 %vm351_vm5, %v1205_v5 }
 0xbb7   :  { %v1198_v30 = vpop.f32.mrf.mxu1 }
 0xbb9   :  { %v1480_v31 = vpop.f32.mrf.mxu1 }
 0xc06   :  { %v1274_v32 = vpop.f32.mrf.mxu0 }
 0xc07   :  { %v1275_v35 = vadd.f32 %v1274_v32, %v1198_v30 }
 0xc08   :  { %v1487_v36 = vpop.f32.mrf.mxu0 }
 0xc09   :  { %v1285_v37 = vadd.f32 %v1313_v33, %v1275_v35 }
 0xc0b   :  { %1287 = vst.msk [vmem:[%s2002_s14] sm:$0x3] %vm1286_vm7, %v1285_v37 }

</bundles_post_ra>
